<compile_context>
chip_gen: v5e
topology: v5e:2x2
jax: 0.10.0
libtpu: 0.0.40
codegen_flags: <defaults>
</compile_context>

<pallas_src>
import jax
import jax.numpy as jnp
from jax import lax
from jax.experimental import pallas as pl
from jax.experimental.pallas import tpu as pltpu

EPS = 1e-5

# MXU operand / activation-staging dtype. Set to jnp.bfloat16 on v5e/v6e/v7x to halve
# VMEM scratch + DMA bytes and hit the native MXU operand path (matmul accumulation,
# BN statistics and all element-wise math stay float32 regardless). float32 default
# matches the PyTorch module closely for the correctness check.
MXU_DTYPE = jnp.float32


def _conv3x3_body(xb, w_ref, y_ref, st_ref, pad_ref):
    """Per-block body shared by both convs: 3x3 'same' conv as 3 dy matmuls with the
    dx taps folded into the contraction dim, plus per-block BatchNorm partial stats
    (mean, M2) computed while the f32 accumulator is hot.

    xb      : (1, H, W, Cin)       activation block, MXU_DTYPE
    w_ref   : (3, 3*Cin, Cout)     per-dy matmul RHS, rows ordered (dx, cin)
    y_ref   : (1, H, W, Cout) f32  pre-BN conv output
    st_ref  : (1, 2, Cout)    f32  [mean_block, M2_block]
    pad_ref : (1, H+2, W, 3*Cin)   VMEM scratch (dy halo rows, dx folded into lanes)
    """
    _, H, W, c_in = xb.shape
    c_out = w_ref.shape[-1]
    HW = H * W

    # --- dx shifts built in-register and folded onto the channel (lane) axis. ---
    zc = jnp.zeros((1, H, 1, c_in), xb.dtype)
    left = jnp.concatenate([zc, xb[:, :, : W - 1, :]], axis=2)    # x[.., w-1, ..]
    right = jnp.concatenate([xb[:, :, 1:, :], zc], axis=2)        # x[.., w+1, ..]
    xcat = jnp.concatenate([left, xb, right], axis=3)             # (1, H, W, 3*Cin)

    # --- dy halo: two contiguous zero row-planes + one contiguous interior store. ---
    zrow = jnp.zeros((1, 1, W, 3 * c_in), pad_ref.dtype)
    pad_ref[:, 0:1, :, :] = zrow
    pad_ref[:, H + 1:H + 2, :, :] = zrow
    pad_ref[:, 1:H + 1, :, :] = xcat

    # --- 3 MXU matmuls with K = 3*Cin, f32 accumulation. ---
    acc = jnp.zeros((HW, c_out), jnp.float32)
    for dy in range(3):
        lhs = pad_ref[:, dy:dy + H, :, :].reshape(HW, 3 * c_in)
        acc = acc + jnp.dot(lhs, w_ref[dy], preferred_element_type=jnp.float32)

    # --- BN partial statistics fused into the conv epilogue (per-block, biased). ---
    inv = 1.0 / float(HW)
    mean = jnp.sum(acc, axis=0, keepdims=True) * inv              # (1, Cout)
    d = acc - mean
    m2 = jnp.sum(d * d, axis=0, keepdims=True)                    # sum squared devs

    y_ref[...] = acc.reshape(1, H, W, c_out)
    st_ref[:, 0:1, :] = mean.reshape(1, 1, c_out)
    st_ref[:, 1:2, :] = m2.reshape(1, 1, c_out)


def _make_conv_stats_kernel(with_bn_relu_prologue):
    """Kernel factory: optional BN(scale,shift)+ReLU prologue, then conv + stats."""
    if with_bn_relu_prologue:
        def kernel(x_ref, s_ref, t_ref, w_ref, y_ref, st_ref, pad_ref):
            c = s_ref.shape[-1]
            s = s_ref[...].reshape(1, 1, 1, c)
            t = t_ref[...].reshape(1, 1, 1, c)
            xb = jnp.maximum(x_ref[...].astype(jnp.float32) * s + t, 0.0)
            _conv3x3_body(xb.astype(pad_ref.dtype), w_ref, y_ref, st_ref, pad_ref)
    else:
        def kernel(x_ref, w_ref, y_ref, st_ref, pad_ref):
            _conv3x3_body(x_ref[...].astype(pad_ref.dtype), w_ref, y_ref, st_ref,
                          pad_ref)
    return kernel


def _bn_relu_kernel(x_ref, s_ref, t_ref, o_ref):
    """Final BN2 + ReLU (element-wise, per batch block)."""
    c = s_ref.shape[-1]
    s = s_ref[...].reshape(1, 1, 1, c)
    t = t_ref[...].reshape(1, 1, 1, c)
    o_ref[...] = jnp.maximum(x_ref[...] * s + t, 0.0)


# ----------------------------- wrapper-side helpers -----------------------------

def _dy_major_weights(w_oihw):
    # (Cout, Cin, 3, 3) OIHW -> (3, 3*Cin, Cout): one (3*Cin, Cout) RHS per dy tap,
    # rows ordered (dx, cin) to match the in-kernel channel-folded LHS.
    c_out, c_in = w_oihw.shape[0], w_oihw.shape[1]
    w = jnp.transpose(w_oihw, (2, 3, 1, 0))                       # (dy, dx, Cin, Cout)
    return w.reshape(3, 3 * c_in, c_out).astype(MXU_DTYPE)


def _combine_bn_stats(stats, count):
    """Chan's parallel-variance merge of per-block (mean, M2) pairs into global biased
    mean/var over (N, H, W). stats: (nblocks, 2, C) f32; every block has `count`
    elements per channel. Tiny (C,)-vector work between pallas_calls."""
    mean = stats[0, 0]
    m2 = stats[0, 1]
    n = float(count)
    for i in range(1, stats.shape[0]):
        delta = stats[i, 0] - mean
        tot = n + count
        mean = mean + delta * (count / tot)
        m2 = m2 + stats[i, 1] + delta * delta * (n * count / tot)
        n = tot
    return mean, m2 / n                                           # biased variance


def _bn_affine(mean, var, gamma, beta):
    scale = gamma.astype(jnp.float32) * lax.rsqrt(var + EPS)
    shift = beta.astype(jnp.float32) - mean * scale
    return scale.reshape(1, -1), shift.reshape(1, -1)


def double_conv(x_nchw, params):
    """Pallas implementation of DoubleConv.forward (training-mode BN semantics).
    x_nchw: (N, Cin, H, W) -> (N, Cout, H, W)."""
    w1, _b1, g1, bt1, w2, _b2, g2, bt2 = params   # conv biases cancel under BN
    N, Cin, H, W = x_nchw.shape
    Cout = w1.shape[0]

    # Module I/O contract is NCHW (PyTorch); kernels work channels-last so channels sit
    # on the 128-lane axis. In a full UNet keep activations NHWC across modules.
    x = jnp.transpose(x_nchw, (0, 2, 3, 1)).astype(MXU_DTYPE)

    w1k = _dy_major_weights(w1)                                    # (3, 3*Cin,  Cout)
    w2k = _dy_major_weights(w2)                                    # (3, 3*Cout, Cout)

    cparams = pltpu.CompilerParams(
        # One block per batch element; blocks are independent -> "parallel" (sharded
        # across v7x's 2 TensorCores; harmless on single-TC v5e/v6e).
        dimension_semantics=("parallel",),
        # Conservative budget valid on v5e/v6e (128 MiB) and v7x (64 MiB physical).
        # Per-block footprint here is <1 MiB; re-derive together with the block size
        # (batch block / H row-bands) when scaling to real UNet shapes.
        vmem_limit_bytes=32 * 1024 * 1024)

    count = float(H * W)                                           # elems per block

    def conv_stats_call(act, w_dy, c_in, scale=None, shift=None):
        c_out = w_dy.shape[-1]
        with_prologue = scale is not None
        kernel = _make_conv_stats_kernel(with_prologue)
        in_specs = [pl.BlockSpec((1, H, W, c_in), lambda b: (b, 0, 0, 0))]
        args = [act]
        if with_prologue:
            # BN scale/shift vectors: constant index map (DMA'd once).
            in_specs += [pl.BlockSpec((1, c_in), lambda b: (0, 0))] * 2
            args += [scale, shift]
        # Per-dy weights: constant index map (DMA'd once, not per grid step).
        in_specs += [pl.BlockSpec(w_dy.shape, lambda b: (0, 0, 0))]
        args += [w_dy]
        return pl.pallas_call(
            kernel,
            grid=(N,),
            in_specs=in_specs,
            out_specs=(pl.BlockSpec((1, H, W, c_out), lambda b: (b, 0, 0, 0)),
                       pl.BlockSpec((1, 2, c_out), lambda b: (b, 0, 0))),
            out_shape=(jax.ShapeDtypeStruct((N, H, W, c_out), jnp.float32),
                       jax.ShapeDtypeStruct((N, 2, c_out), jnp.float32)),
            scratch_shapes=[pltpu.VMEM((1, H + 2, W, 3 * c_in), MXU_DTYPE)],
            compiler_params=cparams,
        )(*args)

    # conv1 (+ per-block BN1 partial stats)
    y1, st1 = conv_stats_call(x, w1k, Cin)
    m1, v1 = _combine_bn_stats(st1, count)
    s1, t1 = _bn_affine(m1, v1, g1, bt1)

    # bn1 + relu + conv2 (+ per-block BN2 partial stats)
    y2, st2 = conv_stats_call(y1, w2k, Cout, s1, t1)
    m2, v2 = _combine_bn_stats(st2, count)
    s2, t2 = _bn_affine(m2, v2, g2, bt2)

    # bn2 + relu
    out_nhwc = pl.pallas_call(
        _bn_relu_kernel,
        grid=(N,),
        in_specs=[pl.BlockSpec((1, H, W, Cout), lambda b: (b, 0, 0, 0)),
                  pl.BlockSpec((1, Cout), lambda b: (0, 0)),
                  pl.BlockSpec((1, Cout), lambda b: (0, 0))],
        out_specs=pl.BlockSpec((1, H, W, Cout), lambda b: (b, 0, 0, 0)),
        out_shape=jax.ShapeDtypeStruct((N, H, W, Cout), jnp.float32),
        compiler_params=cparams,
    )(y2, s2, t2)

    return jnp.transpose(out_nhwc, (0, 3, 1, 2))                   # NHWC -> NCHW


# ----------------------------- reference & self-test -----------------------------

def _reference(x_nchw, params):
    """Plain-JAX mirror of the PyTorch DoubleConv forward (training-mode BN)."""
    w1, b1, g1, bt1, w2, b2, g2, bt2 = params

    def conv(x, w, b):
        y = lax.conv_general_dilated(
            x.astype(jnp.float32), w.astype(jnp.float32), (1, 1), 'SAME',
            dimension_numbers=('NCHW', 'OIHW', 'NCHW'),
            preferred_element_type=jnp.float32,
            precision=lax.Precision.HIGHEST)
        return y + b[None, :, None, None]

    def bn(x, g, bt):
        mean = jnp.mean(x, axis=(0, 2, 3), keepdims=True)
        var = jnp.var(x, axis=(0, 2, 3), keepdims=True)            # biased
        return (x - mean) / jnp.sqrt(var + EPS) * g[None, :, None, None] \
            + bt[None, :, None, None]

    h = jax.nn.relu(bn(conv(x_nchw.astype(jnp.float32), w1, b1), g1, bt1))
    return jax.nn.relu(bn(conv(h, w2, b2), g2, bt2))


if __name__ == "__main__":
    N, Cin, Cout, H, W = 2, 4, 8, 16, 16

    key = jax.random.PRNGKey(0)
    ks = jax.random.split(key, 9)
    w1 = 0.2 * jax.random.normal(ks[0], (Cout, Cin, 3, 3), jnp.float32)
    b1 = 0.1 * jax.random.normal(ks[1], (Cout,), jnp.float32)
    g1 = 1.0 + 0.1 * jax.random.normal(ks[2], (Cout,), jnp.float32)
    bt1 = 0.1 * jax.random.normal(ks[3], (Cout,), jnp.float32)
    w2 = 0.2 * jax.random.normal(ks[4], (Cout, Cout, 3, 3), jnp.float32)
    b2 = 0.1 * jax.random.normal(ks[5], (Cout,), jnp.float32)
    g2 = 1.0 + 0.1 * jax.random.normal(ks[6], (Cout,), jnp.float32)
    bt2 = 0.1 * jax.random.normal(ks[7], (Cout,), jnp.float32)
    params = (w1, b1, g1, bt1, w2, b2, g2, bt2)

    x = jax.random.normal(ks[8], (N, Cin, H, W), jnp.float32)

    out = jax.block_until_ready(jax.jit(double_conv)(x, params))
    ref = jax.block_until_ready(_reference(x, params))

    assert out.shape == (N, Cout, H, W), out.shape
    # Tolerance absorbs a possible reduced-precision (bf16-pass) MXU evaluation of the
    # f32 matmuls vs. the HIGHEST-precision XLA reference; structural errors would be
    # O(1), and the observed mismatch is typically far below this.
    assert jnp.allclose(out, ref, rtol=2e-2, atol=2e-2), \
        float(jnp.max(jnp.abs(out - ref)))
    print("KERNEL_OK")
</pallas_src>

<mosaic_0001>
module attributes {stable_mosaic.version = 11 : i64} {
  func.func @kernel(%arg0: i32, %arg1: memref<1x16x16x4xf32, #tpu.memory_space<vmem>>, %arg2: memref<3x12x8xf32, #tpu.memory_space<vmem>>, %arg3: memref<1x16x16x8xf32, #tpu.memory_space<vmem>>, %arg4: memref<1x2x8xf32, #tpu.memory_space<vmem>>, %arg5: memref<1x18x16x12xf32, #tpu.memory_space<vmem>>) attributes {dimension_semantics = [#tpu.dimension_semantics<parallel>], iteration_bounds = array<i64: 2>, scalar_prefetch = 0 : i64, scratch_operands = 1 : i64, tpu.core_type = #tpu.core_type<tc>, window_params = [{transform_indices = @transform_0, window_bounds = array<i64: 1, 16, 16, 4>}, {pipeline_mode = #tpu.pipeline_mode<synchronous>, transform_indices = @transform_1, window_bounds = array<i64: 3, 12, 8>}, {transform_indices = @transform_2, window_bounds = array<i64: 1, 16, 16, 8>}, {transform_indices = @transform_3, window_bounds = array<i64: 1, 2, 8>}]} {
    %c0 = arith.constant 0 : index
    %c0_0 = arith.constant 0 : index
    %c0_1 = arith.constant 0 : index
    %c0_2 = arith.constant 0 : index
    %0 = vector.load %arg1[%c0, %c0_0, %c0_1, %c0_2] : memref<1x16x16x4xf32, #tpu.memory_space<vmem>>, vector<1x16x16x4xf32>
    %cst = arith.constant 0.000000e+00 : f32
    %1 = vector.broadcast %cst : f32 to vector<1x16x1x4xf32>
    %2 = vector.extract_strided_slice %0 {offsets = [0, 0, 0, 0], sizes = [1, 16, 15, 4], strides = [1, 1, 1, 1]} : vector<1x16x16x4xf32> to vector<1x16x15x4xf32>
    %3 = tpu.concatenate %1, %2 in 2 : vector<1x16x1x4xf32>, vector<1x16x15x4xf32> -> vector<1x16x16x4xf32>
    %4 = vector.extract_strided_slice %0 {offsets = [0, 0, 1, 0], sizes = [1, 16, 15, 4], strides = [1, 1, 1, 1]} : vector<1x16x16x4xf32> to vector<1x16x15x4xf32>
    %5 = tpu.concatenate %4, %1 in 2 : vector<1x16x15x4xf32>, vector<1x16x1x4xf32> -> vector<1x16x16x4xf32>
    %6 = tpu.concatenate %3, %0, %5 in 3 : vector<1x16x16x4xf32>, vector<1x16x16x4xf32>, vector<1x16x16x4xf32> -> vector<1x16x16x12xf32>
    %cst_3 = arith.constant 0.000000e+00 : f32
    %7 = vector.broadcast %cst_3 : f32 to vector<1x1x16x12xf32>
    %c0_4 = arith.constant 0 : index
    %c0_5 = arith.constant 0 : index
    %c0_6 = arith.constant 0 : index
    %c0_7 = arith.constant 0 : index
    %8 = vector.load %arg5[%c0_4, %c0_5, %c0_6, %c0_7] : memref<1x18x16x12xf32, #tpu.memory_space<vmem>>, vector<1x1x16x12xf32>
    tpu.vector_store %arg5[%c0_4, %c0_5, %c0_6, %c0_7], %7 {strides = array<i32>} : memref<1x18x16x12xf32, #tpu.memory_space<vmem>>, vector<1x1x16x12xf32>,
    %c0_8 = arith.constant 0 : index
    %c17 = arith.constant 17 : index
    %c0_9 = arith.constant 0 : index
    %c0_10 = arith.constant 0 : index
    %9 = vector.load %arg5[%c0_8, %c17, %c0_9, %c0_10] : memref<1x18x16x12xf32, #tpu.memory_space<vmem>>, vector<1x1x16x12xf32>
    tpu.vector_store %arg5[%c0_8, %c17, %c0_9, %c0_10], %7 {strides = array<i32>} : memref<1x18x16x12xf32, #tpu.memory_space<vmem>>, vector<1x1x16x12xf32>,
    %c0_11 = arith.constant 0 : index
    %c1 = arith.constant 1 : index
    %c0_12 = arith.constant 0 : index
    %c0_13 = arith.constant 0 : index
    %10 = vector.load %arg5[%c0_11, %c1, %c0_12, %c0_13] : memref<1x18x16x12xf32, #tpu.memory_space<vmem>>, vector<1x16x16x12xf32>
    tpu.vector_store %arg5[%c0_11, %c1, %c0_12, %c0_13], %6 {strides = array<i32>} : memref<1x18x16x12xf32, #tpu.memory_space<vmem>>, vector<1x16x16x12xf32>,
    %cst_14 = arith.constant 0.000000e+00 : f32
    %11 = vector.broadcast %cst_14 : f32 to vector<256x8xf32>
    %c0_15 = arith.constant 0 : index
    %c0_16 = arith.constant 0 : index
    %c0_17 = arith.constant 0 : index
    %c0_18 = arith.constant 0 : index
    %12 = vector.load %arg5[%c0_15, %c0_16, %c0_17, %c0_18] : memref<1x18x16x12xf32, #tpu.memory_space<vmem>>, vector<1x16x16x12xf32>
    %13 = vector.shape_cast %12 : vector<1x16x16x12xf32> to vector<256x12xf32>
    %c0_19 = arith.constant 0 : index
    %c0_20 = arith.constant 0 : index
    %c0_21 = arith.constant 0 : index
    %14 = vector.load %arg2[%c0_19, %c0_20, %c0_21] : memref<3x12x8xf32, #tpu.memory_space<vmem>>, vector<1x12x8xf32>
    %15 = vector.shape_cast %14 : vector<1x12x8xf32> to vector<12x8xf32>
    %cst_22 = arith.constant dense<0.000000e+00> : vector<256x8xf32>
    %16 = tpu.matmul %13, %15, %cst_22 {dimension_numbers = #tpu.dot_dimension_numbers<[1], [0], [0], [1], [0, 0, 1, 1], [], []>} : vector<256x12xf32>, vector<12x8xf32>, vector<256x8xf32> -> vector<256x8xf32>
    %17 = arith.addf %11, %16 : vector<256x8xf32>
    %c0_23 = arith.constant 0 : index
    %c1_24 = arith.constant 1 : index
    %c0_25 = arith.constant 0 : index
    %c0_26 = arith.constant 0 : index
    %18 = vector.load %arg5[%c0_23, %c1_24, %c0_25, %c0_26] : memref<1x18x16x12xf32, #tpu.memory_space<vmem>>, vector<1x16x16x12xf32>
    %19 = vector.shape_cast %18 : vector<1x16x16x12xf32> to vector<256x12xf32>
    %c1_27 = arith.constant 1 : index
    %c0_28 = arith.constant 0 : index
    %c0_29 = arith.constant 0 : index
    %20 = vector.load %arg2[%c1_27, %c0_28, %c0_29] : memref<3x12x8xf32, #tpu.memory_space<vmem>>, vector<1x12x8xf32>
    %21 = vector.shape_cast %20 : vector<1x12x8xf32> to vector<12x8xf32>
    %cst_30 = arith.constant dense<0.000000e+00> : vector<256x8xf32>
    %22 = tpu.matmul %19, %21, %cst_30 {dimension_numbers = #tpu.dot_dimension_numbers<[1], [0], [0], [1], [0, 0, 1, 1], [], []>} : vector<256x12xf32>, vector<12x8xf32>, vector<256x8xf32> -> vector<256x8xf32>
    %23 = arith.addf %17, %22 : vector<256x8xf32>
    %c0_31 = arith.constant 0 : index
    %c2 = arith.constant 2 : index
    %c0_32 = arith.constant 0 : index
    %c0_33 = arith.constant 0 : index
    %24 = vector.load %arg5[%c0_31, %c2, %c0_32, %c0_33] : memref<1x18x16x12xf32, #tpu.memory_space<vmem>>, vector<1x16x16x12xf32>
    %25 = vector.shape_cast %24 : vector<1x16x16x12xf32> to vector<256x12xf32>
    %c2_34 = arith.constant 2 : index
    %c0_35 = arith.constant 0 : index
    %c0_36 = arith.constant 0 : index
    %26 = vector.load %arg2[%c2_34, %c0_35, %c0_36] : memref<3x12x8xf32, #tpu.memory_space<vmem>>, vector<1x12x8xf32>
    %27 = vector.shape_cast %26 : vector<1x12x8xf32> to vector<12x8xf32>
    %cst_37 = arith.constant dense<0.000000e+00> : vector<256x8xf32>
    %28 = tpu.matmul %25, %27, %cst_37 {dimension_numbers = #tpu.dot_dimension_numbers<[1], [0], [0], [1], [0, 0, 1, 1], [], []>} : vector<256x12xf32>, vector<12x8xf32>, vector<256x8xf32> -> vector<256x8xf32>
    %29 = arith.addf %23, %28 : vector<256x8xf32>
    %cst_38 = arith.constant dense<0.000000e+00> : vector<8xf32>
    %30 = vector.multi_reduction <add>, %29, %cst_38 [0] : vector<256x8xf32> to vector<8xf32>
    %31 = vector.shape_cast %30 : vector<8xf32> to vector<1x8xf32>
    %cst_39 = arith.constant 3.906250e-03 : f32
    %32 = vector.broadcast %cst_39 : f32 to vector<1x8xf32>
    %33 = arith.mulf %31, %32 : vector<1x8xf32>
    %34 = vector.broadcast %33 : vector<1x8xf32> to vector<256x8xf32>
    %35 = arith.subf %29, %34 : vector<256x8xf32>
    %36 = arith.mulf %35, %35 : vector<256x8xf32>
    %cst_40 = arith.constant dense<0.000000e+00> : vector<8xf32>
    %37 = vector.multi_reduction <add>, %36, %cst_40 [0] : vector<256x8xf32> to vector<8xf32>
    %38 = vector.shape_cast %37 : vector<8xf32> to vector<1x8xf32>
    %39 = vector.shape_cast %29 : vector<256x8xf32> to vector<1x16x16x8xf32>
    %c0_41 = arith.constant 0 : index
    %c0_42 = arith.constant 0 : index
    %c0_43 = arith.constant 0 : index
    %c0_44 = arith.constant 0 : index
    %40 = vector.load %arg3[%c0_41, %c0_42, %c0_43, %c0_44] : memref<1x16x16x8xf32, #tpu.memory_space<vmem>>, vector<1x16x16x8xf32>
    tpu.vector_store %arg3[%c0_41, %c0_42, %c0_43, %c0_44], %39 {strides = array<i32>} : memref<1x16x16x8xf32, #tpu.memory_space<vmem>>, vector<1x16x16x8xf32>,
    %41 = vector.shape_cast %33 : vector<1x8xf32> to vector<1x1x8xf32>
    %c0_45 = arith.constant 0 : index
    %c0_46 = arith.constant 0 : index
    %c0_47 = arith.constant 0 : index
    %42 = vector.load %arg4[%c0_45, %c0_46, %c0_47] : memref<1x2x8xf32, #tpu.memory_space<vmem>>, vector<1x1x8xf32>
    tpu.vector_store %arg4[%c0_45, %c0_46, %c0_47], %41 {strides = array<i32>} : memref<1x2x8xf32, #tpu.memory_space<vmem>>, vector<1x1x8xf32>,
    %43 = vector.shape_cast %38 : vector<1x8xf32> to vector<1x1x8xf32>
    %c0_48 = arith.constant 0 : index
    %c1_49 = arith.constant 1 : index
    %c0_50 = arith.constant 0 : index
    %44 = vector.load %arg4[%c0_48, %c1_49, %c0_50] : memref<1x2x8xf32, #tpu.memory_space<vmem>>, vector<1x1x8xf32>
    tpu.vector_store %arg4[%c0_48, %c1_49, %c0_50], %43 {strides = array<i32>} : memref<1x2x8xf32, #tpu.memory_space<vmem>>, vector<1x1x8xf32>,
    return
  }
  func.func @transform_0(%arg0: i32) -> (i32, i32, i32, i32) {
    %c0_i32 = arith.constant 0 : i32
    %c0_i32_0 = arith.constant 0 : i32
    %c0_i32_1 = arith.constant 0 : i32
    %c0_i32_2 = arith.constant 0 : i32
    return %arg0, %c0_i32, %c0_i32_0, %c0_i32_1 : i32, i32, i32, i32
  }
  func.func @transform_1(%arg0: i32) -> (i32, i32, i32) {
    %c0_i32 = arith.constant 0 : i32
    %c0_i32_0 = arith.constant 0 : i32
    %c0_i32_1 = arith.constant 0 : i32
    %c0_i32_2 = arith.constant 0 : i32
    return %c0_i32, %c0_i32_0, %c0_i32_1 : i32, i32, i32
  }
  func.func @transform_2(%arg0: i32) -> (i32, i32, i32, i32) {
    %c0_i32 = arith.constant 0 : i32
    %c0_i32_0 = arith.constant 0 : i32
    %c0_i32_1 = arith.constant 0 : i32
    %c0_i32_2 = arith.constant 0 : i32
    return %arg0, %c0_i32, %c0_i32_0, %c0_i32_1 : i32, i32, i32, i32
  }
  func.func @transform_3(%arg0: i32) -> (i32, i32, i32) {
    %c0_i32 = arith.constant 0 : i32
    %c0_i32_0 = arith.constant 0 : i32
    %c0_i32_1 = arith.constant 0 : i32
    return %arg0, %c0_i32, %c0_i32_0 : i32, i32, i32
  }
}

module attributes {stable_mosaic.version = 11 : i64} {
  func.func @kernel(%arg0: i32, %arg1: memref<1x16x16x8xf32, #tpu.memory_space<vmem>>, %arg2: memref<1x8xf32, #tpu.memory_space<vmem>>, %arg3: memref<1x8xf32, #tpu.memory_space<vmem>>, %arg4: memref<3x24x8xf32, #tpu.memory_space<vmem>>, %arg5: memref<1x16x16x8xf32, #tpu.memory_space<vmem>>, %arg6: memref<1x2x8xf32, #tpu.memory_space<vmem>>, %arg7: memref<1x18x16x24xf32, #tpu.memory_space<vmem>>) attributes {dimension_semantics = [#tpu.dimension_semantics<parallel>], iteration_bounds = array<i64: 2>, scalar_prefetch = 0 : i64, scratch_operands = 1 : i64, tpu.core_type = #tpu.core_type<tc>, window_params = [{transform_indices = @transform_0, window_bounds = array<i64: 1, 16, 16, 8>}, {pipeline_mode = #tpu.pipeline_mode<synchronous>, transform_indices = @transform_1, window_bounds = array<i64: 1, 8>}, {pipeline_mode = #tpu.pipeline_mode<synchronous>, transform_indices = @transform_2, window_bounds = array<i64: 1, 8>}, {pipeline_mode = #tpu.pipeline_mode<synchronous>, transform_indices = @transform_3, window_bounds = array<i64: 3, 24, 8>}, {transform_indices = @transform_4, window_bounds = array<i64: 1, 16, 16, 8>}, {transform_indices = @transform_5, window_bounds = array<i64: 1, 2, 8>}]} {
    %c0 = arith.constant 0 : index
    %c0_0 = arith.constant 0 : index
    %0 = vector.load %arg2[%c0, %c0_0] : memref<1x8xf32, #tpu.memory_space<vmem>>, vector<1x8xf32>
    %1 = vector.shape_cast %0 : vector<1x8xf32> to vector<1x1x1x8xf32>
    %c0_1 = arith.constant 0 : index
    %c0_2 = arith.constant 0 : index
    %2 = vector.load %arg3[%c0_1, %c0_2] : memref<1x8xf32, #tpu.memory_space<vmem>>, vector<1x8xf32>
    %3 = vector.shape_cast %2 : vector<1x8xf32> to vector<1x1x1x8xf32>
    %c0_3 = arith.constant 0 : index
    %c0_4 = arith.constant 0 : index
    %c0_5 = arith.constant 0 : index
    %c0_6 = arith.constant 0 : index
    %4 = vector.load %arg1[%c0_3, %c0_4, %c0_5, %c0_6] : memref<1x16x16x8xf32, #tpu.memory_space<vmem>>, vector<1x16x16x8xf32>
    %5 = vector.broadcast %1 : vector<1x1x1x8xf32> to vector<1x16x16x8xf32>
    %6 = arith.mulf %4, %5 : vector<1x16x16x8xf32>
    %7 = vector.broadcast %3 : vector<1x1x1x8xf32> to vector<1x16x16x8xf32>
    %8 = arith.addf %6, %7 : vector<1x16x16x8xf32>
    %cst = arith.constant 0.000000e+00 : f32
    %9 = vector.broadcast %cst : f32 to vector<1x16x16x8xf32>
    %10 = arith.maximumf %8, %9 : vector<1x16x16x8xf32>
    %cst_7 = arith.constant 0.000000e+00 : f32
    %11 = vector.broadcast %cst_7 : f32 to vector<1x16x1x8xf32>
    %12 = vector.extract_strided_slice %10 {offsets = [0, 0, 0, 0], sizes = [1, 16, 15, 8], strides = [1, 1, 1, 1]} : vector<1x16x16x8xf32> to vector<1x16x15x8xf32>
    %13 = tpu.concatenate %11, %12 in 2 : vector<1x16x1x8xf32>, vector<1x16x15x8xf32> -> vector<1x16x16x8xf32>
    %14 = vector.extract_strided_slice %10 {offsets = [0, 0, 1, 0], sizes = [1, 16, 15, 8], strides = [1, 1, 1, 1]} : vector<1x16x16x8xf32> to vector<1x16x15x8xf32>
    %15 = tpu.concatenate %14, %11 in 2 : vector<1x16x15x8xf32>, vector<1x16x1x8xf32> -> vector<1x16x16x8xf32>
    %16 = tpu.concatenate %13, %10, %15 in 3 : vector<1x16x16x8xf32>, vector<1x16x16x8xf32>, vector<1x16x16x8xf32> -> vector<1x16x16x24xf32>
    %cst_8 = arith.constant 0.000000e+00 : f32
    %17 = vector.broadcast %cst_8 : f32 to vector<1x1x16x24xf32>
    %c0_9 = arith.constant 0 : index
    %c0_10 = arith.constant 0 : index
    %c0_11 = arith.constant 0 : index
    %c0_12 = arith.constant 0 : index
    %18 = vector.load %arg7[%c0_9, %c0_10, %c0_11, %c0_12] : memref<1x18x16x24xf32, #tpu.memory_space<vmem>>, vector<1x1x16x24xf32>
    tpu.vector_store %arg7[%c0_9, %c0_10, %c0_11, %c0_12], %17 {strides = array<i32>} : memref<1x18x16x24xf32, #tpu.memory_space<vmem>>, vector<1x1x16x24xf32>,
    %c0_13 = arith.constant 0 : index
    %c17 = arith.constant 17 : index
    %c0_14 = arith.constant 0 : index
    %c0_15 = arith.constant 0 : index
    %19 = vector.load %arg7[%c0_13, %c17, %c0_14, %c0_15] : memref<1x18x16x24xf32, #tpu.memory_space<vmem>>, vector<1x1x16x24xf32>
    tpu.vector_store %arg7[%c0_13, %c17, %c0_14, %c0_15], %17 {strides = array<i32>} : memref<1x18x16x24xf32, #tpu.memory_space<vmem>>, vector<1x1x16x24xf32>,
    %c0_16 = arith.constant 0 : index
    %c1 = arith.constant 1 : index
    %c0_17 = arith.constant 0 : index
    %c0_18 = arith.constant 0 : index
    %20 = vector.load %arg7[%c0_16, %c1, %c0_17, %c0_18] : memref<1x18x16x24xf32, #tpu.memory_space<vmem>>, vector<1x16x16x24xf32>
    tpu.vector_store %arg7[%c0_16, %c1, %c0_17, %c0_18], %16 {strides = array<i32>} : memref<1x18x16x24xf32, #tpu.memory_space<vmem>>, vector<1x16x16x24xf32>,
    %cst_19 = arith.constant 0.000000e+00 : f32
    %21 = vector.broadcast %cst_19 : f32 to vector<256x8xf32>
    %c0_20 = arith.constant 0 : index
    %c0_21 = arith.constant 0 : index
    %c0_22 = arith.constant 0 : index
    %c0_23 = arith.constant 0 : index
    %22 = vector.load %arg7[%c0_20, %c0_21, %c0_22, %c0_23] : memref<1x18x16x24xf32, #tpu.memory_space<vmem>>, vector<1x16x16x24xf32>
    %23 = vector.shape_cast %22 : vector<1x16x16x24xf32> to vector<256x24xf32>
    %c0_24 = arith.constant 0 : index
    %c0_25 = arith.constant 0 : index
    %c0_26 = arith.constant 0 : index
    %24 = vector.load %arg4[%c0_24, %c0_25, %c0_26] : memref<3x24x8xf32, #tpu.memory_space<vmem>>, vector<1x24x8xf32>
    %25 = vector.shape_cast %24 : vector<1x24x8xf32> to vector<24x8xf32>
    %cst_27 = arith.constant dense<0.000000e+00> : vector<256x8xf32>
    %26 = tpu.matmul %23, %25, %cst_27 {dimension_numbers = #tpu.dot_dimension_numbers<[1], [0], [0], [1], [0, 0, 1, 1], [], []>} : vector<256x24xf32>, vector<24x8xf32>, vector<256x8xf32> -> vector<256x8xf32>
    %27 = arith.addf %21, %26 : vector<256x8xf32>
    %c0_28 = arith.constant 0 : index
    %c1_29 = arith.constant 1 : index
    %c0_30 = arith.constant 0 : index
    %c0_31 = arith.constant 0 : index
    %28 = vector.load %arg7[%c0_28, %c1_29, %c0_30, %c0_31] : memref<1x18x16x24xf32, #tpu.memory_space<vmem>>, vector<1x16x16x24xf32>
    %29 = vector.shape_cast %28 : vector<1x16x16x24xf32> to vector<256x24xf32>
    %c1_32 = arith.constant 1 : index
    %c0_33 = arith.constant 0 : index
    %c0_34 = arith.constant 0 : index
    %30 = vector.load %arg4[%c1_32, %c0_33, %c0_34] : memref<3x24x8xf32, #tpu.memory_space<vmem>>, vector<1x24x8xf32>
    %31 = vector.shape_cast %30 : vector<1x24x8xf32> to vector<24x8xf32>
    %cst_35 = arith.constant dense<0.000000e+00> : vector<256x8xf32>
    %32 = tpu.matmul %29, %31, %cst_35 {dimension_numbers = #tpu.dot_dimension_numbers<[1], [0], [0], [1], [0, 0, 1, 1], [], []>} : vector<256x24xf32>, vector<24x8xf32>, vector<256x8xf32> -> vector<256x8xf32>
    %33 = arith.addf %27, %32 : vector<256x8xf32>
    %c0_36 = arith.constant 0 : index
    %c2 = arith.constant 2 : index
    %c0_37 = arith.constant 0 : index
    %c0_38 = arith.constant 0 : index
    %34 = vector.load %arg7[%c0_36, %c2, %c0_37, %c0_38] : memref<1x18x16x24xf32, #tpu.memory_space<vmem>>, vector<1x16x16x24xf32>
    %35 = vector.shape_cast %34 : vector<1x16x16x24xf32> to vector<256x24xf32>
    %c2_39 = arith.constant 2 : index
    %c0_40 = arith.constant 0 : index
    %c0_41 = arith.constant 0 : index
    %36 = vector.load %arg4[%c2_39, %c0_40, %c0_41] : memref<3x24x8xf32, #tpu.memory_space<vmem>>, vector<1x24x8xf32>
    %37 = vector.shape_cast %36 : vector<1x24x8xf32> to vector<24x8xf32>
    %cst_42 = arith.constant dense<0.000000e+00> : vector<256x8xf32>
    %38 = tpu.matmul %35, %37, %cst_42 {dimension_numbers = #tpu.dot_dimension_numbers<[1], [0], [0], [1], [0, 0, 1, 1], [], []>} : vector<256x24xf32>, vector<24x8xf32>, vector<256x8xf32> -> vector<256x8xf32>
    %39 = arith.addf %33, %38 : vector<256x8xf32>
    %cst_43 = arith.constant dense<0.000000e+00> : vector<8xf32>
    %40 = vector.multi_reduction <add>, %39, %cst_43 [0] : vector<256x8xf32> to vector<8xf32>
    %41 = vector.shape_cast %40 : vector<8xf32> to vector<1x8xf32>
    %cst_44 = arith.constant 3.906250e-03 : f32
    %42 = vector.broadcast %cst_44 : f32 to vector<1x8xf32>
    %43 = arith.mulf %41, %42 : vector<1x8xf32>
    %44 = vector.broadcast %43 : vector<1x8xf32> to vector<256x8xf32>
    %45 = arith.subf %39, %44 : vector<256x8xf32>
    %46 = arith.mulf %45, %45 : vector<256x8xf32>
    %cst_45 = arith.constant dense<0.000000e+00> : vector<8xf32>
    %47 = vector.multi_reduction <add>, %46, %cst_45 [0] : vector<256x8xf32> to vector<8xf32>
    %48 = vector.shape_cast %47 : vector<8xf32> to vector<1x8xf32>
    %49 = vector.shape_cast %39 : vector<256x8xf32> to vector<1x16x16x8xf32>
    %c0_46 = arith.constant 0 : index
    %c0_47 = arith.constant 0 : index
    %c0_48 = arith.constant 0 : index
    %c0_49 = arith.constant 0 : index
    %50 = vector.load %arg5[%c0_46, %c0_47, %c0_48, %c0_49] : memref<1x16x16x8xf32, #tpu.memory_space<vmem>>, vector<1x16x16x8xf32>
    tpu.vector_store %arg5[%c0_46, %c0_47, %c0_48, %c0_49], %49 {strides = array<i32>} : memref<1x16x16x8xf32, #tpu.memory_space<vmem>>, vector<1x16x16x8xf32>,
    %51 = vector.shape_cast %43 : vector<1x8xf32> to vector<1x1x8xf32>
    %c0_50 = arith.constant 0 : index
    %c0_51 = arith.constant 0 : index
    %c0_52 = arith.constant 0 : index
    %52 = vector.load %arg6[%c0_50, %c0_51, %c0_52] : memref<1x2x8xf32, #tpu.memory_space<vmem>>, vector<1x1x8xf32>
    tpu.vector_store %arg6[%c0_50, %c0_51, %c0_52], %51 {strides = array<i32>} : memref<1x2x8xf32, #tpu.memory_space<vmem>>, vector<1x1x8xf32>,
    %53 = vector.shape_cast %48 : vector<1x8xf32> to vector<1x1x8xf32>
    %c0_53 = arith.constant 0 : index
    %c1_54 = arith.constant 1 : index
    %c0_55 = arith.constant 0 : index
    %54 = vector.load %arg6[%c0_53, %c1_54, %c0_55] : memref<1x2x8xf32, #tpu.memory_space<vmem>>, vector<1x1x8xf32>
    tpu.vector_store %arg6[%c0_53, %c1_54, %c0_55], %53 {strides = array<i32>} : memref<1x2x8xf32, #tpu.memory_space<vmem>>, vector<1x1x8xf32>,
    return
  }
  func.func @transform_0(%arg0: i32) -> (i32, i32, i32, i32) {
    %c0_i32 = arith.constant 0 : i32
    %c0_i32_0 = arith.constant 0 : i32
    %c0_i32_1 = arith.constant 0 : i32
    %c0_i32_2 = arith.constant 0 : i32
    return %arg0, %c0_i32, %c0_i32_0, %c0_i32_1 : i32, i32, i32, i32
  }
  func.func @transform_1(%arg0: i32) -> (i32, i32) {
    %c0_i32 = arith.constant 0 : i32
    %c0_i32_0 = arith.constant 0 : i32
    %c0_i32_1 = arith.constant 0 : i32
    return %c0_i32, %c0_i32_0 : i32, i32
  }
  func.func @transform_2(%arg0: i32) -> (i32, i32) {
    %c0_i32 = arith.constant 0 : i32
    %c0_i32_0 = arith.constant 0 : i32
    %c0_i32_1 = arith.constant 0 : i32
    return %c0_i32, %c0_i32_0 : i32, i32
  }
  func.func @transform_3(%arg0: i32) -> (i32, i32, i32) {
    %c0_i32 = arith.constant 0 : i32
    %c0_i32_0 = arith.constant 0 : i32
    %c0_i32_1 = arith.constant 0 : i32
    %c0_i32_2 = arith.constant 0 : i32
    return %c0_i32, %c0_i32_0, %c0_i32_1 : i32, i32, i32
  }
  func.func @transform_4(%arg0: i32) -> (i32, i32, i32, i32) {
    %c0_i32 = arith.constant 0 : i32
    %c0_i32_0 = arith.constant 0 : i32
    %c0_i32_1 = arith.constant 0 : i32
    %c0_i32_2 = arith.constant 0 : i32
    return %arg0, %c0_i32, %c0_i32_0, %c0_i32_1 : i32, i32, i32, i32
  }
  func.func @transform_5(%arg0: i32) -> (i32, i32, i32) {
    %c0_i32 = arith.constant 0 : i32
    %c0_i32_0 = arith.constant 0 : i32
    %c0_i32_1 = arith.constant 0 : i32
    return %arg0, %c0_i32, %c0_i32_0 : i32, i32, i32
  }
}

module attributes {stable_mosaic.version = 11 : i64} {
  func.func @_bn_relu_kernel(%arg0: i32, %arg1: memref<1x16x16x8xf32, #tpu.memory_space<vmem>>, %arg2: memref<1x8xf32, #tpu.memory_space<vmem>>, %arg3: memref<1x8xf32, #tpu.memory_space<vmem>>, %arg4: memref<1x16x16x8xf32, #tpu.memory_space<vmem>>) attributes {dimension_semantics = [#tpu.dimension_semantics<parallel>], iteration_bounds = array<i64: 2>, scalar_prefetch = 0 : i64, scratch_operands = 0 : i64, tpu.core_type = #tpu.core_type<tc>, window_params = [{transform_indices = @transform_0, window_bounds = array<i64: 1, 16, 16, 8>}, {pipeline_mode = #tpu.pipeline_mode<synchronous>, transform_indices = @transform_1, window_bounds = array<i64: 1, 8>}, {pipeline_mode = #tpu.pipeline_mode<synchronous>, transform_indices = @transform_2, window_bounds = array<i64: 1, 8>}, {transform_indices = @transform_3, window_bounds = array<i64: 1, 16, 16, 8>}]} {
    %c0 = arith.constant 0 : index
    %c0_0 = arith.constant 0 : index
    %0 = vector.load %arg2[%c0, %c0_0] : memref<1x8xf32, #tpu.memory_space<vmem>>, vector<1x8xf32>
    %1 = vector.shape_cast %0 : vector<1x8xf32> to vector<1x1x1x8xf32>
    %c0_1 = arith.constant 0 : index
    %c0_2 = arith.constant 0 : index
    %2 = vector.load %arg3[%c0_1, %c0_2] : memref<1x8xf32, #tpu.memory_space<vmem>>, vector<1x8xf32>
    %3 = vector.shape_cast %2 : vector<1x8xf32> to vector<1x1x1x8xf32>
    %c0_3 = arith.constant 0 : index
    %c0_4 = arith.constant 0 : index
    %c0_5 = arith.constant 0 : index
    %c0_6 = arith.constant 0 : index
    %4 = vector.load %arg1[%c0_3, %c0_4, %c0_5, %c0_6] : memref<1x16x16x8xf32, #tpu.memory_space<vmem>>, vector<1x16x16x8xf32>
    %5 = vector.broadcast %1 : vector<1x1x1x8xf32> to vector<1x16x16x8xf32>
    %6 = arith.mulf %4, %5 : vector<1x16x16x8xf32>
    %7 = vector.broadcast %3 : vector<1x1x1x8xf32> to vector<1x16x16x8xf32>
    %8 = arith.addf %6, %7 : vector<1x16x16x8xf32>
    %cst = arith.constant 0.000000e+00 : f32
    %9 = vector.broadcast %cst : f32 to vector<1x16x16x8xf32>
    %10 = arith.maximumf %8, %9 : vector<1x16x16x8xf32>
    %c0_7 = arith.constant 0 : index
    %c0_8 = arith.constant 0 : index
    %c0_9 = arith.constant 0 : index
    %c0_10 = arith.constant 0 : index
    %11 = vector.load %arg4[%c0_7, %c0_8, %c0_9, %c0_10] : memref<1x16x16x8xf32, #tpu.memory_space<vmem>>, vector<1x16x16x8xf32>
    tpu.vector_store %arg4[%c0_7, %c0_8, %c0_9, %c0_10], %10 {strides = array<i32>} : memref<1x16x16x8xf32, #tpu.memory_space<vmem>>, vector<1x16x16x8xf32>,
    return
  }
  func.func @transform_0(%arg0: i32) -> (i32, i32, i32, i32) {
    %c0_i32 = arith.constant 0 : i32
    %c0_i32_0 = arith.constant 0 : i32
    %c0_i32_1 = arith.constant 0 : i32
    %c0_i32_2 = arith.constant 0 : i32
    return %arg0, %c0_i32, %c0_i32_0, %c0_i32_1 : i32, i32, i32, i32
  }
  func.func @transform_1(%arg0: i32) -> (i32, i32) {
    %c0_i32 = arith.constant 0 : i32
    %c0_i32_0 = arith.constant 0 : i32
    %c0_i32_1 = arith.constant 0 : i32
    return %c0_i32, %c0_i32_0 : i32, i32
  }
  func.func @transform_2(%arg0: i32) -> (i32, i32) {
    %c0_i32 = arith.constant 0 : i32
    %c0_i32_0 = arith.constant 0 : i32
    %c0_i32_1 = arith.constant 0 : i32
    return %c0_i32, %c0_i32_0 : i32, i32
  }
  func.func @transform_3(%arg0: i32) -> (i32, i32, i32, i32) {
    %c0_i32 = arith.constant 0 : i32
    %c0_i32_0 = arith.constant 0 : i32
    %c0_i32_1 = arith.constant 0 : i32
    %c0_i32_2 = arith.constant 0 : i32
    return %arg0, %c0_i32, %c0_i32_0, %c0_i32_1 : i32, i32, i32, i32
  }
}

</mosaic_0001>

<bundles_post_ra>
// kernel: double_conv.5
= control target key start
LH: loop header
LB: loop body
LE: loop exit
PB: predicated region body
PF: predicated region fallthrough
CT: control target
= control target key end

     0   :  { %s446_s12 = smov 0   ;;  %s637_s0 = inlined_call_operand.vmem [shape: f32[2,16,16,8], index: 0, kind: input, shape index: {}]   ;;  %s638_s1 = inlined_call_operand.vmem [shape: f32[1,8], index: 1, kind: input, shape index: {}]   ;;  %s639_s2 = inlined_call_operand.vmem [shape: f32[1,8], index: 2, kind: input, shape index: {}]   ;;  %s640_s3 = inlined_call_operand.vmem [shape: f32[2,16,16,8], index: 3, kind: output, shape index: {}]  }
   0x1 LB: > { %s395_s13 = sadd.s32 4294967295, %s424_s12   ;;  %p399_p0 = scmp.ge.s32.totalorder %s424_s12, 1  ;;  %s424_s12 = sphi %s446_s12, %s13_s12  }
   0x2   : > { %p137_p1 = scmp.lt.s32.totalorder %s424_s12, 3 }
   0x4   : > { %p138_p2 = pnand %p399_p0, %p137_p1 }
   0x5   : > { %p161_p3 = scmp.lt.s32.totalorder (!%p138_p2), %s395_s13, 1 }
   0x6   : > { %141 = sbr.rel (%p138_p2) target bundleno = 53 (0x35), region = 32 }
   0xb   : > { %s642_s13 = smov (!%p161_p3, %s395_s13), 1  ;;  %v457_v0 = vld [vmem:[%s638_s1] ss:$0 sm:$0xff]  ;;  %vm307_vm0 = vcmask 64512  }
   0xc   : > { %s406_s16 = sshll.u32 %s642_s13, 8  ;;  %v467_v1 = vld [vmem:[%s639_s2] ss:$0 sm:$0xff] }
   0xd   : > { %s462_s19 = scalar_lea.vmem %s637_s0, %s406_s16  ;;  %s490_s24 = scalar_lea.vmem %s640_s3, %s406_s16 }
   0xe   : > { %v173_v2 = vld [vmem:[%s462_s19] sm:$0xff]  ;;  %v174_v3 = vld [vmem:[%s462_s19 + $0x8] sm:$0xff]  ;;  %v175_v4 = vld [vmem:[%s462_s19 + $0x10] sm:$0xff] }
   0xf   : > { %v208_v5 = vmul.f32 %v457_v0, %v173_v2  ;;  %v209_v6 = vmul.f32 %v457_v0, %v174_v3  ;;  %v210_v7 = vmul.f32 %v457_v0, %v175_v4  ;;  %v176_v8 = vld [vmem:[%s462_s19 + $0x18] sm:$0xff]  ;;  %v177_v9 = vld [vmem:[%s462_s19 + $0x20] sm:$0xff]  ;;  %v178_v10 = vld [vmem:[%s462_s19 + $0x28] sm:$0xff] }
  0x10   : > { %v211_v11 = vmul.f32 %v457_v0, %v176_v8  ;;  %v212_v12 = vmul.f32 %v457_v0, %v177_v9  ;;  %v213_v13 = vmul.f32 %v457_v0, %v178_v10  ;;  %v179_v14 = vld [vmem:[%s462_s19 + $0x30] sm:$0xff]  ;;  %v180_v15 = vld [vmem:[%s462_s19 + $0x38] sm:$0xff]  ;;  %v181_v24 = vld [vmem:[%s462_s19 + $0x40] sm:$0xff] }
  0x11   : > { %v243_v16 = vadd.f32 %v467_v1, %v208_v5  ;;  %v244_v17 = vadd.f32 %v467_v1, %v209_v6  ;;  %v245_v18 = vadd.f32 %v467_v1, %v210_v7  ;;  %v214_v19 = vmul.f32 %v457_v0, %v179_v14  ;;  %v182_v25 = vld [vmem:[%s462_s19 + $0x48] sm:$0xff]  ;;  %v183_v26 = vld [vmem:[%s462_s19 + $0x50] sm:$0xff]  ;;  %v184_v31 = vld [vmem:[%s462_s19 + $0x58] sm:$0xff] }
  0x12   : > { %v246_v20 = vadd.f32 %v467_v1, %v211_v11  ;;  %v247_v21 = vadd.f32 %v467_v1, %v212_v12  ;;  %v248_v22 = vadd.f32 %v467_v1, %v213_v13  ;;  %v215_v23 = vmul.f32 %v457_v0, %v180_v15  ;;  %v185_v32 = vld [vmem:[%s462_s19 + $0x60] sm:$0xff]  ;;  %v186_v33 = vld [vmem:[%s462_s19 + $0x68] sm:$0xff]  ;;  %v187_v37 = vld [vmem:[%s462_s19 + $0x70] sm:$0xff] }
  0x13   : > { %v275_v27 = vmax.f32 %v243_v16, 0.0  ;;  %v276_v28 = vmax.f32 %v244_v17, 0.0  ;;  %v277_v29 = vmax.f32 %v245_v18, 0.0  ;;  %v249_v30 = vadd.f32 %v467_v1, %v214_v19  ;;  %v188_v42 = vld [vmem:[%s462_s19 + $0x78] sm:$0xff]  ;;  %v189_v54 = vld [vmem:[%s462_s19 + $0x80] sm:$0xff]  ;;  %v190_v55 = vld [vmem:[%s462_s19 + $0x88] sm:$0xff] }
  0x14   : > { %v278_v34 = vmax.f32 %v246_v20, 0.0  ;;  %v279_v35 = vmax.f32 %v247_v21, 0.0  ;;  %v250_v36 = vadd.f32 %v467_v1, %v215_v23  ;;  %v280_v38 = vmax.f32 %v248_v22, 0.0  ;;  %v191_v56 = vld [vmem:[%s462_s19 + $0x90] sm:$0xff]  ;;  %v192_v59 = vld [vmem:[%s462_s19 + $0x98] sm:$0xff]  ;;  %v193_v63 = vld [vmem:[%s462_s19 + $0xa0] sm:$0xff] }
  0x15   : > { %308 = vst.msk [vmem:[%s490_s24] sm:$0xff] %vm307_vm0, %v275_v27  ;;  %v216_v39 = vmul.f32 %v457_v0, %v181_v24  ;;  %v217_v40 = vmul.f32 %v457_v0, %v182_v25  ;;  %v218_v41 = vmul.f32 %v457_v0, %v183_v26  ;;  %v281_v43 = vmax.f32 %v249_v30, 0.0  ;;  %v194_v6 = vld [vmem:[%s462_s19 + $0xa8] sm:$0xff]  ;;  %v195_v10 = vld [vmem:[%s462_s19 + $0xb0] sm:$0xff]  ;;  %v196_v14 = vld [vmem:[%s462_s19 + $0xb8] sm:$0xff] }
  0x16   : > { %309 = vst.msk [vmem:[%s490_s24 + $0x8] sm:$0xff] %vm307_vm0, %v276_v28  ;;  %v219_v44 = vmul.f32 %v457_v0, %v184_v31  ;;  %v220_v45 = vmul.f32 %v457_v0, %v185_v32  ;;  %v221_v46 = vmul.f32 %v457_v0, %v186_v33  ;;  %v222_v50 = vmul.f32 %v457_v0, %v187_v37  ;;  %v197_v18 = vld [vmem:[%s462_s19 + $0xc0] sm:$0xff]  ;;  %v198_v22 = vld [vmem:[%s462_s19 + $0xc8] sm:$0xff]  ;;  %v199_v26 = vld [vmem:[%s462_s19 + $0xd0] sm:$0xff] }
  0x17   : > { %310 = vst.msk [vmem:[%s490_s24 + $0x10] sm:$0xff] %vm307_vm0, %v277_v29  ;;  %v251_v47 = vadd.f32 %v467_v1, %v216_v39  ;;  %v252_v48 = vadd.f32 %v467_v1, %v217_v40  ;;  %v253_v49 = vadd.f32 %v467_v1, %v218_v41  ;;  %v282_v51 = vmax.f32 %v250_v36, 0.0  ;;  %v200_v30 = vld [vmem:[%s462_s19 + $0xd8] sm:$0xff] }
  0x18   : > { %311 = vst.msk [vmem:[%s490_s24 + $0x18] sm:$0xff] %vm307_vm0, %v278_v34  ;;  %v254_v52 = vadd.f32 %v467_v1, %v219_v44  ;;  %v223_v53 = vmul.f32 %v457_v0, %v188_v42  ;;  %v255_v58 = vadd.f32 %v467_v1, %v220_v45  ;;  %v256_v62 = vadd.f32 %v467_v1, %v221_v46  ;;  %v201_v34 = vld [vmem:[%s462_s19 + $0xe0] sm:$0xff]  ;;  %v203_v42 = vld [vmem:[%s462_s19 + $0xf0] sm:$0xff]  ;;  %v204_v46 = vld [vmem:[%s462_s19 + $0xf8] sm:$0xff] }
  0x19   : > { %312 = vst.msk [vmem:[%s490_s24 + $0x20] sm:$0xff] %vm307_vm0, %v279_v35  ;;  %v283_v57 = vmax.f32 %v251_v47, 0.0  ;;  %v284_v60 = vmax.f32 %v252_v48, 0.0  ;;  %v285_v61 = vmax.f32 %v253_v49, 0.0  ;;  %v257_v2 = vadd.f32 %v467_v1, %v222_v50 }
  0x1a   : > { %313 = vst.msk [vmem:[%s490_s24 + $0x28] sm:$0xff] %vm307_vm0, %v280_v38  ;;  %v224_v3 = vmul.f32 %v457_v0, %v189_v54  ;;  %v225_v4 = vmul.f32 %v457_v0, %v190_v55  ;;  %v226_v5 = vmul.f32 %v457_v0, %v191_v56  ;;  %v286_v7 = vmax.f32 %v254_v52, 0.0  ;;  %v202_v38 = vld [vmem:[%s462_s19 + $0xe8] sm:$0xff] }
  0x1b   : > { %314 = vst.msk [vmem:[%s490_s24 + $0x30] sm:$0xff] %vm307_vm0, %v281_v43  ;;  %v258_v8 = vadd.f32 %v467_v1, %v223_v53  ;;  %v227_v9 = vmul.f32 %v457_v0, %v192_v59  ;;  %v287_v11 = vmax.f32 %v255_v58, 0.0  ;;  %v228_v13 = vmul.f32 %v457_v0, %v193_v63 }
  0x1c   : > { %315 = vst.msk [vmem:[%s490_s24 + $0x38] sm:$0xff] %vm307_vm0, %v282_v51  ;;  %v259_v12 = vadd.f32 %v467_v1, %v224_v3  ;;  %v288_v15 = vmax.f32 %v256_v62, 0.0  ;;  %v260_v16 = vadd.f32 %v467_v1, %v225_v4  ;;  %v229_v17 = vmul.f32 %v457_v0, %v194_v6 }
  0x1d   : > { %316 = vst.msk [vmem:[%s490_s24 + $0x40] sm:$0xff] %vm307_vm0, %v283_v57  ;;  %v289_v19 = vmax.f32 %v257_v2, 0.0  ;;  %v261_v20 = vadd.f32 %v467_v1, %v226_v5  ;;  %v230_v21 = vmul.f32 %v457_v0, %v195_v10  ;;  %v290_v23 = vmax.f32 %v258_v8, 0.0 }
  0x1e   : > { %317 = vst.msk [vmem:[%s490_s24 + $0x48] sm:$0xff] %vm307_vm0, %v284_v60  ;;  %v262_v24 = vadd.f32 %v467_v1, %v227_v9  ;;  %v231_v25 = vmul.f32 %v457_v0, %v196_v14  ;;  %v291_v27 = vmax.f32 %v259_v12, 0.0  ;;  %v263_v28 = vadd.f32 %v467_v1, %v228_v13 }
  0x1f   : > { %318 = vst.msk [vmem:[%s490_s24 + $0x50] sm:$0xff] %vm307_vm0, %v285_v61  ;;  %v232_v29 = vmul.f32 %v457_v0, %v197_v18  ;;  %v292_v31 = vmax.f32 %v260_v16, 0.0  ;;  %v264_v32 = vadd.f32 %v467_v1, %v229_v17  ;;  %v233_v33 = vmul.f32 %v457_v0, %v198_v22 }
  0x20   : > { %319 = vst.msk [vmem:[%s490_s24 + $0x58] sm:$0xff] %vm307_vm0, %v286_v7  ;;  %v293_v35 = vmax.f32 %v261_v20, 0.0  ;;  %v265_v36 = vadd.f32 %v467_v1, %v230_v21  ;;  %v234_v37 = vmul.f32 %v457_v0, %v199_v26  ;;  %v294_v39 = vmax.f32 %v262_v24, 0.0 }
  0x21   : > { %320 = vst.msk [vmem:[%s490_s24 + $0x60] sm:$0xff] %vm307_vm0, %v287_v11  ;;  %v266_v40 = vadd.f32 %v467_v1, %v231_v25  ;;  %v235_v41 = vmul.f32 %v457_v0, %v200_v30  ;;  %v295_v43 = vmax.f32 %v263_v28, 0.0  ;;  %v267_v44 = vadd.f32 %v467_v1, %v232_v29 }
  0x22   : > { %321 = vst.msk [vmem:[%s490_s24 + $0x68] sm:$0xff] %vm307_vm0, %v288_v15  ;;  %v236_v45 = vmul.f32 %v457_v0, %v201_v34  ;;  %v296_v47 = vmax.f32 %v264_v32, 0.0  ;;  %v268_v48 = vadd.f32 %v467_v1, %v233_v33  ;;  %v237_v49 = vmul.f32 %v457_v0, %v202_v38 }
  0x23   : > { %322 = vst.msk [vmem:[%s490_s24 + $0x70] sm:$0xff] %vm307_vm0, %v289_v19  ;;  %v297_v50 = vmax.f32 %v265_v36, 0.0  ;;  %v269_v51 = vadd.f32 %v467_v1, %v234_v37  ;;  %v238_v52 = vmul.f32 %v457_v0, %v203_v42  ;;  %v298_v53 = vmax.f32 %v266_v40, 0.0 }
  0x24   : > { %323 = vst.msk [vmem:[%s490_s24 + $0x78] sm:$0xff] %vm307_vm0, %v290_v23  ;;  %v270_v54 = vadd.f32 %v467_v1, %v235_v41  ;;  %v239_v55 = vmul.f32 %v457_v0, %v204_v46  ;;  %v299_v56 = vmax.f32 %v267_v44, 0.0  ;;  %v271_v57 = vadd.f32 %v467_v1, %v236_v45 }
  0x25   : > { %324 = vst.msk [vmem:[%s490_s24 + $0x80] sm:$0xff] %vm307_vm0, %v291_v27  ;;  %v300_v58 = vmax.f32 %v268_v48, 0.0  ;;  %v272_v59 = vadd.f32 %v467_v1, %v237_v49  ;;  %v301_v60 = vmax.f32 %v269_v51, 0.0  ;;  %v273_v0 = vadd.f32 %v467_v1, %v238_v52 }
  0x26   : > { %325 = vst.msk [vmem:[%s490_s24 + $0x88] sm:$0xff] %vm307_vm0, %v292_v31  ;;  %v302_v61 = vmax.f32 %v270_v54, 0.0  ;;  %v274_v62 = vadd.f32 %v467_v1, %v239_v55  ;;  %v303_v63 = vmax.f32 %v271_v57, 0.0 }
  0x27   : > { %326 = vst.msk [vmem:[%s490_s24 + $0x90] sm:$0xff] %vm307_vm0, %v293_v35  ;;  %v304_v2 = vmax.f32 %v272_v59, 0.0  ;;  %v305_v3 = vmax.f32 %v273_v0, 0.0 }
  0x28   : > { %327 = vst.msk [vmem:[%s490_s24 + $0x98] sm:$0xff] %vm307_vm0, %v294_v39  ;;  %v306_v4 = vmax.f32 %v274_v62, 0.0 }
  0x29   : > { %328 = vst.msk [vmem:[%s490_s24 + $0xa0] sm:$0xff] %vm307_vm0, %v295_v43 }
  0x2a   : > { %329 = vst.msk [vmem:[%s490_s24 + $0xa8] sm:$0xff] %vm307_vm0, %v296_v47 }
  0x2b   : > { %330 = vst.msk [vmem:[%s490_s24 + $0xb0] sm:$0xff] %vm307_vm0, %v297_v50 }
  0x2c   : > { %331 = vst.msk [vmem:[%s490_s24 + $0xb8] sm:$0xff] %vm307_vm0, %v298_v53 }
  0x2d   : > { %332 = vst.msk [vmem:[%s490_s24 + $0xc0] sm:$0xff] %vm307_vm0, %v299_v56 }
  0x2e   : > { %333 = vst.msk [vmem:[%s490_s24 + $0xc8] sm:$0xff] %vm307_vm0, %v300_v58 }
  0x2f   : > { %334 = vst.msk [vmem:[%s490_s24 + $0xd0] sm:$0xff] %vm307_vm0, %v301_v60 }
  0x30   : > { %335 = vst.msk [vmem:[%s490_s24 + $0xd8] sm:$0xff] %vm307_vm0, %v302_v61 }
  0x31   : > { %336 = vst.msk [vmem:[%s490_s24 + $0xe0] sm:$0xff] %vm307_vm0, %v303_v63 }
  0x32   : > { %337 = vst.msk [vmem:[%s490_s24 + $0xe8] sm:$0xff] %vm307_vm0, %v304_v2 }
  0x33   : > { %338 = vst.msk [vmem:[%s490_s24 + $0xf0] sm:$0xff] %vm307_vm0, %v305_v3 }
  0x34   : > { %339 = vst.msk [vmem:[%s490_s24 + $0xf8] sm:$0xff] %vm307_vm0, %v306_v4 }
  0x35 PF: > { %s13_s12 = sadd.s32 1, %s424_s12  }
  0x36   : > { %p10_p4 = scmp.ge.s32.totalorder %s13_s12, 4  }
  0x38   :  { %12 = sbr.rel (!%p10_p4) target bundleno = 1 (0x1), region = 62 }

// kernel: double_conv.3
= control target key start
LH: loop header
LB: loop body
LE: loop exit
PB: predicated region body
PF: predicated region fallthrough
CT: control target
= control target key end

     0   :  { %s2000_s12 = smov 0   ;;  %s3035_s0 = inlined_call_operand.vmem [shape: f32[2,16,16,4], index: 0, kind: input, shape index: {}]   ;;  %s3036_s1 = inlined_call_operand.vmem [shape: f32[3,12,8], index: 1, kind: input, shape index: {}]   ;;  %s3037_s2 = inlined_call_operand.vmem [shape: f32[2,16,16,8], index: 2, kind: output, shape index: {0}]   ;;  %s3038_s3 = inlined_call_operand.vmem [shape: f32[2,2,8], index: 3, kind: output, shape index: {1}]  }
   0x1 LB: > { %s1835_s13 = sadd.s32 4294967295, %s1975_s12   ;;  %p1839_p0 = scmp.ge.s32.totalorder %s1975_s12, 1  ;;  %s1975_s12 = sphi %s2000_s12, %s14_s12  }
   0x2   : > { %p140_p1 = scmp.lt.s32.totalorder %s1975_s12, 3 }
   0x4   : > { %p141_p2 = pnand %p1839_p0, %p140_p1 }
   0x5   : > { %p168_p3 = scmp.lt.s32.totalorder (!%p141_p2), %s1835_s13, 1  ;;  %s1977_s18 = smov (!%p141_p2), 4  }
   0x6   : > { %144 = sbr.rel (%p141_p2) target bundleno = 606 (0x25e), region = 28  ;;  %s1978_s19 = smov (!%p141_p2), 8  }
   0xb   : > { %s3040_s13 = smov (!%p168_p3, %s1835_s13), 1  ;;  %vm343_vm0 = vcmask 1046528   ;;  %vm698_vm1 = vcmask 97280   ;;  %v1979_v46 = vmov 0.0   ;;  %v770_v51 = vld [vmem:[%s3036_s1 + $0x8] sm:$0xf] }
   0xc   : > { %s1950_s14 = sshll.u32 %s3040_s13, 8  ;;  %699 = vst.msk [vmem:[#allocation2] sm:$0xff] %vm698_vm1, %v1979_v46  ;;  %vm902_vm2 = vcmask 1043456   ;;  %v769_v56 = vld [vmem:[%s3036_s1] sm:$0xff]  ;;  %vm246_vm3 = vcmask 1040384   ;;  %vm632_vm4 = vcmask 31744  }
   0xd   : > { %s2016_s17 = scalar_lea.vmem %s3035_s0, %s1950_s14  ;;  %700 = vst.msk [vmem:[#allocation2 + $0x8] sm:$0xff] %vm698_vm1, %v1979_v46  ;;  %1880 = vmatpush.msk.msra.mxu1 %vm902_vm2, %v770_v51  ;;  %vm665_vm5 = vcmask 64512   ;;  %s2568_s7 = scalar_lea.vmem %s3037_s2, %s1950_s14  ;;  %vm1746_vm6 = vcmask 57344  }
   0xe   : > { %v2019_v0 = vld [vmem:[%s2016_s17 + $0x10] sm:$0xff]  ;;  %v2022_v1 = vld [vmem:[%s2016_s17] sm:$0xff]  ;;  %v2025_v2 = vld [vmem:[%s2016_s17 + $0x18] sm:$0xff]  ;;  %702 = vst.msk [vmem:[#allocation2 + $0x110] sm:$0xff] %vm698_vm1, %v1979_v46  ;;  %s1844_s8 = sshll.u32 %s3040_s13, 1 }
   0xf   : > { %428 = vrot.lane.b32.xlu0 %v2019_v0, %s1977_s18  ;;  %424 = vrot.lane.b32.xlu1 %v2022_v1, %s1977_s18  ;;  %v2032_v3 = vld [vmem:[%s2016_s17 + $0x8] sm:$0xff]  ;;  %v347_v4 = vrot.slane %v2019_v0, 1  ;;  %v344_v5 = vrot.slane %v2022_v1, 1  ;;  %v348_v6 = vrot.slane %v2025_v2, 1  ;;  %v2048_v12 = vld [vmem:[%s2016_s17 + $0x20] sm:$0xff]  ;;  %703 = vst.msk [vmem:[#allocation2 + $0x118] sm:$0xff] %vm698_vm1, %v1979_v46  ;;  %s2892_s11 = scalar_lea.vmem %s3038_s3, %s1844_s8 }
  0x10   : > { %v345_v7 = vrot.slane %v2032_v3, 1  ;;  %430 = vrot.lane.b32.xlu2 %v2025_v2, %s1977_s18  ;;  %v2051_v13 = vld [vmem:[%s2016_s17 + $0x28] sm:$0xff]  ;;  %v2057_v14 = vld [vmem:[%s2016_s17 + $0xc0] sm:$0xff]  ;;  %v350_v15 = vrot.slane %v2048_v12, 1  ;;  %v2082_v24 = vld [vmem:[%s2016_s17 + $0x30] sm:$0xff]  ;;  %1133 = vmatpush.msra.mxu1 %v769_v56  ;;  %v250_v62 = vrot.slane %v2019_v0, 7 }
  0x11   : > { %v349_v8 = vsel %vm343_vm0, %v347_v4, %v348_v6  ;;  %v409_v10 = vsel %vm343_vm0, %v348_v6, 0.0  ;;  %v351_v16 = vrot.slane %v2051_v13, 1  ;;  %v380_v17 = vrot.slane %v2057_v14, 1  ;;  %v2065_v18 = vld [vmem:[%s2016_s17 + $0xc8] sm:$0xff]  ;;  %v2085_v25 = vld [vmem:[%s2016_s17 + $0x38] sm:$0xff]  ;;  %v2088_v26 = vld [vmem:[%s2016_s17 + $0xd0] sm:$0xff] }
  0x12   : > { %v346_v9 = vsel %vm343_vm0, %v344_v5, %v345_v7  ;;  %v408_v11 = vsel %vm343_vm0, %v345_v7, 0.0  ;;  %v381_v19 = vrot.slane %v2065_v18, 1  ;;  %v2091_v27 = vld [vmem:[%s2016_s17 + $0xd8] sm:$0xff]  ;;  %v353_v28 = vrot.slane %v2082_v24, 1  ;;  %v2114_v36 = vld [vmem:[%s2016_s17 + $0x40] sm:$0xff]  ;;  %v2119_v38 = vld [vmem:[%s2016_s17 + $0x48] sm:$0xff] }
  0x13   : > { %v352_v20 = vsel %vm343_vm0, %v350_v15, %v351_v16  ;;  %v410_v22 = vsel %vm343_vm0, %v351_v16, 0.0  ;;  %v354_v29 = vrot.slane %v2085_v25, 1  ;;  %v383_v30 = vrot.slane %v2088_v26, 1  ;;  %v2123_v40 = vld [vmem:[%s2016_s17 + $0xe0] sm:$0xff]  ;;  %v2126_v41 = vld [vmem:[%s2016_s17 + $0xe8] sm:$0xff]  ;;  %v2147_v49 = vld [vmem:[%s2016_s17 + $0x50] sm:$0xff] }
  0x14   : > { %v382_v21 = vsel %vm343_vm0, %v380_v17, %v381_v19  ;;  %v420_v23 = vsel %vm343_vm0, %v381_v19, 0.0  ;;  %v384_v31 = vrot.slane %v2091_v27, 1  ;;  %v356_v37 = vrot.slane %v2114_v36, 1  ;;  %v2150_v50 = vld [vmem:[%s2016_s17 + $0x58] sm:$0xff]  ;;  %v2160_v52 = vld [vmem:[%s2016_s17 + $0xf0] sm:$0xff]  ;;  %v737_v58 = vld [vmem:[#allocation2] sm:$0xff] }
  0x15   : > { %v355_v32 = vsel %vm343_vm0, %v353_v28, %v354_v29  ;;  %v411_v34 = vsel %vm343_vm0, %v354_v29, 0.0  ;;  %v357_v39 = vrot.slane %v2119_v38, 1  ;;  %v386_v43 = vrot.slane %v2123_v40, 1  ;;  %v2172_v57 = vld [vmem:[%s2016_s17 + $0xf8] sm:$0xff]  ;;  %1881 = vmatmul.msk.f32.vlgmr.msra.gmra.mxu1 %vm698_vm1, %v737_v58  ;;  %v738_v5 = vld [vmem:[#allocation2 + $0x8] sm:$0xff]  ;;  %v2217_v17 = vld [vmem:[%s2016_s17 + $0x60] sm:$0xff] }
  0x16   : > { %v385_v33 = vsel %vm343_vm0, %v383_v30, %v384_v31  ;;  %v421_v35 = vsel %vm343_vm0, %v384_v31, 0.0  ;;  %v387_v44 = vrot.slane %v2126_v41, 1  ;;  %v359_v53 = vrot.slane %v2147_v49, 1  ;;  %v1846_v0 = vld [vmem:[%s3036_s1 + $0x18] sm:$0xf]  ;;  %v2221_v19 = vld [vmem:[%s2016_s17 + $0x68] sm:$0xff] }
  0x17   : > { %540 = vrot.lane.b32.xlu0 %v349_v8, %s1978_s19  ;;  %536 = vrot.lane.b32.xlu1 %v346_v9, %s1978_s19  ;;  %v358_v42 = vsel %vm343_vm0, %v356_v37, %v357_v39  ;;  %v412_v47 = vsel %vm343_vm0, %v357_v39, 0.0  ;;  %v360_v54 = vrot.slane %v2150_v50, 1  ;;  %v389_v55 = vrot.slane %v2160_v52, 1 }
  0x18   : > { %542 = vrot.lane.b32.xlu2 %v409_v10, %s1978_s19  ;;  %v388_v45 = vsel %vm343_vm0, %v386_v43, %v387_v44  ;;  %v422_v48 = vsel %vm343_vm0, %v387_v44, 0.0  ;;  %v390_v59 = vrot.slane %v2172_v57, 1  ;;  %v251_v63 = vrot.slane %v2025_v2, 7  ;;  %v2197_v2 = vld [vmem:[%s3036_s1 + $0x28] sm:$0xf]  ;;  %1847 = vmatpush.msk.msra.mxu0 %vm902_vm2, %v1846_v0  ;;  %v1845_v10 = vld [vmem:[%s3036_s1 + $0x10] sm:$0xff] }
  0x19   : > { %v361_v60 = vsel %vm343_vm0, %v359_v53, %v360_v54  ;;  %v413_v7 = vsel %vm343_vm0, %v360_v54, 0.0  ;;  %1915 = vmatpush.msk.msra.mxu2 %vm902_vm2, %v2197_v2  ;;  %1952 = vmatpush.msk.msra.mxu3 %vm902_vm2, %v1846_v0  ;;  %v247_v39 = vrot.slane %v2022_v1, 7  ;;  %v253_v0 = vrot.slane %v2048_v12, 7 }
  0x1a   : > { %v391_v61 = vsel %vm343_vm0, %v389_v55, %v390_v59  ;;  %v252_v6 = vsel %vm246_vm3, %v250_v62, %v251_v63  ;;  %921 = vmatpush.msra.mxu0 %v1845_v10  ;;  %v423_v16 = vsel %vm343_vm0, %v390_v59, 0.0  ;;  %v2282_v63 = vld [vmem:[%s2016_s17 + $0x80] sm:$0xff] }
  0x1b   : > { %1953 = vmatpush.msra.mxu3 %v1845_v10 }
  0x1d   : > { %1882 = vmatmul.msk.f32.gmra.mxu1 %vm698_vm1, %v738_v5  ;;  %1954 = vmatpush.msk.msrb.mxu3 %vm902_vm2, %v770_v51 }
  0x1f   : > { %426 = vrot.lane.b32.xlu0 %v2032_v3, %s1977_s18  ;;  %538 = vrot.lane.b32.xlu1 %v408_v11, %s1978_s19  ;;  %v2211_v11 = vld [vmem:[%s3036_s1 + $0x20] sm:$0xff] }
  0x20   : > { %432 = vrot.lane.b32.xlu2 %v2048_v12, %s1977_s18  ;;  %1381 = vmatpush.msra.mxu2 %v2211_v11 }
  0x21   : > { %1955 = vmatpush.msrb.mxu3 %v769_v56 }
  0x27   : > { %472 = vrot.lane.b32.xlu0 %v2057_v14, %s1977_s18  ;;  %544 = vrot.lane.b32.xlu1 %v352_v20, %s1978_s19  ;;  %v2224_v20 = vld [vmem:[%s2016_s17 + $0xb0] sm:$0xff] }
  0x28   : > { %584 = vrot.lane.b32.xlu2 %v382_v21, %s1978_s19  ;;  %v2227_v21 = vld [vmem:[%s2016_s17 + $0xb8] sm:$0xff]  ;;  %v377_v28 = vrot.slane %v2224_v20, 1 }
  0x29   : > { %v378_v29 = vrot.slane %v2227_v21, 1 }
  0x2b   : > { %v419_v46 = vsel %vm343_vm0, %v378_v29, 0.0 }
  0x2f   : > { %434 = vrot.lane.b32.xlu0 %v2051_v13, %s1977_s18  ;;  %474 = vrot.lane.b32.xlu1 %v2065_v18, %s1977_s18 }
  0x30   : > { %546 = vrot.lane.b32.xlu2 %v410_v22, %s1978_s19  ;;  %v362_v22 = vrot.slane %v2217_v17, 1 }
  0x37   : > { %586 = vrot.lane.b32.xlu0 %v420_v23, %s1978_s19  ;;  %436 = vrot.lane.b32.xlu1 %v2082_v24, %s1977_s18  ;;  %v363_v23 = vrot.slane %v2221_v19, 1 }
  0x38   : > { %476 = vrot.lane.b32.xlu2 %v2088_v26, %s1977_s18 }
  0x39   : > { %v364_v31 = vsel %vm343_vm0, %v362_v22, %v363_v23  ;;  %v414_v44 = vsel %vm343_vm0, %v363_v23, 0.0  ;;  %v329_v23 = vsel %vm246_vm3, 0.0, %v253_v0 }
  0x3f   : > { %548 = vrot.lane.b32.xlu0 %v355_v32, %s1978_s19  ;;  %588 = vrot.lane.b32.xlu1 %v385_v33, %s1978_s19  ;;  %v379_v32 = vsel %vm343_vm0, %v377_v28, %v378_v29  ;;  %v284_v33 = vrot.slane %v2065_v18, 7  ;;  %v2255_v18 = vld [vmem:[%s2016_s17 + $0x70] sm:$0xff] }
  0x40   : > { %438 = vrot.lane.b32.xlu2 %v2085_v25, %s1977_s18  ;;  %v365_v1 = vrot.slane %v2255_v18, 1 }
  0x47   : > { %478 = vrot.lane.b32.xlu0 %v2091_v27, %s1977_s18  ;;  %550 = vrot.lane.b32.xlu1 %v411_v34, %s1978_s19  ;;  %v283_v34 = vrot.slane %v2057_v14, 7  ;;  %v328_v14 = vsel %vm246_vm3, 0.0, %v250_v62 }
  0x48   : > { %590 = vrot.lane.b32.xlu2 %v421_v35, %s1978_s19 }
  0x49   : > { %v2251_v43 = vsel %vm246_vm3, %v283_v34, %v284_v33  ;;  %v339_v28 = vsel %vm246_vm3, 0.0, %v283_v34 }
  0x4f   : > { %440 = vrot.lane.b32.xlu0 %v2114_v36, %s1977_s18  ;;  %480 = vrot.lane.b32.xlu1 %v2123_v40, %s1977_s18 }
  0x50   : > { %552 = vrot.lane.b32.xlu2 %v358_v42, %s1978_s19 }
  0x57   : > { %592 = vrot.lane.b32.xlu0 %v388_v45, %s1978_s19  ;;  %442 = vrot.lane.b32.xlu1 %v2119_v38, %s1977_s18  ;;  %v2258_v45 = vld [vmem:[%s2016_s17 + $0x78] sm:$0xff] }
  0x58   : > { %482 = vrot.lane.b32.xlu2 %v2126_v41, %s1977_s18 }
  0x5f   : > { %554 = vrot.lane.b32.xlu0 %v412_v47, %s1978_s19  ;;  %594 = vrot.lane.b32.xlu1 %v422_v48, %s1978_s19  ;;  %v327_v47 = vsel %vm246_vm3, 0.0, %v247_v39  ;;  %v366_v48 = vrot.slane %v2258_v45, 1 }
  0x60   : > { %444 = vrot.lane.b32.xlu2 %v2147_v49, %s1977_s18 }
  0x61   : > { %v415_v22 = vsel %vm343_vm0, %v366_v48, 0.0 }
  0x67   : > { %484 = vrot.lane.b32.xlu0 %v2160_v52, %s1977_s18  ;;  %556 = vrot.lane.b32.xlu1 %v361_v60, %s1978_s19  ;;  %v248_v60 = vrot.slane %v2032_v3, 7 }
  0x68   : > { %596 = vrot.lane.b32.xlu2 %v391_v61, %s1978_s19  ;;  %v367_v61 = vsel %vm343_vm0, %v365_v1, %v366_v48 }
  0x69   : > { %v249_v62 = vsel %vm246_vm3, %v247_v39, %v248_v60 }
  0x6a   : > { %v431_v4 = vpop.permute.xlu2 %430 }
  0x6b   : > { %v636_v8 = vsel %vm632_vm4, %v252_v6, %v431_v4  ;;  %v2285_v4 = vld [vmem:[%s2016_s17 + $0x88] sm:$0xff]  ;;  %v368_v6 = vrot.slane %v2282_v63, 1 }
  0x6f   : > { %446 = vrot.lane.b32.xlu0 %v2150_v50, %s1977_s18  ;;  %486 = vrot.lane.b32.xlu1 %v2172_v57, %s1977_s18 }
  0x70   : > { %558 = vrot.lane.b32.xlu2 %v413_v7, %s1978_s19 }
  0x72   : > { %v543_v9 = vpop.permute.xlu2 %542 }
  0x73   : > { %v669_v15 = vsel %vm665_vm5, %v636_v8, %v543_v9 }
  0x74   : > { %708 = vst.msk [vmem:[#allocation2 + $0x28] sm:$0xff] %vm698_vm1, %v669_v15 }
  0x77   : > { %598 = vrot.lane.b32.xlu0 %v423_v16, %s1978_s19  ;;  %448 = vrot.lane.b32.xlu1 %v2217_v17, %s1977_s18  ;;  %v369_v16 = vrot.slane %v2285_v4, 1 }
  0x78   : > { %468 = vrot.lane.b32.xlu2 %v2224_v20, %s1977_s18 }
  0x79   : > { %v370_v12 = vsel %vm343_vm0, %v368_v6, %v369_v16  ;;  %v259_v6 = vrot.slane %v2114_v36, 7 }
  0x7a   : > { %v2239_v30 = vpop.permute.xlu2 %432 }
  0x7b   : > { %v637_v29 = vsel %vm632_vm4, %v329_v23, %v2239_v30  ;;  %v254_v30 = vrot.slane %v2051_v13, 7 }
  0x7d   : > { %v255_v1 = vsel %vm246_vm3, %v253_v0, %v254_v30 }
  0x7f   : > { %560 = vrot.lane.b32.xlu0 %v364_v31, %s1978_s19  ;;  %580 = vrot.lane.b32.xlu1 %v379_v32, %s1978_s19 }
  0x80   : > { %450 = vrot.lane.b32.xlu2 %v2221_v19, %s1977_s18 }
  0x81   : > { %v429_v35 = vpop.permute.xlu0 %428  ;;  %v425_v37 = vpop.permute.xlu1 %424 }
  0x82   : > { %v585_v42 = vpop.permute.xlu2 %584  ;;  %v635_v51 = vsel %vm632_vm4, %v328_v14, %v429_v35  ;;  %v633_v53 = vsel %vm632_vm4, %v327_v47, %v425_v37  ;;  %v1233_v37 = vld [vmem:[#allocation2 + $0x28] sm:$0xff]  ;;  %v2323_v14 = vld [vmem:[%s2016_s17 + $0x90] sm:$0xff]  ;;  %v2326_v47 = vld [vmem:[%s2016_s17 + $0x98] sm:$0xff] }
  0x83   : > { %v371_v13 = vrot.slane %v2323_v14, 1 }
  0x87   : > { %470 = vrot.lane.b32.xlu0 %v2227_v21, %s1977_s18  ;;  %562 = vrot.lane.b32.xlu1 %v414_v44, %s1978_s19 }
  0x88   : > { %582 = vrot.lane.b32.xlu2 %v419_v46, %s1978_s19  ;;  %v416_v46 = vsel %vm343_vm0, %v369_v16, 0.0 }
  0x89   : > { %v541_v54 = vpop.permute.xlu0 %540  ;;  %v537_v55 = vpop.permute.xlu1 %536 }
  0x8a   : > { %v668_v56 = vsel %vm665_vm5, %v635_v51, %v541_v54  ;;  %v666_v58 = vsel %vm665_vm5, %v633_v53, %v537_v55  ;;  %v547_v59 = vpop.permute.xlu2 %546 }
  0x8b   : > { %707 = vst.msk [vmem:[#allocation2 + $0x20] sm:$0xff] %vm698_vm1, %v668_v56 }
  0x8c   : > { %705 = vst.msk [vmem:[#allocation2 + $0x10] sm:$0xff] %vm698_vm1, %v666_v58 }
  0x8f   : > { %452 = vrot.lane.b32.xlu0 %v2255_v18, %s1977_s18  ;;  %564 = vrot.lane.b32.xlu1 %v367_v61, %s1978_s19  ;;  %v2348_v61 = vld [vmem:[%s2016_s17 + $0xa0] sm:$0xff] }
  0x90   : > { %454 = vrot.lane.b32.xlu2 %v2258_v45, %s1977_s18 }
  0x91   : > { %v427_v5 = vpop.permute.xlu0 %426  ;;  %v539_v3 = vpop.permute.xlu1 %538 }
  0x92   : > { %v634_v7 = vsel %vm632_vm4, %v249_v62, %v427_v5  ;;  %v1232_v8 = vld [vmem:[#allocation2 + $0x20] sm:$0xff]  ;;  %v2292_v9 = vpop.permute.xlu2 %476  ;;  %v2351_v62 = vld [vmem:[%s2016_s17 + $0xa8] sm:$0xff]  ;;  %v374_v5 = vrot.slane %v2348_v61, 1 }
  0x93   : > { %v667_v10 = vsel %vm665_vm5, %v634_v7, %v539_v3  ;;  %v771_v15 = vld [vmem:[#allocation2 + $0x10] sm:$0xff]  ;;  %1916 = vmatmul.msk.f32.vlgmr.msra.gmra.mxu2 %vm698_vm1, %v1232_v8  ;;  %v375_v3 = vrot.slane %v2351_v62, 1 }
  0x94   : > { %706 = vst.msk [vmem:[#allocation2 + $0x18] sm:$0xff] %vm698_vm1, %v667_v10  ;;  %1848 = vmatmul.msk.f32.vlgmr.msra.gmra.mxu0 %vm698_vm1, %v771_v15  ;;  %1883 = vmatmul.msk.f32.gmra.mxu1 %vm698_vm1, %v771_v15  ;;  %v286_v10 = vrot.slane %v2088_v26, 7 }
  0x95   : > { %v376_v36 = vsel %vm343_vm0, %v374_v5, %v375_v3 }
  0x96   : > { %v340_v26 = vsel %vm246_vm3, 0.0, %v286_v10 }
  0x97   : > { %566 = vrot.lane.b32.xlu0 %v415_v22, %s1978_s19  ;;  %456 = vrot.lane.b32.xlu1 %v2282_v63, %s1977_s18 }
  0x98   : > { %568 = vrot.lane.b32.xlu2 %v370_v12, %s1978_s19  ;;  %v659_v12 = vsel %vm632_vm4, %v340_v26, %v2292_v9  ;;  %v418_v9 = vsel %vm343_vm0, %v375_v3, 0.0 }
  0x99   : > { %v473_v31 = vpop.permute.xlu0 %472  ;;  %v545_v32 = vpop.permute.xlu1 %544 }
  0x9a   : > { %v657_v33 = vsel %vm632_vm4, %v339_v28, %v473_v31  ;;  %v670_v35 = vsel %vm665_vm5, %v637_v29, %v545_v32  ;;  %v2312_v39 = vpop.permute.xlu2 %438  ;;  %v257_v32 = vrot.slane %v2085_v25, 7 }
  0x9b   : > { %709 = vst.msk [vmem:[#allocation2 + $0x30] sm:$0xff] %vm698_vm1, %v670_v35  ;;  %v690_v34 = vsel %vm665_vm5, %v657_v33, %v585_v42  ;;  %1917 = vmatmul.msk.f32.gmra.mxu2 %vm698_vm1, %v1233_v37  ;;  %v772_v44 = vld [vmem:[#allocation2 + $0x18] sm:$0xff]  ;;  %v372_v42 = vrot.slane %v2326_v47, 1  ;;  %v287_v35 = vrot.slane %v2091_v27, 7 }
  0x9c   : > { %729 = vst.msk [vmem:[#allocation2 + $0xd0] sm:$0xff] %vm698_vm1, %v690_v34  ;;  %1849 = vmatmul.msk.f32.gmra.mxu0 %vm698_vm1, %v772_v44  ;;  %1884 = vmatmul.msk.f32.gmra.mxu1 %vm698_vm1, %v772_v44 }
  0x9d   : > { %v373_v58 = vsel %vm343_vm0, %v371_v13, %v372_v42  ;;  %v288_v25 = vsel %vm246_vm3, %v286_v10, %v287_v35 }
  0x9f   : > { %458 = vrot.lane.b32.xlu0 %v2285_v4, %s1977_s18  ;;  %570 = vrot.lane.b32.xlu1 %v416_v46, %s1978_s19 }
  0xa0   : > { %460 = vrot.lane.b32.xlu2 %v2323_v14, %s1977_s18 }
  0xa1   : > { %v435_v48 = vpop.permute.xlu0 %434  ;;  %v475_v51 = vpop.permute.xlu1 %474 }
  0xa2   : > { %v638_v53 = vsel %vm632_vm4, %v255_v1, %v435_v48  ;;  %v1234_v54 = vld [vmem:[#allocation2 + $0x30] sm:$0xff]  ;;  %v591_v60 = vpop.permute.xlu2 %590  ;;  %v658_v7 = vsel %vm632_vm4, %v2251_v43, %v475_v51  ;;  %v331_v51 = vsel %vm246_vm3, 0.0, %v259_v6 }
  0xa3   : > { %v671_v55 = vsel %vm665_vm5, %v638_v53, %v547_v59  ;;  %1918 = vmatmul.msk.f32.gmra.mxu2 %vm698_vm1, %v1234_v54  ;;  %v2339_v56 = vld [vmem:[#allocation2 + $0xd0] sm:$0xff]  ;;  %v260_v59 = vrot.slane %v2119_v38, 7  ;;  %v256_v38 = vrot.slane %v2082_v24, 7  ;;  %v417_v24 = vsel %vm343_vm0, %v372_v42, 0.0 }
  0xa4   : > { %710 = vst.msk [vmem:[#allocation2 + $0x38] sm:$0xff] %vm698_vm1, %v671_v55  ;;  %1850 = vmatmul.msk.f32.gmra.mxu0 %vm698_vm1, %v1232_v8  ;;  %1872 = vmatmul.msk.f32.vlgmr.msra.gmra.mxu3 %vm698_vm1, %v2339_v56  ;;  %v292_v53 = vrot.slane %v2160_v52, 7 }
  0xa5   : > { %1885 = vmatmul.msk.f32.gmra.mxu1 %vm698_vm1, %v1232_v8  ;;  %1956 = vmatpush.msk.msra.mxu3 %vm902_vm2, %v2197_v2  ;;  %v2370_v16 = vsel %vm246_vm3, %v259_v6, %v260_v59 }
  0xa7   : > { %572 = vrot.lane.b32.xlu0 %v373_v58, %s1978_s19  ;;  %462 = vrot.lane.b32.xlu1 %v2326_v47, %s1977_s18  ;;  %v289_v58 = vrot.slane %v2123_v40, 7 }
  0xa8   : > { %1957 = vmatpush.msra.mxu3 %v2211_v11  ;;  %v330_v11 = vsel %vm246_vm3, 0.0, %v256_v38  ;;  %574 = vrot.lane.b32.xlu2 %v417_v24, %s1978_s19 }
  0xa9   : > { %v587_v0 = vpop.permute.xlu0 %586  ;;  %v437_v2 = vpop.permute.xlu1 %436  ;;  %v341_v40 = vsel %vm246_vm3, 0.0, %v289_v58 }
  0xaa   : > { %v691_v8 = vsel %vm665_vm5, %v658_v7, %v587_v0  ;;  %v553_v43 = vpop.permute.xlu2 %552  ;;  %v639_v22 = vsel %vm632_vm4, %v330_v11, %v437_v2 }
  0xab   : > { %730 = vst.msk [vmem:[#allocation2 + $0xd8] sm:$0xff] %vm698_vm1, %v691_v8  ;;  %v1235_v15 = vld [vmem:[#allocation2 + $0x38] sm:$0xff] }
  0xac   : > { %1851 = vmatmul.msk.f32.gmra.mxu0 %vm698_vm1, %v1233_v37  ;;  %1919 = vmatmul.msk.f32.gmra.mxu2 %vm698_vm1, %v1235_v15 }
  0xad   : > { %1886 = vmatmul.msk.f32.gmra.mxu1 %vm698_vm1, %v1233_v37  ;;  %v258_v37 = vsel %vm246_vm3, %v256_v38, %v257_v32  ;;  %v290_v38 = vrot.slane %v2126_v41, 7 }
  0xae   : > { %v640_v27 = vsel %vm632_vm4, %v258_v37, %v2312_v39  ;;  %v293_v39 = vrot.slane %v2172_v57, 7 }
  0xaf   : > { %464 = vrot.lane.b32.xlu0 %v2348_v61, %s1977_s18  ;;  %576 = vrot.lane.b32.xlu1 %v376_v36, %s1978_s19 }
  0xb0   : > { %466 = vrot.lane.b32.xlu2 %v2351_v62, %s1977_s18  ;;  %v2424_v3 = vsel %vm246_vm3, %v292_v53, %v293_v39 }
  0xb1   : > { %v549_v23 = vpop.permute.xlu0 %548  ;;  %v589_v28 = vpop.permute.xlu1 %588 }
  0xb2   : > { %v672_v29 = vsel %vm665_vm5, %v639_v22, %v549_v23  ;;  %v692_v31 = vsel %vm665_vm5, %v659_v12, %v589_v28  ;;  %v2389_v33 = vld [vmem:[#allocation2 + $0xd8] sm:$0xff]  ;;  %v483_v34 = vpop.permute.xlu2 %482  ;;  %v262_v22 = vrot.slane %v2147_v49, 7  ;;  %v342_v28 = vsel %vm246_vm3, 0.0, %v292_v53 }
  0xb3   : > { %711 = vst.msk [vmem:[#allocation2 + $0x40] sm:$0xff] %vm698_vm1, %v672_v29  ;;  %1873 = vmatmul.msk.f32.gmra.mxu3 %vm698_vm1, %v2389_v33 }
  0xb4   : > { %731 = vst.msk [vmem:[#allocation2 + $0xe0] sm:$0xff] %vm698_vm1, %v692_v31  ;;  %1852 = vmatmul.msk.f32.gmra.mxu0 %vm698_vm1, %v1234_v54 }
  0xb5   : > { %1887 = vmatmul.msk.f32.gmra.mxu1 %vm698_vm1, %v1234_v54 }
  0xb7   : > { %578 = vrot.lane.b32.xlu0 %v418_v9, %s1978_s19 }
  0xb9   : > { %v479_v44 = vpop.permute.xlu0 %478  ;;  %v551_v30 = vpop.permute.xlu1 %550 }
  0xba   : > { %v660_v46 = vsel %vm632_vm4, %v288_v25, %v479_v44  ;;  %v673_v1 = vsel %vm665_vm5, %v640_v27, %v551_v30  ;;  %v1236_v13 = vld [vmem:[#allocation2 + $0x40] sm:$0xff]  ;;  %v445_v5 = vpop.permute.xlu2 %444 }
  0xbb   : > { %712 = vst.msk [vmem:[#allocation2 + $0x48] sm:$0xff] %vm698_vm1, %v673_v1  ;;  %v693_v42 = vsel %vm665_vm5, %v660_v46, %v591_v60  ;;  %v2410_v48 = vld [vmem:[#allocation2 + $0xe0] sm:$0xff]  ;;  %1920 = vmatmul.msk.f32.gmra.mxu2 %vm698_vm1, %v1236_v13 }
  0xbc   : > { %732 = vst.msk [vmem:[#allocation2 + $0xe8] sm:$0xff] %vm698_vm1, %v693_v42  ;;  %1874 = vmatmul.msk.f32.gmra.mxu3 %vm698_vm1, %v2410_v48  ;;  %1853 = vmatmul.msk.f32.gmra.mxu0 %vm698_vm1, %v1235_v15 }
  0xbd   : > { %1888 = vmatmul.msk.f32.gmra.mxu1 %vm698_vm1, %v1235_v15  ;;  %v291_v15 = vsel %vm246_vm3, %v289_v58, %v290_v38  ;;  %v280_v58 = vrot.slane %v2224_v20, 7  ;;  %v281_v38 = vrot.slane %v2227_v21, 7 }
  0xbe   : > { %v662_v24 = vsel %vm632_vm4, %v291_v15, %v483_v34  ;;  %v263_v34 = vrot.slane %v2150_v50, 7 }
  0xc0   : > { %v264_v27 = vsel %vm246_vm3, %v262_v22, %v263_v34 }
  0xc1   : > { %v441_v54 = vpop.permute.xlu0 %440  ;;  %v481_v55 = vpop.permute.xlu1 %480 }
  0xc2   : > { %v641_v60 = vsel %vm632_vm4, %v331_v51, %v441_v54  ;;  %v1237_v59 = vld [vmem:[#allocation2 + $0x48] sm:$0xff]  ;;  %v661_v52 = vsel %vm632_vm4, %v341_v40, %v481_v55  ;;  %v597_v10 = vpop.permute.xlu2 %596  ;;  %v265_v54 = vrot.slane %v2217_v17, 7 }
  0xc3   : > { %v674_v7 = vsel %vm665_vm5, %v641_v60, %v553_v43  ;;  %1921 = vmatmul.msk.f32.gmra.mxu2 %vm698_vm1, %v1237_v59  ;;  %v2428_v57 = vld [vmem:[#allocation2 + $0xe8] sm:$0xff] }
  0xc4   : > { %713 = vst.msk [vmem:[#allocation2 + $0x50] sm:$0xff] %vm698_vm1, %v674_v7  ;;  %1854 = vmatmul.msk.f32.gmra.mxu0 %vm698_vm1, %v1236_v13  ;;  %1875 = vmatmul.msk.f32.gmra.mxu3 %vm698_vm1, %v2428_v57 }
  0xc5   : > { %1889 = vmatmul.msk.f32.gmra.mxu1 %vm698_vm1, %v1236_v13 }
  0xc9   : > { %v593_v6 = vpop.permute.xlu0 %592  ;;  %v443_v0 = vpop.permute.xlu1 %442 }
  0xca   : > { %v694_v2 = vsel %vm665_vm5, %v661_v52, %v593_v6  ;;  %v642_v36 = vsel %vm632_vm4, %v2370_v16, %v443_v0  ;;  %v332_v16 = vsel %vm246_vm3, 0.0, %v262_v22  ;;  %v559_v23 = vpop.permute.xlu2 %558  ;;  %v266_v0 = vrot.slane %v2221_v19, 7 }
  0xcb   : > { %733 = vst.msk [vmem:[#allocation2 + $0xf0] sm:$0xff] %vm698_vm1, %v694_v2  ;;  %v1238_v8 = vld [vmem:[#allocation2 + $0x50] sm:$0xff]  ;;  %v643_v49 = vsel %vm632_vm4, %v332_v16, %v445_v5  ;;  %v333_v5 = vsel %vm246_vm3, 0.0, %v265_v54  ;;  %v282_v19 = vsel %vm246_vm3, %v280_v58, %v281_v38 }
  0xcc   : > { %1855 = vmatmul.msk.f32.gmra.mxu0 %vm698_vm1, %v1237_v59  ;;  %1922 = vmatmul.msk.f32.gmra.mxu2 %vm698_vm1, %v1238_v8  ;;  %v267_v15 = vsel %vm246_vm3, %v265_v54, %v266_v0 }
  0xcd   : > { %1890 = vmatmul.msk.f32.gmra.mxu1 %vm698_vm1, %v1237_v59 }
  0xd1   : > { %v555_v11 = vpop.permute.xlu0 %554  ;;  %v595_v26 = vpop.permute.xlu1 %594 }
  0xd2   : > { %v675_v41 = vsel %vm665_vm5, %v642_v36, %v555_v11  ;;  %v695_v43 = vsel %vm665_vm5, %v662_v24, %v595_v26  ;;  %v2450_v12 = vld [vmem:[#allocation2 + $0xf0] sm:$0xff]  ;;  %v469_v44 = vpop.permute.xlu2 %468  ;;  %v271_v36 = vrot.slane %v2282_v63, 7 }
  0xd3   : > { %714 = vst.msk [vmem:[#allocation2 + $0x58] sm:$0xff] %vm698_vm1, %v675_v41  ;;  %1876 = vmatmul.msk.f32.gmra.mxu3 %vm698_vm1, %v2450_v12 }
  0xd4   : > { %734 = vst.msk [vmem:[#allocation2 + $0xf8] sm:$0xff] %vm698_vm1, %v695_v43  ;;  %1856 = vmatmul.msk.f32.gmra.mxu0 %vm698_vm1, %v1238_v8 }
  0xd5   : > { %1891 = vmatmul.msk.f32.gmra.mxu1 %vm698_vm1, %v1238_v8  ;;  %v272_v8 = vrot.slane %v2285_v4, 7  ;;  %v268_v4 = vrot.slane %v2255_v18, 7 }
  0xd7   : > { %v273_v41 = vsel %vm246_vm3, %v271_v36, %v272_v8  ;;  %v334_v18 = vsel %vm246_vm3, 0.0, %v268_v4 }
  0xd9   : > { %v485_v29 = vpop.permute.xlu0 %484  ;;  %v557_v31 = vpop.permute.xlu1 %556 }
  0xda   : > { %v663_v32 = vsel %vm632_vm4, %v342_v28, %v485_v29  ;;  %v676_v35 = vsel %vm665_vm5, %v643_v49, %v557_v31  ;;  %v1239_v9 = vld [vmem:[#allocation2 + $0x58] sm:$0xff]  ;;  %v451_v59 = vpop.permute.xlu2 %450  ;;  %v1135_v28 = vpop.f32.mrf.mxu1  ;;  %v269_v49 = vrot.slane %v2258_v45, 7 }
  0xdb   : > { %715 = vst.msk [vmem:[#allocation2 + $0x60] sm:$0xff] %vm698_vm1, %v676_v35  ;;  %v696_v37 = vsel %vm665_vm5, %v663_v32, %v597_v10  ;;  %v2465_v25 = vld [vmem:[#allocation2 + $0xf8] sm:$0xff]  ;;  %1923 = vmatmul.msk.f32.gmra.mxu2 %vm698_vm1, %v1239_v9  ;;  %v646_v24 = vsel %vm632_vm4, %v267_v15, %v451_v59 }
  0xdc   : > { %735 = vst.msk [vmem:[#allocation2 + $0x100] sm:$0xff] %vm698_vm1, %v696_v37  ;;  %1877 = vmatmul.msk.f32.gmra.mxu3 %vm698_vm1, %v2465_v25  ;;  %1857 = vmatmul.msk.f32.gmra.mxu0 %vm698_vm1, %v1239_v9  ;;  %v270_v45 = vsel %vm246_vm3, %v268_v4, %v269_v49 }
  0xdd   : > { %1892 = vmatmul.msk.f32.gmra.mxu1 %vm698_vm1, %v1239_v9 }
  0xe1   : > { %v447_v30 = vpop.permute.xlu0 %446  ;;  %v487_v46 = vpop.permute.xlu1 %486 }
  0xe2   : > { %v644_v1 = vsel %vm632_vm4, %v264_v27, %v447_v30  ;;  %v1240_v13 = vld [vmem:[#allocation2 + $0x60] sm:$0xff]  ;;  %v664_v39 = vsel %vm632_vm4, %v2424_v3, %v487_v46  ;;  %v338_v3 = vsel %vm246_vm3, 0.0, %v280_v58  ;;  %v583_v10 = vpop.permute.xlu2 %582  ;;  %v335_v27 = vsel %vm246_vm3, 0.0, %v271_v36 }
  0xe3   : > { %v677_v42 = vsel %vm665_vm5, %v644_v1, %v559_v23  ;;  %1924 = vmatmul.msk.f32.gmra.mxu2 %vm698_vm1, %v1240_v13  ;;  %v2478_v50 = vld [vmem:[#allocation2 + $0x100] sm:$0xff]  ;;  %v655_v7 = vsel %vm632_vm4, %v338_v3, %v469_v44 }
  0xe4   : > { %716 = vst.msk [vmem:[#allocation2 + $0x68] sm:$0xff] %vm698_vm1, %v677_v42  ;;  %1858 = vmatmul.msk.f32.gmra.mxu0 %vm698_vm1, %v1240_v13  ;;  %1878 = vmatmul.msk.f32.gmra.mxu3 %vm698_vm1, %v2478_v50  ;;  %v1138_v42 = vpop.f32.mrf.mxu1 }
  0xe5   : > { %1893 = vmatmul.msk.f32.gmra.mxu1 %vm698_vm1, %v1240_v13 }
  0xe9   : > { %v599_v51 = vpop.permute.xlu0 %598  ;;  %v449_v53 = vpop.permute.xlu1 %448 }
  0xea   : > { %v697_v55 = vsel %vm665_vm5, %v664_v39, %v599_v51  ;;  %v645_v17 = vsel %vm632_vm4, %v333_v5, %v449_v53  ;;  %v455_v23 = vpop.permute.xlu2 %454 }
  0xeb   : > { %736 = vst.msk [vmem:[#allocation2 + $0x108] sm:$0xff] %vm698_vm1, %v697_v55  ;;  %v782_v60 = vld [vmem:[#allocation2 + $0x68] sm:$0xff]  ;;  %v648_v34 = vsel %vm632_vm4, %v270_v45, %v455_v23  ;;  %v274_v55 = vrot.slane %v2323_v14, 7 }
  0xec   : > { %1859 = vmatmul.msk.f32.gmra.mxu0 %vm698_vm1, %v782_v60  ;;  %1925 = vmatmul.msk.f32.gmra.mxu2 %vm698_vm1, %v782_v60 }
  0xed   : > { %1894 = vmatmul.msk.f32.gmra.mxu1 %vm698_vm1, %v782_v60  ;;  %v336_v14 = vsel %vm246_vm3, 0.0, %v274_v55 }
  0xf1   : > { %v561_v40 = vpop.permute.xlu0 %560  ;;  %v581_v20 = vpop.permute.xlu1 %580 }
  0xf2   : > { %v678_v52 = vsel %vm665_vm5, %v645_v17, %v561_v40  ;;  %v688_v6 = vsel %vm665_vm5, %v655_v7, %v581_v20  ;;  %v2501_v2 = vld [vmem:[#allocation2 + $0x108] sm:$0xff]  ;;  %v569_v44 = vpop.permute.xlu2 %568  ;;  %v275_v17 = vrot.slane %v2326_v47, 7 }
  0xf3   : > { %717 = vst.msk [vmem:[#allocation2 + $0x70] sm:$0xff] %vm698_vm1, %v678_v52  ;;  %1879 = vmatmul.msk.f32.gmra.mxu3 %vm698_vm1, %v2501_v2 }
  0xf4   : > { %727 = vst.msk [vmem:[#allocation2 + $0xc0] sm:$0xff] %vm698_vm1, %v688_v6  ;;  %v276_v6 = vsel %vm246_vm3, %v274_v55, %v275_v17 }
  0xf9   : > { %v471_v11 = vpop.permute.xlu0 %470  ;;  %v563_v26 = vpop.permute.xlu1 %562 }
  0xfa   : > { %v656_v43 = vsel %vm632_vm4, %v282_v19, %v471_v11  ;;  %v679_v21 = vsel %vm665_vm5, %v646_v24, %v563_v26  ;;  %v783_v22 = vld [vmem:[#allocation2 + $0x70] sm:$0xff]  ;;  %v461_v53 = vpop.permute.xlu2 %460  ;;  %v277_v24 = vrot.slane %v2348_v61, 7 }
  0xfb   : > { %718 = vst.msk [vmem:[#allocation2 + $0x78] sm:$0xff] %vm698_vm1, %v679_v21  ;;  %v689_v16 = vsel %vm665_vm5, %v656_v43, %v583_v10  ;;  %1860 = vmatmul.msk.f32.gmra.mxu0 %vm698_vm1, %v783_v22  ;;  %1895 = vmatmul.msk.f32.gmra.mxu1 %vm698_vm1, %v783_v22  ;;  %v2521_v63 = vld [vmem:[#allocation2 + $0xc0] sm:$0xff]  ;;  %v651_v52 = vsel %vm632_vm4, %v336_v14, %v461_v53 }
  0xfc   : > { %728 = vst.msk [vmem:[#allocation2 + $0xc8] sm:$0xff] %vm698_vm1, %v689_v16  ;;  %1905 = vmatmul.msk.f32.vlgmr.msrb.gmra.mxu3 %vm698_vm1, %v2521_v63  ;;  %1926 = vmatmul.msk.f32.gmra.mxu2 %vm698_vm1, %v783_v22  ;;  %v337_v61 = vsel %vm246_vm3, 0.0, %v277_v24  ;;  %v278_v16 = vrot.slane %v2351_v62, 7 }
  0xfe   : > { %v279_v62 = vsel %vm246_vm3, %v277_v24, %v278_v16 }
 0x101   : > { %v453_v29 = vpop.permute.xlu0 %452  ;;  %v565_v31 = vpop.permute.xlu1 %564 }
 0x102   : > { %v647_v32 = vsel %vm632_vm4, %v334_v18, %v453_v29  ;;  %v784_v35 = vld [vmem:[#allocation2 + $0x78] sm:$0xff]  ;;  %v575_v8 = vpop.permute.xlu2 %574 }
 0x103   : > { %v680_v9 = vsel %vm665_vm5, %v647_v32, %v565_v31  ;;  %1861 = vmatmul.msk.f32.gmra.mxu0 %vm698_vm1, %v784_v35  ;;  %1896 = vmatmul.msk.f32.gmra.mxu1 %vm698_vm1, %v784_v35  ;;  %v2533_v37 = vld [vmem:[#allocation2 + $0xc8] sm:$0xff] }
 0x104   : > { %719 = vst.msk [vmem:[#allocation2 + $0x80] sm:$0xff] %vm698_vm1, %v680_v9  ;;  %1927 = vmatmul.msk.f32.gmra.mxu2 %vm698_vm1, %v784_v35  ;;  %1906 = vmatmul.msk.f32.gmra.mxu3 %vm698_vm1, %v2533_v37 }
 0x109   : > { %v567_v30 = vpop.permute.xlu0 %566  ;;  %v457_v46 = vpop.permute.xlu1 %456 }
 0x10a   : > { %v681_v1 = vsel %vm665_vm5, %v648_v34, %v567_v30  ;;  %v649_v13 = vsel %vm632_vm4, %v335_v27, %v457_v46  ;;  %v467_v31 = vpop.permute.xlu2 %466 }
 0x10b   : > { %720 = vst.msk [vmem:[#allocation2 + $0x88] sm:$0xff] %vm698_vm1, %v681_v1  ;;  %v785_v39 = vld [vmem:[#allocation2 + $0x80] sm:$0xff]  ;;  %v682_v51 = vsel %vm665_vm5, %v649_v13, %v569_v44  ;;  %v654_v9 = vsel %vm632_vm4, %v279_v62, %v467_v31 }
 0x10c   : > { %1862 = vmatmul.msk.f32.gmra.mxu0 %vm698_vm1, %v785_v39  ;;  %1897 = vmatmul.msk.f32.gmra.mxu1 %vm698_vm1, %v785_v39  ;;  %721 = vst.msk [vmem:[#allocation2 + $0x90] sm:$0xff] %vm698_vm1, %v682_v51 }
 0x10d   : > { %1907 = vmatmul.msk.f32.gmra.mxu3 %vm698_vm1, %v2339_v56  ;;  %1928 = vmatmul.msk.f32.gmra.mxu2 %vm698_vm1, %v785_v39 }
 0x111   : > { %v923_v54 = vpop.f32.mrf.mxu0  ;;  %v459_v60 = vpop.permute.xlu0 %458 }
 0x112   : > { %v786_v58 = vld [vmem:[#allocation2 + $0x88] sm:$0xff]  ;;  %v571_v59 = vpop.permute.xlu1 %570  ;;  %v650_v5 = vsel %vm632_vm4, %v273_v41, %v459_v60  ;;  %v1136_v7 = vadd.f32 %v1135_v28, %v923_v54  ;;  %v1141_v40 = vpop.f32.mrf.mxu1 }
 0x113   : > { %v683_v3 = vsel %vm665_vm5, %v650_v5, %v571_v59  ;;  %v787_v38 = vld [vmem:[#allocation2 + $0x90] sm:$0xff] }
 0x114   : > { %1863 = vmatmul.msk.f32.gmra.mxu0 %vm698_vm1, %v786_v58  ;;  %1898 = vmatmul.msk.f32.gmra.mxu1 %vm698_vm1, %v786_v58  ;;  %722 = vst.msk [vmem:[#allocation2 + $0x98] sm:$0xff] %vm698_vm1, %v683_v3 }
 0x115   : > { %1908 = vmatmul.msk.f32.gmra.mxu3 %vm698_vm1, %v2389_v33  ;;  %1929 = vmatmul.msk.f32.gmra.mxu2 %vm698_vm1, %v786_v58 }
 0x116   : > { %v1383_v20 = vpop.f32.mrf.mxu2 }
 0x117   : > { %v2570_v47 = vadd.f32 %v1383_v20, %v1136_v7 }
 0x119   : > { %1714 = vst.msk [vmem:[%s2568_s7] sm:$0xff] %vm665_vm5, %v2570_v47  ;;  %v926_v0 = vpop.f32.mrf.mxu0  ;;  %v573_v10 = vpop.permute.xlu0 %572 }
 0x11a   : > { %v463_v15 = vpop.permute.xlu1 %462  ;;  %v684_v36 = vsel %vm665_vm5, %v651_v52, %v573_v10  ;;  %v1139_v26 = vadd.f32 %v1138_v42, %v926_v0  ;;  %v1144_v43 = vpop.f32.mrf.mxu1 }
 0x11b   : > { %v652_v19 = vsel %vm632_vm4, %v276_v6, %v463_v15  ;;  %723 = vst.msk [vmem:[#allocation2 + $0xa0] sm:$0xff] %vm698_vm1, %v684_v36  ;;  %v788_v4 = vld [vmem:[#allocation2 + $0x98] sm:$0xff] }
 0x11c   : > { %1864 = vmatmul.msk.f32.gmra.mxu0 %vm698_vm1, %v787_v38  ;;  %1899 = vmatmul.msk.f32.gmra.mxu1 %vm698_vm1, %v787_v38  ;;  %v685_v11 = vsel %vm665_vm5, %v652_v19, %v575_v8 }
 0x11d   : > { %1909 = vmatmul.msk.f32.gmra.mxu3 %vm698_vm1, %v2410_v48  ;;  %1930 = vmatmul.msk.f32.gmra.mxu2 %vm698_vm1, %v787_v38  ;;  %724 = vst.msk [vmem:[#allocation2 + $0xa8] sm:$0xff] %vm698_vm1, %v685_v11 }
 0x11e   : > { %v1386_v41 = vpop.f32.mrf.mxu2 }
 0x11f   : > { %v2588_v21 = vadd.f32 %v1386_v41, %v1139_v26 }
 0x121   : > { %1715 = vst.msk [vmem:[%s2568_s7 + $0x8] sm:$0xff] %vm665_vm5, %v2588_v21  ;;  %v929_v22 = vpop.f32.mrf.mxu0  ;;  %v465_v23 = vpop.permute.xlu0 %464 }
 0x122   : > { %v653_v18 = vsel %vm632_vm4, %v337_v61, %v465_v23  ;;  %v577_v28 = vpop.permute.xlu1 %576  ;;  %v1142_v29 = vadd.f32 %v1141_v40, %v929_v22  ;;  %v1147_v45 = vpop.f32.mrf.mxu1  ;;  %v789_v27 = vld [vmem:[#allocation2 + $0xa0] sm:$0xff] }
 0x123   : > { %v686_v49 = vsel %vm665_vm5, %v653_v18, %v577_v28 }
 0x124   : > { %1865 = vmatmul.msk.f32.gmra.mxu0 %vm698_vm1, %v788_v4  ;;  %1900 = vmatmul.msk.f32.gmra.mxu1 %vm698_vm1, %v788_v4  ;;  %725 = vst.msk [vmem:[#allocation2 + $0xb0] sm:$0xff] %vm698_vm1, %v686_v49  ;;  %v790_v39 = vld [vmem:[#allocation2 + $0xa8] sm:$0xff] }
 0x125   : > { %1910 = vmatmul.msk.f32.gmra.mxu3 %vm698_vm1, %v2428_v57  ;;  %1931 = vmatmul.msk.f32.gmra.mxu2 %vm698_vm1, %v788_v4 }
 0x126   : > { %v1389_v32 = vpop.f32.mrf.mxu2 }
 0x127   : > { %v2604_v35 = vadd.f32 %v1389_v32, %v1142_v29  ;;  %v2627_v53 = vpop.f32.mrf.mxu3 }
 0x129   : > { %1716 = vst.msk [vmem:[%s2568_s7 + $0x10] sm:$0xff] %vm665_vm5, %v2604_v35  ;;  %v932_v34 = vpop.f32.mrf.mxu0  ;;  %v579_v44 = vpop.permute.xlu0 %578 }
 0x12a   : > { %v687_v30 = vsel %vm665_vm5, %v654_v9, %v579_v44  ;;  %v1145_v46 = vadd.f32 %v1144_v43, %v932_v34  ;;  %v1150_v51 = vpop.f32.mrf.mxu1  ;;  %v1262_v43 = vld [vmem:[#allocation2 + $0x110] sm:$0xff] }
 0x12b   : > { %726 = vst.msk [vmem:[#allocation2 + $0xb8] sm:$0xff] %vm698_vm1, %v687_v30  ;;  %v791_v55 = vld [vmem:[#allocation2 + $0xb0] sm:$0xff] }
 0x12c   : > { %1866 = vmatmul.msk.f32.gmra.mxu0 %vm698_vm1, %v789_v27  ;;  %1901 = vmatmul.msk.f32.gmra.mxu1 %vm698_vm1, %v789_v27 }
 0x12d   : > { %1911 = vmatmul.msk.f32.gmra.mxu3 %vm698_vm1, %v2450_v12  ;;  %1932 = vmatmul.msk.f32.gmra.mxu2 %vm698_vm1, %v789_v27 }
 0x12f   : > { %v1392_v1 = vpop.f32.mrf.mxu2 }
 0x130   : > { %v2617_v13 = vadd.f32 %v1392_v1, %v1145_v46 }
 0x131   : > { %v935_v42 = vpop.f32.mrf.mxu0 }
 0x132   : > { %1717 = vst.msk [vmem:[%s2568_s7 + $0x18] sm:$0xff] %vm665_vm5, %v2617_v13  ;;  %v1148_v58 = vadd.f32 %v1147_v45, %v935_v42  ;;  %v1153_v60 = vpop.f32.mrf.mxu1  ;;  %v792_v7 = vld [vmem:[#allocation2 + $0xb8] sm:$0xff] }
 0x134   : > { %1867 = vmatmul.msk.f32.gmra.mxu0 %vm698_vm1, %v790_v39  ;;  %1902 = vmatmul.msk.f32.gmra.mxu1 %vm698_vm1, %v790_v39 }
 0x135   : > { %1912 = vmatmul.msk.f32.gmra.mxu3 %vm698_vm1, %v2465_v25  ;;  %1933 = vmatmul.msk.f32.gmra.mxu2 %vm698_vm1, %v790_v39 }
 0x136   : > { %v2634_v59 = vpop.f32.mrf.mxu3 }
 0x139   : > { %v938_v54 = vpop.f32.mrf.mxu0 }
 0x13a   : > { %v1151_v40 = vadd.f32 %v1150_v51, %v938_v54  ;;  %v1156_v14 = vpop.f32.mrf.mxu1 }
 0x13c   : > { %1868 = vmatmul.msk.f32.gmra.mxu0 %vm698_vm1, %v791_v55  ;;  %1903 = vmatmul.msk.f32.gmra.mxu1 %vm698_vm1, %v791_v55 }
 0x13d   : > { %1934 = vmatmul.msk.f32.gmra.mxu2 %vm698_vm1, %v791_v55  ;;  %1940 = vmatmul.msk.f32.vlgmr.msra.gmra.mxu3 %vm698_vm1, %v2410_v48 }
 0x13e   : > { %v1395_v5 = vpop.f32.mrf.mxu2 }
 0x13f   : > { %v2636_v3 = vadd.f32 %v1395_v5, %v1148_v58  ;;  %v2648_v52 = vpop.f32.mrf.mxu3 }
 0x141   : > { %1718 = vst.msk [vmem:[%s2568_s7 + $0x20] sm:$0xff] %vm665_vm5, %v2636_v3  ;;  %v941_v17 = vpop.f32.mrf.mxu0 }
 0x142   : > { %v1159_v8 = vpop.f32.mrf.mxu1 }
 0x144   : > { %1869 = vmatmul.msk.f32.gmra.mxu0 %vm698_vm1, %v792_v7  ;;  %1904 = vmatmul.msk.f32.gmra.mxu1 %vm698_vm1, %v792_v7 }
 0x145   : > { %1935 = vmatmul.msk.f32.gmra.mxu2 %vm698_vm1, %v792_v7  ;;  %1941 = vmatmul.msk.f32.gmra.mxu3 %vm698_vm1, %v2428_v57  ;;  %v1154_v57 = vadd.f32 %v1153_v60, %v941_v17 }
 0x146   : > { %v1398_v48 = vpop.f32.mrf.mxu2 }
 0x147   : > { %v2646_v20 = vadd.f32 %v1398_v48, %v1151_v40  ;;  %v2661_v10 = vpop.f32.mrf.mxu3 }
 0x149   : > { %1719 = vst.msk [vmem:[%s2568_s7 + $0x28] sm:$0xff] %vm665_vm5, %v2646_v20  ;;  %v944_v6 = vpop.f32.mrf.mxu0 }
 0x14a   : > { %v1157_v19 = vadd.f32 %v1156_v14, %v944_v6 }
 0x14c   : > { %1870 = vmatmul.msk.f32.gmra.mxu0 %vm698_vm1, %v2521_v63 }
 0x14d   : > { %1936 = vmatmul.msk.f32.gmra.mxu2 %vm698_vm1, %v2521_v63  ;;  %1942 = vmatmul.msk.f32.gmra.mxu3 %vm698_vm1, %v2450_v12  ;;  %v1162_v63 = vpop.f32.mrf.mxu1 }
 0x14f   : > { %v1401_v0 = vpop.f32.mrf.mxu2 }
 0x150   : > { %v2659_v38 = vadd.f32 %v1401_v0, %v1154_v57 }
 0x151   : > { %v947_v15 = vpop.f32.mrf.mxu0 }
 0x152   : > { %1720 = vst.msk [vmem:[%s2568_s7 + $0x30] sm:$0xff] %vm665_vm5, %v2659_v38 }
 0x154   : > { %1871 = vmatmul.msk.f32.gmra.mxu0 %vm698_vm1, %v2533_v37 }
 0x155   : > { %1937 = vmatmul.msk.f32.gmra.mxu2 %vm698_vm1, %v2533_v37  ;;  %1943 = vmatmul.msk.f32.gmra.mxu3 %vm698_vm1, %v2465_v25  ;;  %v1160_v25 = vadd.f32 %v1159_v8, %v947_v15  ;;  %v1165_v26 = vpop.f32.mrf.mxu1 }
 0x156   : > { %v2672_v12 = vpop.f32.mrf.mxu3 }
 0x159   : > { %v950_v36 = vpop.f32.mrf.mxu0 }
 0x15a   : > { %v1163_v61 = vadd.f32 %v1162_v63, %v950_v36 }
 0x15d   : > { %1938 = vmatmul.msk.f32.gmra.mxu2 %vm698_vm1, %v2339_v56  ;;  %1944 = vmatmul.msk.f32.gmra.mxu3 %vm698_vm1, %v2478_v50  ;;  %v1168_v4 = vpop.f32.mrf.mxu1 }
 0x15e   : > { %v1404_v24 = vpop.f32.mrf.mxu2 }
 0x15f   : > { %v2678_v11 = vadd.f32 %v1404_v24, %v1157_v19  ;;  %v2683_v37 = vpop.f32.mrf.mxu3 }
 0x161   : > { %1721 = vst.msk [vmem:[%s2568_s7 + $0x38] sm:$0xff] %vm665_vm5, %v2678_v11  ;;  %v953_v56 = vpop.f32.mrf.mxu0 }
 0x162   : > { %v1166_v29 = vadd.f32 %v1165_v26, %v953_v56 }
 0x165   : > { %1939 = vmatmul.msk.f32.gmra.mxu2 %vm698_vm1, %v2389_v33  ;;  %1945 = vmatmul.msk.f32.gmra.mxu3 %vm698_vm1, %v2501_v2  ;;  %v1263_v2 = vld [vmem:[#allocation2 + $0x118] sm:$0xff]  ;;  %v1171_v49 = vpop.f32.mrf.mxu1 }
 0x166   : > { %v1407_v41 = vpop.f32.mrf.mxu2 }
 0x167   : > { %v2689_v50 = vadd.f32 %v1407_v41, %v1160_v25  ;;  %v2695_v22 = vpop.f32.mrf.mxu3 }
 0x169   : > { %1722 = vst.msk [vmem:[%s2568_s7 + $0x40] sm:$0xff] %vm665_vm5, %v2689_v50  ;;  %v956_v33 = vpop.f32.mrf.mxu0 }
 0x16a   : > { %v1169_v34 = vadd.f32 %v1168_v4, %v956_v33 }
 0x16d   : > { %1946 = vmatmul.msk.f32.gmra.mxu3 %vm698_vm1, %v1262_v43  ;;  %v1174_v45 = vpop.f32.mrf.mxu1 }
 0x16f   : > { %v1410_v16 = vpop.f32.mrf.mxu2 }
 0x170   : > { %v2697_v23 = vadd.f32 %v1410_v16, %v1163_v61 }
 0x172   : > { %1723 = vst.msk [vmem:[%s2568_s7 + $0x48] sm:$0xff] %vm665_vm5, %v2697_v23 }
 0x175   : > { %1947 = vmatmul.msk.f32.gmra.mxu3 %vm698_vm1, %v1263_v2 }
 0x176   : > { %v2703_v18 = vpop.f32.mrf.mxu3 }
 0x178   : > { %v959_v28 = vpop.f32.mrf.mxu0  ;;  %v1177_v1 = vpop.f32.mrf.mxu1 }
 0x179   : > { %v1172_v42 = vadd.f32 %v1171_v49, %v959_v28  ;;  %v1512_v49 = vsel %vm665_vm5, %v2588_v21, 0.0 }
 0x17f   : > { %v1207_v62 = vpop.f32.mrf.mxu3  ;;  %v1413_v31 = vpop.f32.mrf.mxu2 }
 0x180   : > { %v2705_v32 = vadd.f32 %v1413_v31, %v1166_v29  ;;  %v962_v9 = vpop.f32.mrf.mxu0  ;;  %v1180_v58 = vpop.f32.mrf.mxu1  ;;  %v1511_v31 = vsel %vm665_vm5, %v2570_v47, 0.0 }
 0x181   : > { %v1175_v60 = vadd.f32 %v1174_v45, %v962_v9  ;;  %v1514_v9 = vsel %vm665_vm5, %v2604_v35, 0.0  ;;  %v1208_v45 = vadd.f32 %v1207_v62, %v2627_v53  ;;  %v1520_v53 = vsel %vm665_vm5, %v2646_v20, 0.0 }
 0x182   : > { %1724 = vst.msk [vmem:[%s2568_s7 + $0x50] sm:$0xff] %vm665_vm5, %v2705_v32 }
 0x187   : > { %v1416_v27 = vpop.f32.mrf.mxu2  ;;  %v2710_v44 = vpop.f32.mrf.mxu3 }
 0x188   : > { %v2712_v30 = vadd.f32 %v1416_v27, %v1169_v34  ;;  %v1513_v27 = vadd.f32 %v1512_v49, %v1511_v31 }
 0x189   : > { %v965_v46 = vpop.f32.mrf.mxu0  ;;  %v1183_v14 = vpop.f32.mrf.mxu1 }
 0x18a   : > { %1725 = vst.msk [vmem:[%s2568_s7 + $0x58] sm:$0xff] %vm665_vm5, %v2712_v30  ;;  %v1178_v48 = vadd.f32 %v1177_v1, %v965_v46 }
 0x190   : > { %v2717_v39 = vpop.f32.mrf.mxu3  ;;  %v1419_v51 = vpop.f32.mrf.mxu2 }
 0x191   : > { %v2719_v54 = vadd.f32 %v1419_v51, %v1172_v42  ;;  %v968_v55 = vpop.f32.mrf.mxu0  ;;  %v1186_v19 = vpop.f32.mrf.mxu1  ;;  %v1516_v42 = vsel %vm665_vm5, %v2617_v13, 0.0  ;;  %v1214_v49 = vadd.f32 %v2717_v39, %v2648_v52 }
 0x192   : > { %v1181_v8 = vadd.f32 %v1180_v58, %v968_v55  ;;  %v1515_v58 = vadd.f32 %v1514_v9, %v1513_v27  ;;  %v1532_v27 = vsel %vm665_vm5, %v2712_v30, 0.0 }
 0x193   : > { %1726 = vst.msk [vmem:[%s2568_s7 + $0x60] sm:$0xff] %vm665_vm5, %v2719_v54 }
 0x198   : > { %v2724_v5 = vpop.f32.mrf.mxu3  ;;  %v1422_v17 = vpop.f32.mrf.mxu2 }
 0x199   : > { %v2726_v7 = vadd.f32 %v1422_v17, %v1175_v60  ;;  %v971_v40 = vpop.f32.mrf.mxu0  ;;  %v1189_v61 = vpop.f32.mrf.mxu1  ;;  %v1518_v60 = vsel %vm665_vm5, %v2636_v3, 0.0  ;;  %v1517_v17 = vadd.f32 %v1516_v42, %v1515_v58 }
 0x19a   : > { %v1184_v25 = vadd.f32 %v1183_v14, %v971_v40  ;;  %v1211_v14 = vadd.f32 %v2710_v44, %v2634_v59  ;;  %v1528_v44 = vsel %vm665_vm5, %v2697_v23, 0.0 }
 0x19b   : > { %1727 = vst.msk [vmem:[%s2568_s7 + $0x68] sm:$0xff] %vm665_vm5, %v2726_v7  ;;  %v1519_v40 = vadd.f32 %v1518_v60, %v1517_v17  ;;  %v1534_v60 = vsel %vm665_vm5, %v2719_v54, 0.0  ;;  %v1536_v39 = vsel %vm665_vm5, %v2726_v7, 0.0 }
 0x1a0   : > { %v2731_v6 = vpop.f32.mrf.mxu3  ;;  %v1425_v57 = vpop.f32.mrf.mxu2 }
 0x1a1   : > { %v2733_v0 = vadd.f32 %v1425_v57, %v1178_v48  ;;  %v974_v15 = vpop.f32.mrf.mxu0  ;;  %v1192_v29 = vpop.f32.mrf.mxu1  ;;  %v1522_v48 = vsel %vm665_vm5, %v2659_v38, 0.0 }
 0x1a2   : > { %v1187_v4 = vadd.f32 %v1186_v19, %v974_v15  ;;  %v1521_v15 = vadd.f32 %v1520_v53, %v1519_v40  ;;  %v1217_v53 = vadd.f32 %v2724_v5, %v2661_v10 }
 0x1a3   : > { %1728 = vst.msk [vmem:[%s2568_s7 + $0x70] sm:$0xff] %vm665_vm5, %v2733_v0 }
 0x1a8   : > { %v2738_v63 = vpop.f32.mrf.mxu3  ;;  %v1428_v36 = vpop.f32.mrf.mxu2 }
 0x1a9   : > { %v2740_v24 = vadd.f32 %v1428_v36, %v1181_v8  ;;  %v977_v41 = vpop.f32.mrf.mxu0  ;;  %v1195_v57 = vpop.f32.mrf.mxu1 }
 0x1aa   : > { %v1190_v34 = vadd.f32 %v1189_v61, %v977_v41  ;;  %v1523_v61 = vadd.f32 %v1522_v48, %v1521_v15 }
 0x1ab   : > { %1729 = vst.msk [vmem:[%s2568_s7 + $0x78] sm:$0xff] %vm665_vm5, %v2740_v24 }
 0x1b0   : > { %v2745_v26 = vpop.f32.mrf.mxu3  ;;  %v1431_v56 = vpop.f32.mrf.mxu2 }
 0x1b1   : > { %v2747_v43 = vadd.f32 %v1431_v56, %v1184_v25  ;;  %v980_v28 = vpop.f32.mrf.mxu0  ;;  %v1524_v25 = vsel %vm665_vm5, %v2678_v11, 0.0  ;;  %v1198_v58 = vpop.f32.mrf.mxu1 }
 0x1b2   : > { %v1193_v8 = vadd.f32 %v1192_v29, %v980_v28  ;;  %v1525_v59 = vadd.f32 %v1524_v25, %v1523_v61  ;;  %v1530_v28 = vsel %vm665_vm5, %v2705_v32, 0.0 }
 0x1b3   : > { %1730 = vst.msk [vmem:[%s2568_s7 + $0x80] sm:$0xff] %vm665_vm5, %v2747_v43  ;;  %v1542_v61 = vsel %vm665_vm5, %v2747_v43, 0.0 }
 0x1b8   : > { %v2752_v16 = vpop.f32.mrf.mxu3  ;;  %v1434_v33 = vpop.f32.mrf.mxu2 }
 0x1b9   : > { %v2754_v2 = vadd.f32 %v1434_v33, %v1187_v4  ;;  %v983_v62 = vpop.f32.mrf.mxu0  ;;  %v1526_v4 = vsel %vm665_vm5, %v2689_v50, 0.0  ;;  %v1201_v5 = vpop.f32.mrf.mxu1 }
 0x1ba   : > { %v1527_v33 = vadd.f32 %v1526_v4, %v1525_v59  ;;  %v1196_v29 = vadd.f32 %v1195_v57, %v983_v62  ;;  %v1538_v62 = vsel %vm665_vm5, %v2733_v0, 0.0 }
 0x1bb   : > { %1731 = vst.msk [vmem:[%s2568_s7 + $0x88] sm:$0xff] %vm665_vm5, %v2754_v2  ;;  %v1544_v4 = vsel %vm665_vm5, %v2754_v2, 0.0 }
 0x1bc   : > { %v1529_v9 = vadd.f32 %v1528_v44, %v1527_v33  ;;  %v1220_v44 = vadd.f32 %v2731_v6, %v2672_v12 }
 0x1be   : > { %v1531_v42 = vadd.f32 %v1530_v28, %v1529_v9 }
 0x1c0   : > { %v1437_v46 = vpop.f32.mrf.mxu2  ;;  %v1455_v1 = vpop.f32.mrf.mxu3  ;;  %v1533_v52 = vadd.f32 %v1532_v27, %v1531_v42 }
 0x1c1   : > { %v2768_v51 = vadd.f32 %v1437_v46, %v1190_v34  ;;  %v2770_v55 = vadd.f32 %v1455_v1, %v1208_v45  ;;  %v986_v31 = vpop.f32.mrf.mxu0 }
 0x1c2   : > { %v1535_v17 = vadd.f32 %v1534_v60, %v1533_v52  ;;  %v1199_v40 = vadd.f32 %v1198_v58, %v986_v31  ;;  %v1204_v60 = vpop.f32.mrf.mxu1 }
 0x1c3   : > { %1732 = vst.msk [vmem:[%s2568_s7 + $0x90] sm:$0xff] %vm665_vm5, %v2768_v51  ;;  %v1546_v33 = vsel %vm665_vm5, %v2768_v51, 0.0 }
 0x1c4   : > { %1738 = vst.msk [vmem:[%s2568_s7 + $0xc0] sm:$0xff] %vm665_vm5, %v2770_v55  ;;  %v1537_v48 = vadd.f32 %v1536_v39, %v1535_v17  ;;  %v1223_v39 = vadd.f32 %v2738_v63, %v2683_v37  ;;  %v1558_v37 = vsel %vm665_vm5, %v2770_v55, 0.0 }
 0x1c8   : > { %v1440_v36 = vpop.f32.mrf.mxu2  ;;  %v1458_v19 = vpop.f32.mrf.mxu3 }
 0x1c9   : > { %v2788_v56 = vadd.f32 %v1440_v36, %v1193_v8  ;;  %v2790_v41 = vadd.f32 %v1458_v19, %v1211_v14  ;;  %v1540_v8 = vsel %vm665_vm5, %v2740_v24, 0.0  ;;  %v1539_v19 = vadd.f32 %v1538_v62, %v1537_v48  ;;  %v989_v25 = vpop.f32.mrf.mxu0 }
 0x1ca   : > { %v1202_v28 = vadd.f32 %v1201_v5, %v989_v25 }
 0x1cb   : > { %1733 = vst.msk [vmem:[%s2568_s7 + $0x98] sm:$0xff] %vm665_vm5, %v2788_v56  ;;  %v1541_v10 = vadd.f32 %v1540_v8, %v1539_v19  ;;  %v1548_v9 = vsel %vm665_vm5, %v2788_v56, 0.0 }
 0x1cc   : > { %1739 = vst.msk [vmem:[%s2568_s7 + $0xc8] sm:$0xff] %vm665_vm5, %v2790_v41 }
 0x1cd   : > { %v1543_v59 = vadd.f32 %v1542_v61, %v1541_v10  ;;  %v1226_v61 = vadd.f32 %v2745_v26, %v2695_v22  ;;  %v1560_v10 = vsel %vm665_vm5, %v2790_v41, 0.0 }
 0x1d0   : > { %v1443_v45 = vpop.f32.mrf.mxu2  ;;  %v1461_v34 = vpop.f32.mrf.mxu3 }
 0x1d1   : > { %v2808_v46 = vadd.f32 %v1443_v45, %v1196_v29  ;;  %v2810_v1 = vadd.f32 %v1461_v34, %v1214_v49  ;;  %v1545_v49 = vadd.f32 %v1544_v4, %v1543_v59  ;;  %v992_v6 = vpop.f32.mrf.mxu0 }
 0x1d2   : > { %v1205_v17 = vadd.f32 %v1204_v60, %v992_v6 }
 0x1d3   : > { %1734 = vst.msk [vmem:[%s2568_s7 + $0xa0] sm:$0xff] %vm665_vm5, %v2808_v46  ;;  %v1547_v27 = vadd.f32 %v1546_v33, %v1545_v49  ;;  %v1550_v42 = vsel %vm665_vm5, %v2808_v46, 0.0  ;;  %v1562_v59 = vsel %vm665_vm5, %v2810_v1, 0.0 }
 0x1d4   : > { %1740 = vst.msk [vmem:[%s2568_s7 + $0xd0] sm:$0xff] %vm665_vm5, %v2810_v1 }
 0x1d5   : > { %v1549_v12 = vadd.f32 %v1548_v9, %v1547_v27 }
 0x1d7   : > { %v1551_v52 = vadd.f32 %v1550_v42, %v1549_v12 }
 0x1d8   : > { %v1446_v14 = vpop.f32.mrf.mxu2  ;;  %v1464_v57 = vpop.f32.mrf.mxu3 }
 0x1d9   : > { %v2828_v15 = vadd.f32 %v1446_v14, %v1199_v40  ;;  %v2830_v36 = vadd.f32 %v1464_v57, %v1217_v53 }
 0x1db   : > { %1735 = vst.msk [vmem:[%s2568_s7 + $0xa8] sm:$0xff] %vm665_vm5, %v2828_v15  ;;  %v1552_v58 = vsel %vm665_vm5, %v2828_v15, 0.0 }
 0x1dc   : > { %1741 = vst.msk [vmem:[%s2568_s7 + $0xd8] sm:$0xff] %vm665_vm5, %v2830_v36  ;;  %v1553_v62 = vadd.f32 %v1552_v58, %v1551_v52 }
 0x1e0   : > { %v1449_v29 = vpop.f32.mrf.mxu2  ;;  %v1467_v31 = vpop.f32.mrf.mxu3 }
 0x1e1   : > { %v1501_v45 = vadd.f32 %v1449_v29, %v1202_v28  ;;  %v2848_v34 = vadd.f32 %v1467_v31, %v1220_v44  ;;  %v1564_v28 = vsel %vm665_vm5, %v2830_v36, 0.0  ;;  %v1229_v29 = vadd.f32 %v2752_v16, %v2703_v18 }
 0x1e3   : > { %1736 = vst.msk [vmem:[%s2568_s7 + $0xb0] sm:$0xff] %vm665_vm5, %v1501_v45  ;;  %v1554_v53 = vsel %vm665_vm5, %v1501_v45, 0.0  ;;  %v1566_v22 = vsel %vm665_vm5, %v2848_v34, 0.0 }
 0x1e4   : > { %1742 = vst.msk [vmem:[%s2568_s7 + $0xe0] sm:$0xff] %vm665_vm5, %v2848_v34  ;;  %v1555_v8 = vadd.f32 %v1554_v53, %v1553_v62 }
 0x1e8   : > { %v1452_v40 = vpop.f32.mrf.mxu2  ;;  %v1470_v48 = vpop.f32.mrf.mxu3 }
 0x1e9   : > { %v1502_v14 = vadd.f32 %v1452_v40, %v1205_v17  ;;  %v1508_v57 = vadd.f32 %v1470_v48, %v1223_v39 }
 0x1eb   : > { %v1556_v19 = vsel %vm665_vm5, %v1502_v14, 0.0  ;;  %1737 = vst.msk [vmem:[%s2568_s7 + $0xb8] sm:$0xff] %vm665_vm5, %v1502_v14  ;;  %v1568_v31 = vsel %vm665_vm5, %v1508_v57, 0.0 }
 0x1ec   : > { %v1557_v25 = vadd.f32 %v1556_v19, %v1555_v8  ;;  %1743 = vst.msk [vmem:[%s2568_s7 + $0xe8] sm:$0xff] %vm665_vm5, %v1508_v57 }
 0x1ee   : > { %v1559_v63 = vadd.f32 %v1558_v37, %v1557_v25 }
 0x1f0   : > { %v1561_v5 = vadd.f32 %v1560_v10, %v1559_v63  ;;  %v1473_v4 = vpop.f32.mrf.mxu3 }
 0x1f1   : > { %v1509_v44 = vadd.f32 %v1473_v4, %v1226_v61 }
 0x1f2   : > { %v1563_v33 = vadd.f32 %v1562_v59, %v1561_v5 }
 0x1f3   : > { %1744 = vst.msk [vmem:[%s2568_s7 + $0xf0] sm:$0xff] %vm665_vm5, %v1509_v44  ;;  %v1570_v42 = vsel %vm665_vm5, %v1509_v44, 0.0 }
 0x1f4   : > { %v1565_v49 = vadd.f32 %v1564_v28, %v1563_v33 }
 0x1f6   : > { %v1567_v26 = vadd.f32 %v1566_v22, %v1565_v49 }
 0x1f8   : > { %v1569_v9 = vadd.f32 %v1568_v31, %v1567_v26  ;;  %v1476_v27 = vpop.f32.mrf.mxu3 }
 0x1f9   : > { %v1510_v12 = vadd.f32 %v1476_v27, %v1229_v29 }
 0x1fa   : > { %v1571_v6 = vadd.f32 %v1570_v42, %v1569_v9 }
 0x1fb   : > { %v1572_v58 = vsel %vm665_vm5, %v1510_v12, 0.0  ;;  %1745 = vst.msk [vmem:[%s2568_s7 + $0xf8] sm:$0xff] %vm665_vm5, %v1510_v12 }
 0x1fc   : > { %v1573_v60 = vadd.f32 %v1572_v58, %v1571_v6 }
 0x1fe   : > { %v1574_v52 = vrot.slane %v1573_v60, 4 }
 0x200   : > { %v1575_v39 = vadd.f32 %v1574_v52, %v1573_v60 }
 0x202   : > { %v1576_v17 = vrot.slane %v1575_v39, 2 }
 0x204   : > { %v1577_v53 = vadd.f32 %v1576_v17, %v1575_v39 }
 0x206   : > { %v1578_v62 = vrot.slane %v1577_v53, 1 }
 0x208   : > { %v1579_v18 = vadd.f32 %v1578_v62, %v1577_v53 }
 0x20a   : > { %v2894_v16 = vmul.f32 0.00390625, %v1579_v18 }
 0x20c   : > { %1747 = vst.msk [vmem:[%s2892_s11] sm:$0x1] %vm1746_vm6, %v2894_v16  ;;  %v2901_v40 = vsub.f32 %v2808_v46, %v2894_v16  ;;  %v2905_v48 = vsub.f32 %v2828_v15, %v2894_v16  ;;  %v2908_v8 = vsub.f32 %v1501_v45, %v2894_v16  ;;  %v2911_v19 = vsub.f32 %v1502_v14, %v2894_v16 }
 0x20d   : > { %v2915_v25 = vsub.f32 %v2810_v1, %v2894_v16  ;;  %v2919_v37 = vsub.f32 %v2830_v36, %v2894_v16  ;;  %v2923_v46 = vsub.f32 %v2848_v34, %v2894_v16  ;;  %v2926_v15 = vsub.f32 %v1508_v57, %v2894_v16 }
 0x20e   : > { %v2929_v45 = vsub.f32 %v1509_v44, %v2894_v16  ;;  %v2932_v14 = vsub.f32 %v1510_v12, %v2894_v16  ;;  %v1581_v1 = vsub.f32 %v2570_v47, %v2894_v16  ;;  %v1582_v36 = vsub.f32 %v2588_v21, %v2894_v16 }
 0x20f   : > { %v1583_v63 = vsub.f32 %v2604_v35, %v2894_v16  ;;  %v1584_v34 = vsub.f32 %v2617_v13, %v2894_v16  ;;  %v1585_v10 = vsub.f32 %v2636_v3, %v2894_v16  ;;  %v1586_v4 = vsub.f32 %v2646_v20, %v2894_v16 }
 0x210   : > { %v1613_v57 = vmul.f32 %v1581_v1, %v1581_v1  ;;  %v1614_v61 = vmul.f32 %v1582_v36, %v1582_v36  ;;  %v1587_v35 = vsub.f32 %v2659_v38, %v2894_v16  ;;  %v1588_v3 = vsub.f32 %v2678_v11, %v2894_v16 }
 0x211   : > { %v1615_v5 = vmul.f32 %v1583_v63, %v1583_v63  ;;  %v1616_v59 = vmul.f32 %v1584_v34, %v1584_v34  ;;  %v1617_v33 = vmul.f32 %v1585_v10, %v1585_v10  ;;  %v1618_v49 = vmul.f32 %v1586_v4, %v1586_v4 }
 0x212   : > { %v1645_v47 = vsel %vm665_vm5, %v1613_v57, 0.0  ;;  %v1646_v21 = vsel %vm665_vm5, %v1614_v61, 0.0  ;;  %v1589_v26 = vsub.f32 %v2689_v50, %v2894_v16  ;;  %v1619_v29 = vmul.f32 %v1587_v35, %v1587_v35 }
 0x213   : > { %v1647_v44 = vadd.f32 %v1646_v21, %v1645_v47  ;;  %v1648_v13 = vsel %vm665_vm5, %v1615_v5, 0.0  ;;  %v1650_v22 = vsel %vm665_vm5, %v1616_v59, 0.0  ;;  %v1652_v31 = vsel %vm665_vm5, %v1617_v33, 0.0 }
 0x214   : > { %v1590_v38 = vsub.f32 %v2697_v23, %v2894_v16  ;;  %v1620_v27 = vmul.f32 %v1588_v3, %v1588_v3  ;;  %v1654_v42 = vsel %vm665_vm5, %v1618_v49, 0.0  ;;  %v1591_v11 = vsub.f32 %v2705_v32, %v2894_v16 }
 0x215   : > { %v1649_v28 = vadd.f32 %v1648_v13, %v1647_v44  ;;  %v1621_v6 = vmul.f32 %v1589_v26, %v1589_v26  ;;  %v1656_v58 = vsel %vm665_vm5, %v1619_v29, 0.0  ;;  %v1592_v50 = vsub.f32 %v2712_v30, %v2894_v16 }
 0x216   : > { %v1622_v52 = vmul.f32 %v1590_v38, %v1590_v38  ;;  %v1658_v39 = vsel %vm665_vm5, %v1620_v27, 0.0  ;;  %v1593_v23 = vsub.f32 %v2719_v54, %v2894_v16  ;;  %v1623_v53 = vmul.f32 %v1591_v11, %v1591_v11 }
 0x217   : > { %v1651_v20 = vadd.f32 %v1650_v22, %v1649_v28  ;;  %v1660_v62 = vsel %vm665_vm5, %v1621_v6, 0.0  ;;  %v1594_v32 = vsub.f32 %v2726_v7, %v2894_v16  ;;  %v1624_v1 = vmul.f32 %v1592_v50, %v1592_v50 }
 0x218   : > { %v1662_v36 = vsel %vm665_vm5, %v1622_v52, 0.0  ;;  %v1595_v30 = vsub.f32 %v2733_v0, %v2894_v16  ;;  %v1625_v34 = vmul.f32 %v1593_v23, %v1593_v23  ;;  %v1664_v57 = vsel %vm665_vm5, %v1623_v53, 0.0 }
 0x219   : > { %v1653_v9 = vadd.f32 %v1652_v31, %v1651_v20  ;;  %v1596_v54 = vsub.f32 %v2740_v24, %v2894_v16  ;;  %v1626_v10 = vmul.f32 %v1594_v32, %v1594_v32  ;;  %v1666_v5 = vsel %vm665_vm5, %v1624_v1, 0.0 }
 0x21a   : > { %v1597_v7 = vsub.f32 %v2747_v43, %v2894_v16  ;;  %v1627_v59 = vmul.f32 %v1595_v30, %v1595_v30  ;;  %v1668_v47 = vsel %vm665_vm5, %v1625_v34, 0.0  ;;  %v1598_v0 = vsub.f32 %v2754_v2, %v2894_v16 }
 0x21b   : > { %v1655_v12 = vadd.f32 %v1654_v42, %v1653_v9  ;;  %v1628_v44 = vmul.f32 %v1596_v54, %v1596_v54  ;;  %v1670_v35 = vsel %vm665_vm5, %v1626_v10, 0.0  ;;  %v1599_v24 = vsub.f32 %v2768_v51, %v2894_v16 }
 0x21c   : > { %v1629_v13 = vmul.f32 %v1597_v7, %v1597_v7  ;;  %v1672_v28 = vsel %vm665_vm5, %v1627_v59, 0.0  ;;  %v1600_v43 = vsub.f32 %v2788_v56, %v2894_v16  ;;  %v1630_v49 = vmul.f32 %v1598_v0, %v1598_v0 }
 0x21d   : > { %v1657_v60 = vadd.f32 %v1656_v58, %v1655_v12  ;;  %v1674_v22 = vsel %vm665_vm5, %v1628_v44, 0.0  ;;  %v1631_v26 = vmul.f32 %v1599_v24, %v1599_v24  ;;  %v1633_v51 = vmul.f32 %v2901_v40, %v2901_v40 }
 0x21e   : > { %v1676_v2 = vsel %vm665_vm5, %v1629_v13, 0.0  ;;  %v1632_v31 = vmul.f32 %v1600_v43, %v1600_v43  ;;  %v1678_v9 = vsel %vm665_vm5, %v1630_v49, 0.0  ;;  %v1634_v56 = vmul.f32 %v2905_v48, %v2905_v48 }
 0x21f   : > { %v1659_v17 = vadd.f32 %v1658_v39, %v1657_v60  ;;  %v1680_v27 = vsel %vm665_vm5, %v1631_v26, 0.0  ;;  %v1605_v6 = vsub.f32 %v2770_v55, %v2894_v16  ;;  %v1635_v58 = vmul.f32 %v2908_v8, %v2908_v8 }
 0x220   : > { %v1682_v12 = vsel %vm665_vm5, %v1632_v31, 0.0  ;;  %v1684_v60 = vsel %vm665_vm5, %v1633_v51, 0.0  ;;  %v1606_v40 = vsub.f32 %v2790_v41, %v2894_v16  ;;  %v1636_v52 = vmul.f32 %v2911_v19, %v2911_v19 }
 0x221   : > { %v1661_v18 = vadd.f32 %v1660_v62, %v1659_v17  ;;  %v1686_v48 = vsel %vm665_vm5, %v1634_v56, 0.0  ;;  %v1637_v17 = vmul.f32 %v1605_v6, %v1605_v6  ;;  %v1688_v23 = vsel %vm665_vm5, %v1635_v58, 0.0 }
 0x222   : > { %v1638_v55 = vmul.f32 %v1606_v40, %v1606_v40  ;;  %v1690_v62 = vsel %vm665_vm5, %v1636_v52, 0.0  ;;  %v1640_v16 = vmul.f32 %v2919_v37, %v2919_v37  ;;  %v1642_v34 = vmul.f32 %v2926_v15, %v2926_v15 }
 0x223   : > { %v1663_v63 = vadd.f32 %v1662_v36, %v1661_v18  ;;  %v1639_v18 = vmul.f32 %v2915_v25, %v2915_v25  ;;  %v1692_v32 = vsel %vm665_vm5, %v1637_v17, 0.0  ;;  %v1641_v36 = vmul.f32 %v2923_v46, %v2923_v46 }
 0x224   : > { %v1694_v19 = vsel %vm665_vm5, %v1638_v55, 0.0  ;;  %v1698_v25 = vsel %vm665_vm5, %v1640_v16, 0.0  ;;  %v1644_v10 = vmul.f32 %v2932_v14, %v2932_v14  ;;  %v1702_v46 = vsel %vm665_vm5, %v1642_v34, 0.0 }
 0x225   : > { %v1665_v61 = vadd.f32 %v1664_v57, %v1663_v63  ;;  %v1696_v63 = vsel %vm665_vm5, %v1639_v18, 0.0  ;;  %v1700_v37 = vsel %vm665_vm5, %v1641_v36, 0.0 }
 0x226   : > { %v1706_v15 = vsel %vm665_vm5, %v1644_v10, 0.0 }
 0x227   : > { %v1667_v4 = vadd.f32 %v1666_v5, %v1665_v61  ;;  %v1643_v61 = vmul.f32 %v2929_v45, %v2929_v45 }
 0x229   : > { %v1669_v21 = vadd.f32 %v1668_v47, %v1667_v4  ;;  %v1704_v4 = vsel %vm665_vm5, %v1643_v61, 0.0 }
 0x22b   : > { %v1671_v33 = vadd.f32 %v1670_v35, %v1669_v21 }
 0x22d   : > { %v1673_v3 = vadd.f32 %v1672_v28, %v1671_v33 }
 0x22f   : > { %v1675_v20 = vadd.f32 %v1674_v22, %v1673_v3 }
 0x231   : > { %v1677_v29 = vadd.f32 %v1676_v2, %v1675_v20 }
 0x233   : > { %v1679_v38 = vadd.f32 %v1678_v9, %v1677_v29 }
 0x235   : > { %v1681_v42 = vadd.f32 %v1680_v27, %v1679_v38 }
 0x237   : > { %v1683_v11 = vadd.f32 %v1682_v12, %v1681_v42 }
 0x239   : > { %v1685_v50 = vadd.f32 %v1684_v60, %v1683_v11 }
 0x23b   : > { %v1687_v39 = vadd.f32 %v1686_v48, %v1685_v50 }
 0x23d   : > { %v1689_v53 = vadd.f32 %v1688_v23, %v1687_v39 }
 0x23f   : > { %v1691_v8 = vadd.f32 %v1690_v62, %v1689_v53 }
 0x241   : > { %v1693_v41 = vadd.f32 %v1692_v32, %v1691_v8 }
 0x243   : > { %v1695_v1 = vadd.f32 %v1694_v19, %v1693_v41 }
 0x245   : > { %v1697_v30 = vadd.f32 %v1696_v63, %v1695_v1 }
 0x247   : > { %v1699_v57 = vadd.f32 %v1698_v25, %v1697_v30 }
 0x249   : > { %v1701_v54 = vadd.f32 %v1700_v37, %v1699_v57 }
 0x24b   : > { %v1703_v5 = vadd.f32 %v1702_v46, %v1701_v54 }
 0x24d   : > { %v1705_v7 = vadd.f32 %v1704_v4, %v1703_v5 }
 0x24f   : > { %v1707_v59 = vadd.f32 %v1706_v15, %v1705_v7 }
 0x251   : > { %v1708_v47 = vrot.slane %v1707_v59, 4 }
 0x253   : > { %v1709_v21 = vadd.f32 %v1708_v47, %v1707_v59 }
 0x255   : > { %v1710_v0 = vrot.slane %v1709_v21, 2 }
 0x257   : > { %v1711_v45 = vadd.f32 %v1710_v0, %v1709_v21 }
 0x259   : > { %v1712_v44 = vrot.slane %v1711_v45, 1 }
 0x25b   : > { %v1713_v35 = vadd.f32 %v1712_v44, %v1711_v45 }
 0x25d   : > { %1748 = vst.msk [vmem:[%s2892_s11 + $0x1] sm:$0x1] %vm1746_vm6, %v1713_v35 }
 0x25e PF: > { %s14_s12 = sadd.s32 1, %s1975_s12  }
 0x25f   : > { %p11_p4 = scmp.ge.s32.totalorder %s14_s12, 4  }
 0x261   :  { %13 = sbr.rel (!%p11_p4) target bundleno = 1 (0x1), region = 75 }

// kernel: double_conv.4
= control target key start
LH: loop header
LB: loop body
LE: loop exit
PB: predicated region body
PF: predicated region fallthrough
CT: control target
= control target key end

     0   :  { %s2165_s18 = smov 0   ;;  %s3292_s0 = inlined_call_operand.vmem [shape: f32[2,16,16,8], index: 0, kind: input, shape index: {}]   ;;  %s3293_s1 = inlined_call_operand.vmem [shape: f32[1,8], index: 1, kind: input, shape index: {}]   ;;  %s3294_s2 = inlined_call_operand.vmem [shape: f32[1,8], index: 2, kind: input, shape index: {}]   ;;  %s3295_s3 = inlined_call_operand.vmem [shape: f32[3,24,8], index: 3, kind: input, shape index: {}]   ;;  %s3296_s4 = inlined_call_operand.vmem [shape: f32[2,16,16,8], index: 4, kind: output, shape index: {0}]   ;;  %s3297_s5 = inlined_call_operand.vmem [shape: f32[2,2,8], index: 5, kind: output, shape index: {1}]  }
   0x1 LB: > { %s1986_s19 = sadd.s32 4294967295, %s2130_s18   ;;  %p1990_p0 = scmp.ge.s32.totalorder %s2130_s18, 1  ;;  %s2130_s18 = sphi %s2165_s18, %s16_s18  }
   0x2   : > { %p190_p1 = scmp.lt.s32.totalorder %s2130_s18, 3 }
   0x4   : > { %p191_p2 = pnand %p1990_p0, %p190_p1 }
   0x5   : > { %p222_p3 = scmp.lt.s32.totalorder (!%p191_p2), %s1986_s19, 1  ;;  %s2132_s28 = smov (!%p191_p2), 8  }
   0x6   : > { %194 = sbr.rel (%p191_p2) target bundleno = 612 (0x264), region = 36  ;;  %s2133_s29 = smov (!%p191_p2), 16  }
   0xb   : > { %s3299_s19 = smov (!%p222_p3, %s1986_s19), 1  ;;  %v2178_v0 = vld [vmem:[%s3293_s1] ss:$0 sm:$0xff]  ;;  %vm501_vm0 = vcmask 1046528   ;;  %vm404_vm1 = vcmask 1040384   ;;  %vm856_vm2 = vcmask 195584  }
   0xc   : > { %s2100_s22 = sshll.u32 %s3299_s19, 8  ;;  %v2191_v1 = vld [vmem:[%s3294_s2] ss:$0 sm:$0xff]  ;;  %vm790_vm3 = vcmask 64512   ;;  %vm823_vm4 = vcmask 130048   ;;  %vm1897_vm5 = vcmask 57344  }
   0xd   : > { %s2186_s25 = scalar_lea.vmem %s3292_s0, %s2100_s22 }
   0xe   : > { %v240_v2 = vld [vmem:[%s2186_s25 + $0x10] sm:$0xff]  ;;  %v238_v3 = vld [vmem:[%s2186_s25] sm:$0xff]  ;;  %v239_v4 = vld [vmem:[%s2186_s25 + $0x8] sm:$0xff] }
   0xf   : > { %v275_v5 = vmul.f32 %v2178_v0, %v240_v2  ;;  %v273_v6 = vmul.f32 %v2178_v0, %v238_v3  ;;  %v274_v7 = vmul.f32 %v2178_v0, %v239_v4  ;;  %v241_v8 = vld [vmem:[%s2186_s25 + $0x18] sm:$0xff]  ;;  %v242_v9 = vld [vmem:[%s2186_s25 + $0x20] sm:$0xff]  ;;  %v243_v23 = vld [vmem:[%s2186_s25 + $0x28] sm:$0xff] }
  0x10   : > { %v276_v10 = vmul.f32 %v2178_v0, %v241_v8  ;;  %v277_v15 = vmul.f32 %v2178_v0, %v242_v9  ;;  %v262_v26 = vld [vmem:[%s2186_s25 + $0xc0] sm:$0xff]  ;;  %v278_v27 = vmul.f32 %v2178_v0, %v243_v23  ;;  %v263_v28 = vld [vmem:[%s2186_s25 + $0xc8] sm:$0xff]  ;;  %v244_v48 = vld [vmem:[%s2186_s25 + $0x30] sm:$0xff] }
  0x11   : > { %v310_v11 = vadd.f32 %v2191_v1, %v275_v5  ;;  %v308_v12 = vadd.f32 %v2191_v1, %v273_v6  ;;  %v309_v13 = vadd.f32 %v2191_v1, %v274_v7  ;;  %v297_v29 = vmul.f32 %v2178_v0, %v262_v26  ;;  %v245_v49 = vld [vmem:[%s2186_s25 + $0x38] sm:$0xff]  ;;  %v264_v50 = vld [vmem:[%s2186_s25 + $0xd0] sm:$0xff] }
  0x12   : > { %v311_v14 = vadd.f32 %v2191_v1, %v276_v10  ;;  %v312_v22 = vadd.f32 %v2191_v1, %v277_v15  ;;  %v313_v32 = vadd.f32 %v2191_v1, %v278_v27  ;;  %v298_v33 = vmul.f32 %v2178_v0, %v263_v28  ;;  %v265_v51 = vld [vmem:[%s2186_s25 + $0xd8] sm:$0xff]  ;;  %v246_v10 = vld [vmem:[%s2186_s25 + $0x40] sm:$0xff] }
  0x13   : > { %v2207_v16 = vmax.f32 %v310_v11, 0.0  ;;  %v2209_v17 = vmax.f32 %v308_v12, 0.0  ;;  %v2211_v18 = vmax.f32 %v309_v13, 0.0  ;;  %v332_v34 = vadd.f32 %v2191_v1, %v297_v29  ;;  %v247_v11 = vld [vmem:[%s2186_s25 + $0x48] sm:$0xff]  ;;  %v266_v13 = vld [vmem:[%s2186_s25 + $0xe0] sm:$0xff] }
  0x14   : > { %v2213_v19 = vmax.f32 %v311_v14, 0.0  ;;  %v2226_v25 = vmax.f32 %v312_v22, 0.0  ;;  %v2244_v37 = vmax.f32 %v313_v32, 0.0  ;;  %v333_v39 = vadd.f32 %v2191_v1, %v298_v33  ;;  %v267_v14 = vld [vmem:[%s2186_s25 + $0xe8] sm:$0xff] }
  0x15   : > { %586 = vrot.lane.b32.xlu0 %v2207_v16, %s2132_s28  ;;  %582 = vrot.lane.b32.xlu1 %v2209_v17, %s2132_s28  ;;  %v502_v20 = vrot.slane %v2209_v17, 1  ;;  %v503_v21 = vrot.slane %v2211_v18, 1  ;;  %v505_v30 = vrot.slane %v2207_v16, 1  ;;  %v2250_v40 = vmax.f32 %v332_v34, 0.0 }
  0x16   : > { %588 = vrot.lane.b32.xlu2 %v2213_v19, %s2132_s28  ;;  %v506_v31 = vrot.slane %v2213_v19, 1  ;;  %v508_v41 = vrot.slane %v2226_v25, 1  ;;  %v509_v42 = vrot.slane %v2244_v37, 1  ;;  %v2255_v43 = vmax.f32 %v333_v39, 0.0 }
  0x17   : > { %v504_v24 = vsel %vm501_vm0, %v502_v20, %v503_v21  ;;  %v566_v36 = vsel %vm501_vm0, %v503_v21, 0.0  ;;  %v538_v44 = vrot.slane %v2250_v40, 1  ;;  %v279_v52 = vmul.f32 %v2178_v0, %v244_v48 }
  0x18   : > { %v507_v35 = vsel %vm501_vm0, %v505_v30, %v506_v31  ;;  %v567_v38 = vsel %vm501_vm0, %v506_v31, 0.0  ;;  %v539_v45 = vrot.slane %v2255_v43, 1  ;;  %v510_v46 = vsel %vm501_vm0, %v508_v41, %v509_v42 }
  0x19   : > { %v280_v53 = vmul.f32 %v2178_v0, %v245_v49  ;;  %v299_v54 = vmul.f32 %v2178_v0, %v264_v50  ;;  %v300_v55 = vmul.f32 %v2178_v0, %v265_v51  ;;  %v568_v56 = vsel %vm501_vm0, %v509_v42, 0.0  ;;  %v248_v42 = vld [vmem:[%s2186_s25 + $0x50] sm:$0xff]  ;;  %v269_v49 = vld [vmem:[%s2186_s25 + $0xf8] sm:$0xff] }
  0x1a   : > { %v540_v47 = vsel %vm501_vm0, %v538_v44, %v539_v45  ;;  %v314_v57 = vadd.f32 %v2191_v1, %v279_v52  ;;  %v578_v62 = vsel %vm501_vm0, %v539_v45, 0.0  ;;  %v281_v12 = vmul.f32 %v2178_v0, %v246_v10  ;;  %v249_v44 = vld [vmem:[%s2186_s25 + $0x58] sm:$0xff]  ;;  %v2364_v51 = vld [vmem:[%s3295_s3 + $0x10] sm:$0xff]  ;;  %v927_v10 = vld [vmem:[%s3295_s3] sm:$0xff] }
  0x1b   : > { %v315_v58 = vadd.f32 %v2191_v1, %v280_v53  ;;  %v334_v59 = vadd.f32 %v2191_v1, %v299_v54  ;;  %v335_v60 = vadd.f32 %v2191_v1, %v300_v55  ;;  %v282_v15 = vmul.f32 %v2178_v0, %v247_v11  ;;  %1284 = vmatpush.msra.mxu1 %v2364_v51 }
  0x1c   : > { %v2283_v61 = vmax.f32 %v314_v57, 0.0  ;;  %v316_v20 = vadd.f32 %v2191_v1, %v281_v12  ;;  %v301_v21 = vmul.f32 %v2178_v0, %v266_v13  ;;  %v302_v23 = vmul.f32 %v2178_v0, %v267_v14 }
  0x1d   : > { %584 = vrot.lane.b32.xlu0 %v2211_v18, %s2132_s28  ;;  %694 = vrot.lane.b32.xlu1 %v504_v24, %s2133_s29  ;;  %v2286_v63 = vmax.f32 %v315_v58, 0.0  ;;  %v2288_v2 = vmax.f32 %v334_v59, 0.0  ;;  %v2290_v3 = vmax.f32 %v335_v60, 0.0  ;;  %v317_v24 = vadd.f32 %v2191_v1, %v282_v15  ;;  %v250_v15 = vld [vmem:[%s2186_s25 + $0x60] sm:$0xff] }
  0x1e   : > { %590 = vrot.lane.b32.xlu2 %v2226_v25, %s2132_s28  ;;  %v511_v4 = vrot.slane %v2283_v61, 1  ;;  %v2322_v27 = vmax.f32 %v316_v20, 0.0  ;;  %v336_v28 = vadd.f32 %v2191_v1, %v301_v21  ;;  %v337_v29 = vadd.f32 %v2191_v1, %v302_v23  ;;  %v251_v20 = vld [vmem:[%s2186_s25 + $0x68] sm:$0xff]  ;;  %v260_v21 = vld [vmem:[%s2186_s25 + $0xb0] sm:$0xff] }
  0x1f   : > { %v512_v5 = vrot.slane %v2286_v63, 1  ;;  %v541_v6 = vrot.slane %v2288_v2, 1  ;;  %v542_v7 = vrot.slane %v2290_v3, 1  ;;  %v2327_v30 = vmax.f32 %v317_v24, 0.0 }
  0x20   : > { %v514_v31 = vrot.slane %v2322_v27, 1  ;;  %v2330_v32 = vmax.f32 %v336_v28, 0.0  ;;  %v2333_v34 = vmax.f32 %v337_v29, 0.0  ;;  %v283_v48 = vmul.f32 %v2178_v0, %v248_v42  ;;  %v1998_v29 = vld [vmem:[%s3295_s3 + $0x28] sm:$0xff] }
  0x21   : > { %v513_v8 = vsel %vm501_vm0, %v511_v4, %v512_v5  ;;  %v543_v9 = vsel %vm501_vm0, %v541_v6, %v542_v7  ;;  %v569_v22 = vsel %vm501_vm0, %v512_v5, 0.0  ;;  %v579_v26 = vsel %vm501_vm0, %v542_v7, 0.0  ;;  %v928_v5 = vld [vmem:[%s3295_s3 + $0x8] sm:$0xff]  ;;  %1075 = vmatpush.msra.mxu0 %v1998_v29  ;;  %2102 = vmatpush.msra.mxu3 %v1998_v29 }
  0x22   : > { %v515_v33 = vrot.slane %v2327_v30, 1  ;;  %v544_v39 = vrot.slane %v2330_v32, 1  ;;  %v545_v41 = vrot.slane %v2333_v34, 1  ;;  %v318_v52 = vadd.f32 %v2191_v1, %v283_v48  ;;  %1285 = vmatpush.msra.mxu1 %v928_v5  ;;  %v255_v29 = vld [vmem:[%s2186_s25 + $0x88] sm:$0xff] }
  0x23   : > { %v304_v54 = vmul.f32 %v2178_v0, %v269_v49  ;;  %v2134_v60 = vmov 0.0   ;;  %v286_v28 = vmul.f32 %v2178_v0, %v251_v20 }
  0x24   : > { %v580_v57 = vsel %vm501_vm0, %v545_v41, 0.0  ;;  %v2375_v58 = vmax.f32 %v318_v52, 0.0  ;;  %857 = vst.msk [vmem:[#allocation2] sm:$0xff] %vm856_vm2, %v2134_v60  ;;  %1286 = vmatpush.msra.mxu1 %v927_v10 }
  0x25   : > { %698 = vrot.lane.b32.xlu0 %v507_v35, %s2133_s29  ;;  %696 = vrot.lane.b32.xlu1 %v566_v36, %s2133_s29  ;;  %v516_v35 = vsel %vm501_vm0, %v514_v31, %v515_v33  ;;  %v408_v36 = vrot.slane %v2207_v16, 7  ;;  %858 = vst.msk [vmem:[#allocation2 + $0x8] sm:$0xff] %vm856_vm2, %v2134_v60  ;;  %v295_v31 = vmul.f32 %v2178_v0, %v260_v21  ;;  %v405_v21 = vrot.slane %v2209_v17, 7 }
  0x26   : > { %700 = vrot.lane.b32.xlu2 %v567_v38, %s2133_s29  ;;  %v409_v38 = vrot.slane %v2213_v19, 7  ;;  %v284_v19 = vmul.f32 %v2178_v0, %v249_v44  ;;  %860 = vst.msk [vmem:[#allocation2 + $0x110] sm:$0xff] %vm856_vm2, %v2134_v60  ;;  %v517_v6 = vrot.slane %v2375_v58, 1 }
  0x27   : > { %861 = vst.msk [vmem:[#allocation2 + $0x118] sm:$0xff] %vm856_vm2, %v2134_v60  ;;  %v330_v42 = vadd.f32 %v2191_v1, %v295_v31  ;;  %v485_v31 = vsel %vm404_vm1, 0.0, %v405_v21 }
  0x28   : > { %v2350_v45 = vsel %vm404_vm1, %v408_v36, %v409_v38  ;;  %v319_v53 = vadd.f32 %v2191_v1, %v284_v19 }
  0x2a   : > { %v2377_v59 = vmax.f32 %v319_v53, 0.0  ;;  %v2451_v53 = vld [vmem:[%s3295_s3 + $0x40] sm:$0xff] }
  0x2b   : > { %v895_v12 = vld [vmem:[#allocation2] sm:$0xff]  ;;  %1530 = vmatpush.msra.mxu2 %v2451_v53 }
  0x2c   : > { %v518_v7 = vrot.slane %v2377_v59, 1  ;;  %2031 = vmatmul.msk.f32.vlgmr.msra.gmra.mxu1 %vm856_vm2, %v895_v12  ;;  %v896_v24 = vld [vmem:[#allocation2 + $0x8] sm:$0xff] }
  0x2d   : > { %630 = vrot.lane.b32.xlu0 %v2250_v40, %s2132_s28  ;;  %702 = vrot.lane.b32.xlu1 %v510_v46, %s2133_s29  ;;  %v546_v46 = vsel %vm501_vm0, %v544_v39, %v545_v41  ;;  %v321_v39 = vadd.f32 %v2191_v1, %v286_v28  ;;  %v1997_v41 = vld [vmem:[%s3295_s3 + $0x20] sm:$0xff] }
  0x2e   : > { %742 = vrot.lane.b32.xlu2 %v540_v47, %s2133_s29  ;;  %v268_v47 = vld [vmem:[%s2186_s25 + $0xf0] sm:$0xff]  ;;  %v519_v13 = vsel %vm501_vm0, %v517_v6, %v518_v7  ;;  %1076 = vmatpush.msra.mxu0 %v1997_v41 }
  0x2f   : > { %v303_v50 = vmul.f32 %v2178_v0, %v268_v47  ;;  %2103 = vmatpush.msra.mxu3 %v1997_v41  ;;  %v1996_v47 = vld [vmem:[%s3295_s3 + $0x18] sm:$0xff]  ;;  %v2441_v19 = vmax.f32 %v321_v39, 0.0 }
  0x30   : > { %1077 = vmatpush.msra.mxu0 %v1996_v47 }
  0x31   : > { %v338_v55 = vadd.f32 %v2191_v1, %v303_v50  ;;  %2104 = vmatpush.msra.mxu3 %v1996_v47  ;;  %v2444_v50 = vmax.f32 %v330_v42, 0.0 }
  0x33   : > { %v2385_v4 = vmax.f32 %v338_v55, 0.0  ;;  %2105 = vmatpush.msrb.mxu3 %v2364_v51 }
  0x34   : > { %2032 = vmatmul.msk.f32.gmra.mxu1 %vm856_vm2, %v896_v24 }
  0x35   : > { %592 = vrot.lane.b32.xlu0 %v2244_v37, %s2132_s28  ;;  %632 = vrot.lane.b32.xlu1 %v2255_v43, %s2132_s28 }
  0x36   : > { %704 = vrot.lane.b32.xlu2 %v568_v56, %s2133_s29  ;;  %v570_v56 = vsel %vm501_vm0, %v515_v33, 0.0  ;;  %2106 = vmatpush.msrb.mxu3 %v928_v5  ;;  %v253_v5 = vld [vmem:[%s2186_s25 + $0x78] sm:$0xff] }
  0x38   : > { %2107 = vmatpush.msrb.mxu3 %v927_v10  ;;  %v288_v10 = vmul.f32 %v2178_v0, %v253_v5 }
  0x3d   : > { %744 = vrot.lane.b32.xlu0 %v578_v62, %s2133_s29  ;;  %594 = vrot.lane.b32.xlu1 %v2283_v61, %s2132_s28  ;;  %v339_v62 = vadd.f32 %v2191_v1, %v304_v54  ;;  %v2458_v54 = vld [vmem:[%s3295_s3 + $0x38] sm:$0xff] }
  0x3e   : > { %634 = vrot.lane.b32.xlu2 %v2288_v2, %s2132_s28  ;;  %1531 = vmatpush.msra.mxu2 %v2458_v54 }
  0x45   : > { %706 = vrot.lane.b32.xlu0 %v513_v8, %s2133_s29  ;;  %746 = vrot.lane.b32.xlu1 %v543_v9, %s2133_s29  ;;  %v2395_v8 = vmax.f32 %v339_v62, 0.0  ;;  %v547_v9 = vrot.slane %v2385_v4, 1  ;;  %v252_v62 = vld [vmem:[%s2186_s25 + $0x70] sm:$0xff] }
  0x46   : > { %596 = vrot.lane.b32.xlu2 %v2286_v63, %s2132_s28  ;;  %v287_v12 = vmul.f32 %v2178_v0, %v252_v62 }
  0x47   : > { %v548_v11 = vrot.slane %v2395_v8, 1 }
  0x49   : > { %v549_v14 = vsel %vm501_vm0, %v547_v9, %v548_v11  ;;  %v581_v49 = vsel %vm501_vm0, %v548_v11, 0.0 }
  0x4d   : > { %636 = vrot.lane.b32.xlu0 %v2290_v3, %s2132_s28  ;;  %708 = vrot.lane.b32.xlu1 %v569_v22, %s2133_s29  ;;  %v261_v22 = vld [vmem:[%s2186_s25 + $0xb8] sm:$0xff] }
  0x4e   : > { %748 = vrot.lane.b32.xlu2 %v579_v26, %s2133_s29  ;;  %v285_v26 = vmul.f32 %v2178_v0, %v250_v15  ;;  %v296_v33 = vmul.f32 %v2178_v0, %v261_v22 }
  0x50   : > { %v320_v38 = vadd.f32 %v2191_v1, %v285_v26  ;;  %v331_v44 = vadd.f32 %v2191_v1, %v296_v33  ;;  %v254_v33 = vld [vmem:[%s2186_s25 + $0x80] sm:$0xff] }
  0x52   : > { %v2439_v48 = vmax.f32 %v320_v38, 0.0  ;;  %v2446_v52 = vmax.f32 %v331_v44, 0.0  ;;  %v290_v38 = vmul.f32 %v2178_v0, %v255_v29  ;;  %v406_v44 = vrot.slane %v2211_v18, 7 }
  0x54   : > { %v520_v55 = vrot.slane %v2439_v48, 1  ;;  %v536_v60 = vrot.slane %v2446_v52, 1  ;;  %v407_v18 = vsel %vm404_vm1, %v405_v21, %v406_v44  ;;  %v441_v21 = vrot.slane %v2250_v40, 7  ;;  %v259_v44 = vld [vmem:[%s2186_s25 + $0xa8] sm:$0xff] }
  0x55   : > { %598 = vrot.lane.b32.xlu0 %v2322_v27, %s2132_s28  ;;  %638 = vrot.lane.b32.xlu1 %v2330_v32, %s2132_s28 }
  0x56   : > { %710 = vrot.lane.b32.xlu2 %v516_v35, %s2133_s29  ;;  %v571_v35 = vsel %vm501_vm0, %v518_v7, 0.0  ;;  %v2477_v7 = vld [vmem:[%s3295_s3 + $0x30] sm:$0xff]  ;;  %v577_v28 = vsel %vm501_vm0, %v536_v60, 0.0  ;;  %v497_v40 = vsel %vm404_vm1, 0.0, %v441_v21 }
  0x57   : > { %1532 = vmatpush.msra.mxu2 %v2477_v7 }
  0x5d   : > { %750 = vrot.lane.b32.xlu0 %v546_v46, %s2133_s29  ;;  %600 = vrot.lane.b32.xlu1 %v2327_v30, %s2132_s28 }
  0x5e   : > { %640 = vrot.lane.b32.xlu2 %v2333_v34, %s2132_s28 }
  0x65   : > { %712 = vrot.lane.b32.xlu0 %v570_v56, %s2133_s29  ;;  %752 = vrot.lane.b32.xlu1 %v580_v57, %s2133_s29  ;;  %v521_v56 = vrot.slane %v2441_v19, 1  ;;  %v535_v57 = vrot.slane %v2444_v50, 1 }
  0x66   : > { %602 = vrot.lane.b32.xlu2 %v2375_v58, %s2132_s28 }
  0x67   : > { %v522_v9 = vsel %vm501_vm0, %v520_v55, %v521_v56  ;;  %v537_v11 = vsel %vm501_vm0, %v535_v57, %v536_v60  ;;  %v486_v57 = vsel %vm404_vm1, 0.0, %v408_v36 }
  0x6d   : > { %642 = vrot.lane.b32.xlu0 %v2385_v4, %s2132_s28  ;;  %714 = vrot.lane.b32.xlu1 %v519_v13, %s2133_s29  ;;  %v322_v13 = vadd.f32 %v2191_v1, %v287_v12 }
  0x6e   : > { %754 = vrot.lane.b32.xlu2 %v549_v14, %s2133_s29  ;;  %v323_v14 = vadd.f32 %v2191_v1, %v288_v10 }
  0x6f   : > { %v2496_v24 = vmax.f32 %v322_v13, 0.0 }
  0x70   : > { %v589_v23 = vpop.permute.xlu2 %588  ;;  %v2498_v26 = vmax.f32 %v323_v14, 0.0 }
  0x71   : > { %v794_v51 = vsel %vm790_vm3, %v2350_v45, %v589_v23  ;;  %v572_v23 = vsel %vm501_vm0, %v521_v56, 0.0  ;;  %v523_v17 = vrot.slane %v2496_v24, 1 }
  0x75   : > { %604 = vrot.lane.b32.xlu0 %v2377_v59, %s2132_s28  ;;  %644 = vrot.lane.b32.xlu1 %v2395_v8, %s2132_s28 }
  0x76   : > { %716 = vrot.lane.b32.xlu2 %v571_v35, %s2133_s29  ;;  %v524_v35 = vrot.slane %v2498_v26, 1 }
  0x78   : > { %v2434_v46 = vpop.permute.xlu2 %590  ;;  %v525_v56 = vsel %vm501_vm0, %v523_v17, %v524_v35 }
  0x7d   : > { %756 = vrot.lane.b32.xlu0 %v581_v49, %s2133_s29  ;;  %606 = vrot.lane.b32.xlu1 %v2439_v48, %s2132_s28  ;;  %v289_v49 = vmul.f32 %v2178_v0, %v254_v33 }
  0x7e   : > { %626 = vrot.lane.b32.xlu2 %v2444_v50, %s2132_s28 }
  0x7f   : > { %v324_v60 = vadd.f32 %v2191_v1, %v289_v49 }
  0x80   : > { %v701_v6 = vpop.permute.xlu2 %700 }
  0x81   : > { %v827_v45 = vsel %vm823_vm4, %v794_v51, %v701_v6  ;;  %v325_v51 = vadd.f32 %v2191_v1, %v290_v38  ;;  %v2539_v14 = vmax.f32 %v324_v60, 0.0 }
  0x82   : > { %866 = vst.msk [vmem:[#allocation2 + $0x28] sm:$0xff] %vm856_vm2, %v827_v45  ;;  %v256_v45 = vld [vmem:[%s2186_s25 + $0x90] sm:$0xff] }
  0x83   : > { %v2528_v62 = vmax.f32 %v325_v51, 0.0  ;;  %v526_v29 = vrot.slane %v2539_v14, 1 }
  0x85   : > { %718 = vrot.lane.b32.xlu0 %v522_v9, %s2133_s29  ;;  %738 = vrot.lane.b32.xlu1 %v537_v11, %s2133_s29  ;;  %v257_v9 = vld [vmem:[%s2186_s25 + $0x98] sm:$0xff]  ;;  %v411_v11 = vrot.slane %v2226_v25, 7  ;;  %v527_v25 = vrot.slane %v2528_v62, 1 }
  0x86   : > { %608 = vrot.lane.b32.xlu2 %v2441_v19, %s2132_s28 }
  0x87   : > { %v587_v15 = vpop.permute.xlu0 %586  ;;  %v583_v20 = vpop.permute.xlu1 %582  ;;  %v528_v33 = vsel %vm501_vm0, %v526_v29, %v527_v25  ;;  %v574_v60 = vsel %vm501_vm0, %v527_v25, 0.0 }
  0x88   : > { %v2493_v22 = vpop.permute.xlu2 %742  ;;  %v791_v39 = vsel %vm790_vm3, %v485_v31, %v583_v20  ;;  %v793_v5 = vsel %vm790_vm3, %v486_v57, %v587_v15  ;;  %v573_v15 = vsel %vm501_vm0, %v524_v35, 0.0  ;;  %v487_v31 = vsel %vm404_vm1, 0.0, %v411_v11 }
  0x89   : > { %v795_v38 = vsel %vm790_vm3, %v487_v31, %v2434_v46  ;;  %v412_v46 = vrot.slane %v2244_v37, 7 }
  0x8d   : > { %628 = vrot.lane.b32.xlu0 %v2446_v52, %s2132_s28  ;;  %720 = vrot.lane.b32.xlu1 %v572_v23, %s2133_s29  ;;  %v291_v23 = vmul.f32 %v2178_v0, %v256_v45 }
  0x8e   : > { %740 = vrot.lane.b32.xlu2 %v577_v28, %s2133_s29  ;;  %v292_v28 = vmul.f32 %v2178_v0, %v257_v9 }
  0x8f   : > { %v585_v41 = vpop.permute.xlu0 %584  ;;  %v695_v42 = vpop.permute.xlu1 %694  ;;  %v326_v17 = vadd.f32 %v2191_v1, %v291_v23 }
  0x90   : > { %v824_v47 = vsel %vm823_vm4, %v791_v39, %v695_v42  ;;  %v2515_v55 = vpop.permute.xlu2 %704  ;;  %v792_v16 = vsel %vm790_vm3, %v407_v18, %v585_v41  ;;  %v327_v35 = vadd.f32 %v2191_v1, %v292_v28  ;;  %v258_v42 = vld [vmem:[%s2186_s25 + $0xa0] sm:$0xff] }
  0x91   : > { %863 = vst.msk [vmem:[#allocation2 + $0x10] sm:$0xff] %vm856_vm2, %v824_v47 }
  0x95   : > { %610 = vrot.lane.b32.xlu0 %v2496_v24, %s2132_s28  ;;  %722 = vrot.lane.b32.xlu1 %v525_v56, %s2133_s29 }
  0x96   : > { %612 = vrot.lane.b32.xlu2 %v2498_v26, %s2132_s28 }
  0x97   : > { %v699_v6 = vpop.permute.xlu0 %698  ;;  %v697_v36 = vpop.permute.xlu1 %696 }
  0x98   : > { %v826_v12 = vsel %vm823_vm4, %v793_v5, %v699_v6  ;;  %v825_v10 = vsel %vm823_vm4, %v792_v16, %v697_v36  ;;  %v930_v13 = vld [vmem:[#allocation2 + $0x10] sm:$0xff]  ;;  %v2541_v20 = vpop.permute.xlu2 %634  ;;  %v2579_v5 = vmax.f32 %v326_v17, 0.0  ;;  %v2581_v16 = vmax.f32 %v327_v35, 0.0 }
  0x99   : > { %865 = vst.msk [vmem:[#allocation2 + $0x20] sm:$0xff] %vm856_vm2, %v826_v12  ;;  %1999 = vmatmul.msk.f32.vlgmr.msra.gmra.mxu0 %vm856_vm2, %v930_v13  ;;  %2033 = vmatmul.msk.f32.gmra.mxu1 %vm856_vm2, %v930_v13  ;;  %v293_v6 = vmul.f32 %v2178_v0, %v258_v42  ;;  %v413_v36 = vsel %vm404_vm1, %v411_v11, %v412_v46  ;;  %v442_v13 = vrot.slane %v2255_v43, 7 }
  0x9a   : > { %864 = vst.msk [vmem:[#allocation2 + $0x18] sm:$0xff] %vm856_vm2, %v825_v10  ;;  %v529_v37 = vrot.slane %v2579_v5, 1  ;;  %v530_v45 = vrot.slane %v2581_v16, 1 }
  0x9b   : > { %v328_v9 = vadd.f32 %v2191_v1, %v293_v6 }
  0x9d   : > { %724 = vrot.lane.b32.xlu0 %v573_v15, %s2133_s29  ;;  %614 = vrot.lane.b32.xlu1 %v2539_v14, %s2132_s28  ;;  %v1386_v15 = vld [vmem:[#allocation2 + $0x28] sm:$0xff]  ;;  %v2606_v29 = vmax.f32 %v328_v9, 0.0 }
  0x9e   : > { %726 = vrot.lane.b32.xlu2 %v528_v33, %s2133_s29 }
  0x9f   : > { %v631_v39 = vpop.permute.xlu0 %630  ;;  %v703_v41 = vpop.permute.xlu1 %702  ;;  %v532_v31 = vrot.slane %v2606_v29, 1 }
  0xa0   : > { %v815_v47 = vsel %vm790_vm3, %v497_v40, %v631_v39  ;;  %v828_v49 = vsel %vm823_vm4, %v795_v38, %v703_v41  ;;  %v1385_v56 = vld [vmem:[#allocation2 + $0x20] sm:$0xff]  ;;  %v2568_v51 = vpop.permute.xlu2 %596  ;;  %v575_v41 = vsel %vm501_vm0, %v530_v45, 0.0 }
  0xa1   : > { %867 = vst.msk [vmem:[#allocation2 + $0x30] sm:$0xff] %vm856_vm2, %v828_v49  ;;  %v848_v57 = vsel %vm823_vm4, %v815_v47, %v2493_v22  ;;  %v931_v18 = vld [vmem:[#allocation2 + $0x18] sm:$0xff]  ;;  %2066 = vmatmul.msk.f32.vlgmr.msra.gmra.mxu2 %vm856_vm2, %v1385_v56  ;;  %v294_v22 = vmul.f32 %v2178_v0, %v259_v44 }
  0xa2   : > { %887 = vst.msk [vmem:[#allocation2 + $0xd0] sm:$0xff] %vm856_vm2, %v848_v57  ;;  %2000 = vmatmul.msk.f32.gmra.mxu0 %vm856_vm2, %v931_v18  ;;  %2034 = vmatmul.msk.f32.gmra.mxu1 %vm856_vm2, %v931_v18  ;;  %v415_v18 = vrot.slane %v2286_v63, 7 }
  0xa3   : > { %v329_v12 = vadd.f32 %v2191_v1, %v294_v22  ;;  %v531_v1 = vsel %vm501_vm0, %v529_v37, %v530_v45 }
  0xa5   : > { %616 = vrot.lane.b32.xlu0 %v2528_v62, %s2132_s28  ;;  %728 = vrot.lane.b32.xlu1 %v574_v60, %s2133_s29  ;;  %v2608_v43 = vmax.f32 %v329_v12, 0.0 }
  0xa6   : > { %618 = vrot.lane.b32.xlu2 %v2579_v5, %s2132_s28 }
  0xa7   : > { %v593_v10 = vpop.permute.xlu0 %592  ;;  %v633_v0 = vpop.permute.xlu1 %632  ;;  %v533_v33 = vrot.slane %v2608_v43, 1 }
  0xa8   : > { %v796_v11 = vsel %vm790_vm3, %v413_v36, %v593_v10  ;;  %v749_v28 = vpop.permute.xlu2 %748  ;;  %v1387_v39 = vld [vmem:[#allocation2 + $0x30] sm:$0xff] }
  0xa9   : > { %v829_v25 = vsel %vm823_vm4, %v796_v11, %v2515_v55  ;;  %2067 = vmatmul.msk.f32.gmra.mxu2 %vm856_vm2, %v1386_v15  ;;  %v2600_v23 = vld [vmem:[#allocation2 + $0xd0] sm:$0xff]  ;;  %v443_v55 = vsel %vm404_vm1, %v441_v21, %v442_v13  ;;  %v414_v21 = vrot.slane %v2283_v61, 7  ;;  %v576_v63 = vsel %vm501_vm0, %v533_v33, 0.0 }
  0xaa   : > { %868 = vst.msk [vmem:[#allocation2 + $0x38] sm:$0xff] %vm856_vm2, %v829_v25  ;;  %2001 = vmatmul.msk.f32.gmra.mxu0 %vm856_vm2, %v1385_v56  ;;  %2035 = vmatmul.msk.f32.gmra.mxu1 %vm856_vm2, %v1385_v56  ;;  %v816_v40 = vsel %vm790_vm3, %v443_v55, %v633_v0  ;;  %v417_v13 = vrot.slane %v2322_v27, 7 }
  0xab   : > { %2023 = vmatmul.msk.f32.vlgmr.msra.gmra.mxu3 %vm856_vm2, %v2600_v23  ;;  %v488_v42 = vsel %vm404_vm1, 0.0, %v414_v21  ;;  %v416_v6 = vsel %vm404_vm1, %v414_v21, %v415_v18  ;;  %v418_v21 = vrot.slane %v2327_v30, 7 }
  0xac   : > { %2108 = vmatpush.msra.mxu3 %v2451_v53  ;;  %v444_v53 = vrot.slane %v2288_v2, 7 }
  0xad   : > { %730 = vrot.lane.b32.xlu0 %v531_v1, %s2133_s29  ;;  %620 = vrot.lane.b32.xlu1 %v2581_v16, %s2132_s28 }
  0xae   : > { %2109 = vmatpush.msra.mxu3 %v2458_v54  ;;  %v534_v54 = vsel %vm501_vm0, %v532_v31, %v533_v33  ;;  %v498_v61 = vsel %vm404_vm1, 0.0, %v444_v53  ;;  %732 = vrot.lane.b32.xlu2 %v575_v41, %s2133_s29  ;;  %v419_v41 = vsel %vm404_vm1, %v417_v13, %v418_v21 }
  0xaf   : > { %v745_v17 = vpop.permute.xlu0 %744  ;;  %v595_v35 = vpop.permute.xlu1 %594  ;;  %v817_v44 = vsel %vm790_vm3, %v498_v61, %v2541_v20  ;;  %v445_v20 = vrot.slane %v2290_v3, 7  ;;  %v798_v3 = vsel %vm790_vm3, %v416_v6, %v2568_v51  ;;  %v489_v51 = vsel %vm404_vm1, 0.0, %v417_v13 }
  0xb0   : > { %v849_v38 = vsel %vm823_vm4, %v816_v40, %v745_v17  ;;  %2110 = vmatpush.msra.mxu3 %v2477_v7  ;;  %v711_v2 = vpop.permute.xlu2 %710  ;;  %v797_v7 = vsel %vm790_vm3, %v488_v42, %v595_v35  ;;  %v451_v13 = vrot.slane %v2395_v8, 7 }
  0xb1   : > { %888 = vst.msk [vmem:[#allocation2 + $0xd8] sm:$0xff] %vm856_vm2, %v849_v38  ;;  %2068 = vmatmul.msk.f32.gmra.mxu2 %vm856_vm2, %v1387_v39  ;;  %v1388_v60 = vld [vmem:[#allocation2 + $0x38] sm:$0xff]  ;;  %v446_v22 = vsel %vm404_vm1, %v444_v53, %v445_v20  ;;  %v448_v53 = vrot.slane %v2333_v34, 7 }
  0xb2   : > { %2002 = vmatmul.msk.f32.gmra.mxu0 %vm856_vm2, %v1386_v15  ;;  %2036 = vmatmul.msk.f32.gmra.mxu1 %vm856_vm2, %v1386_v15 }
  0xb5   : > { %622 = vrot.lane.b32.xlu0 %v2606_v29, %s2132_s28  ;;  %734 = vrot.lane.b32.xlu1 %v534_v54, %s2133_s29 }
  0xb6   : > { %624 = vrot.lane.b32.xlu2 %v2608_v43, %s2132_s28  ;;  %s2838_s28 = scalar_lea.vmem %s3296_s4, %s2100_s22  ;;  %s1995_s22 = sshll.u32 %s3299_s19, 1 }
  0xb7   : > { %v707_v47 = vpop.permute.xlu0 %706  ;;  %v747_v49 = vpop.permute.xlu1 %746  ;;  %s3149_s6 = scalar_lea.vmem %s3297_s5, %s1995_s22 }
  0xb8   : > { %v830_v56 = vsel %vm823_vm4, %v797_v7, %v707_v47  ;;  %v850_v57 = vsel %vm823_vm4, %v817_v44, %v747_v49  ;;  %v2643_v46 = vld [vmem:[#allocation2 + $0xd8] sm:$0xff]  ;;  %v641_v36 = vpop.permute.xlu2 %640  ;;  %v420_v47 = vrot.slane %v2375_v58, 7 }
  0xb9   : > { %869 = vst.msk [vmem:[#allocation2 + $0x40] sm:$0xff] %vm856_vm2, %v830_v56  ;;  %2024 = vmatmul.msk.f32.gmra.mxu3 %vm856_vm2, %v2643_v46  ;;  %2069 = vmatmul.msk.f32.gmra.mxu2 %vm856_vm2, %v1388_v60  ;;  %v450_v56 = vrot.slane %v2385_v4, 7 }
  0xba   : > { %889 = vst.msk [vmem:[#allocation2 + $0xe0] sm:$0xff] %vm856_vm2, %v850_v57  ;;  %2003 = vmatmul.msk.f32.gmra.mxu0 %vm856_vm2, %v1387_v39  ;;  %2037 = vmatmul.msk.f32.gmra.mxu1 %vm856_vm2, %v1387_v39  ;;  %v490_v57 = vsel %vm404_vm1, 0.0, %v420_v47 }
  0xbb   : > { %v500_v58 = vsel %vm404_vm1, 0.0, %v450_v56 }
  0xbd   : > { %736 = vrot.lane.b32.xlu0 %v576_v63, %s2133_s29 }
  0xbf   : > { %v637_v37 = vpop.permute.xlu0 %636  ;;  %v709_v45 = vpop.permute.xlu1 %708 }
  0xc0   : > { %v818_v9 = vsel %vm790_vm3, %v446_v22, %v637_v37  ;;  %v831_v12 = vsel %vm823_vm4, %v798_v3, %v709_v45  ;;  %v1389_v10 = vld [vmem:[#allocation2 + $0x40] sm:$0xff]  ;;  %v603_v31 = vpop.permute.xlu2 %602  ;;  %v421_v37 = vrot.slane %v2377_v59, 7 }
  0xc1   : > { %870 = vst.msk [vmem:[#allocation2 + $0x48] sm:$0xff] %vm856_vm2, %v831_v12  ;;  %v851_v0 = vsel %vm823_vm4, %v818_v9, %v749_v28  ;;  %v2665_v11 = vld [vmem:[#allocation2 + $0xe0] sm:$0xff]  ;;  %2070 = vmatmul.msk.f32.gmra.mxu2 %vm856_vm2, %v1389_v10  ;;  %v447_v28 = vrot.slane %v2330_v32, 7 }
  0xc2   : > { %890 = vst.msk [vmem:[#allocation2 + $0xe8] sm:$0xff] %vm856_vm2, %v851_v0  ;;  %2004 = vmatmul.msk.f32.gmra.mxu0 %vm856_vm2, %v1388_v60  ;;  %2025 = vmatmul.msk.f32.gmra.mxu3 %vm856_vm2, %v2665_v11  ;;  %v422_v45 = vsel %vm404_vm1, %v420_v47, %v421_v37 }
  0xc3   : > { %2038 = vmatmul.msk.f32.gmra.mxu1 %vm856_vm2, %v1388_v60  ;;  %v499_v40 = vsel %vm404_vm1, 0.0, %v447_v28  ;;  %v449_v42 = vsel %vm404_vm1, %v447_v28, %v448_v53  ;;  %v801_v60 = vsel %vm790_vm3, %v490_v57, %v603_v31  ;;  %v423_v31 = vrot.slane %v2439_v48, 7 }
  0xc4   : > { %v820_v30 = vsel %vm790_vm3, %v449_v42, %v641_v36  ;;  %v439_v42 = vrot.slane %v2446_v52, 7 }
  0xc7   : > { %v599_v15 = vpop.permute.xlu0 %598  ;;  %v639_v25 = vpop.permute.xlu1 %638 }
  0xc8   : > { %v799_v1 = vsel %vm790_vm3, %v489_v51, %v599_v15  ;;  %v1390_v55 = vld [vmem:[#allocation2 + $0x48] sm:$0xff]  ;;  %v819_v32 = vsel %vm790_vm3, %v499_v40, %v639_v25  ;;  %v755_v54 = vpop.permute.xlu2 %754  ;;  %v452_v25 = vsel %vm404_vm1, %v450_v56, %v451_v13 }
  0xc9   : > { %v832_v27 = vsel %vm823_vm4, %v799_v1, %v711_v2  ;;  %2071 = vmatmul.msk.f32.gmra.mxu2 %vm856_vm2, %v1390_v55  ;;  %v2679_v33 = vld [vmem:[#allocation2 + $0xe8] sm:$0xff] }
  0xca   : > { %871 = vst.msk [vmem:[#allocation2 + $0x50] sm:$0xff] %vm856_vm2, %v832_v27  ;;  %2005 = vmatmul.msk.f32.gmra.mxu0 %vm856_vm2, %v1389_v10  ;;  %2026 = vmatmul.msk.f32.gmra.mxu3 %vm856_vm2, %v2679_v33  ;;  %v438_v27 = vrot.slane %v2444_v50, 7 }
  0xcb   : > { %2039 = vmatmul.msk.f32.gmra.mxu1 %vm856_vm2, %v1389_v10 }
  0xcf   : > { %v751_v17 = vpop.permute.xlu0 %750  ;;  %v601_v35 = vpop.permute.xlu1 %600 }
  0xd0   : > { %v852_v38 = vsel %vm823_vm4, %v819_v32, %v751_v17  ;;  %v800_v61 = vsel %vm790_vm3, %v419_v41, %v601_v35  ;;  %v717_v18 = vpop.permute.xlu2 %716  ;;  %v491_v17 = vsel %vm404_vm1, 0.0, %v423_v31  ;;  %v496_v35 = vsel %vm404_vm1, 0.0, %v438_v27 }
  0xd1   : > { %891 = vst.msk [vmem:[#allocation2 + $0xf0] sm:$0xff] %vm856_vm2, %v852_v38  ;;  %v1391_v39 = vld [vmem:[#allocation2 + $0x50] sm:$0xff] }
  0xd2   : > { %2006 = vmatmul.msk.f32.gmra.mxu0 %vm856_vm2, %v1390_v55  ;;  %2072 = vmatmul.msk.f32.gmra.mxu2 %vm856_vm2, %v1391_v39 }
  0xd3   : > { %2040 = vmatmul.msk.f32.gmra.mxu1 %vm856_vm2, %v1390_v55 }
  0xd7   : > { %v713_v2 = vpop.permute.xlu0 %712  ;;  %v753_v34 = vpop.permute.xlu1 %752 }
  0xd8   : > { %v833_v7 = vsel %vm823_vm4, %v800_v61, %v713_v2  ;;  %v853_v44 = vsel %vm823_vm4, %v820_v30, %v753_v34  ;;  %v2702_v49 = vld [vmem:[#allocation2 + $0xf0] sm:$0xff]  ;;  %v627_v9 = vpop.permute.xlu2 %626  ;;  %v440_v2 = vsel %vm404_vm1, %v438_v27, %v439_v42 }
  0xd9   : > { %872 = vst.msk [vmem:[#allocation2 + $0x58] sm:$0xff] %vm856_vm2, %v833_v7  ;;  %2027 = vmatmul.msk.f32.gmra.mxu3 %vm856_vm2, %v2702_v49  ;;  %v813_v48 = vsel %vm790_vm3, %v496_v35, %v627_v9 }
  0xda   : > { %892 = vst.msk [vmem:[#allocation2 + $0xf8] sm:$0xff] %vm856_vm2, %v853_v44  ;;  %2007 = vmatmul.msk.f32.gmra.mxu0 %vm856_vm2, %v1391_v39 }
  0xdb   : > { %2041 = vmatmul.msk.f32.gmra.mxu1 %vm856_vm2, %v1391_v39 }
  0xdf   : > { %v643_v20 = vpop.permute.xlu0 %642  ;;  %v715_v63 = vpop.permute.xlu1 %714 }
  0xe0   : > { %v821_v6 = vsel %vm790_vm3, %v500_v58, %v643_v20  ;;  %v834_v22 = vsel %vm823_vm4, %v801_v60, %v715_v63  ;;  %v939_v4 = vld [vmem:[#allocation2 + $0x58] sm:$0xff]  ;;  %v609_v32 = vpop.permute.xlu2 %608  ;;  %v2779_v20 = vpop.f32.mrf.mxu1  ;;  %v427_v63 = vrot.slane %v2498_v26, 7 }
  0xe1   : > { %873 = vst.msk [vmem:[#allocation2 + $0x60] sm:$0xff] %vm856_vm2, %v834_v22  ;;  %v854_v36 = vsel %vm823_vm4, %v821_v6, %v755_v54  ;;  %v2718_v3 = vld [vmem:[#allocation2 + $0xf8] sm:$0xff]  ;;  %2073 = vmatmul.msk.f32.gmra.mxu2 %vm856_vm2, %v939_v4  ;;  %v424_v54 = vrot.slane %v2441_v19, 7 }
  0xe2   : > { %893 = vst.msk [vmem:[#allocation2 + $0x100] sm:$0xff] %vm856_vm2, %v854_v36  ;;  %2008 = vmatmul.msk.f32.gmra.mxu0 %vm856_vm2, %v939_v4  ;;  %2028 = vmatmul.msk.f32.gmra.mxu3 %vm856_vm2, %v2718_v3 }
  0xe3   : > { %2042 = vmatmul.msk.f32.gmra.mxu1 %vm856_vm2, %v939_v4  ;;  %v425_v30 = vsel %vm404_vm1, %v423_v31, %v424_v54 }
  0xe4   : > { %v804_v34 = vsel %vm790_vm3, %v425_v30, %v609_v32  ;;  %v432_v32 = vrot.slane %v2579_v5, 7 }
  0xe6   : > { %v494_v5 = vsel %vm404_vm1, 0.0, %v432_v32 }
  0xe7   : > { %v605_v12 = vpop.permute.xlu0 %604  ;;  %v645_v10 = vpop.permute.xlu1 %644 }
  0xe8   : > { %v802_v0 = vsel %vm790_vm3, %v422_v45, %v605_v12  ;;  %v940_v51 = vld [vmem:[#allocation2 + $0x60] sm:$0xff]  ;;  %v822_v8 = vsel %vm790_vm3, %v452_v25, %v645_v10  ;;  %v741_v61 = vpop.permute.xlu2 %740  ;;  %v429_v45 = vrot.slane %v2539_v14, 7 }
  0xe9   : > { %v835_v59 = vsel %vm823_vm4, %v802_v0, %v717_v18  ;;  %2074 = vmatmul.msk.f32.gmra.mxu2 %vm856_vm2, %v940_v51  ;;  %v2732_v15 = vld [vmem:[#allocation2 + $0x100] sm:$0xff]  ;;  %v426_v18 = vrot.slane %v2496_v24, 7 }
  0xea   : > { %874 = vst.msk [vmem:[#allocation2 + $0x68] sm:$0xff] %vm856_vm2, %v835_v59  ;;  %2009 = vmatmul.msk.f32.gmra.mxu0 %vm856_vm2, %v940_v51  ;;  %2029 = vmatmul.msk.f32.gmra.mxu3 %vm856_vm2, %v2732_v15  ;;  %v493_v12 = vsel %vm404_vm1, 0.0, %v429_v45  ;;  %v1291_v59 = vpop.f32.mrf.mxu1 }
  0xeb   : > { %2043 = vmatmul.msk.f32.gmra.mxu1 %vm856_vm2, %v940_v51  ;;  %v492_v60 = vsel %vm404_vm1, 0.0, %v426_v18  ;;  %v428_v26 = vsel %vm404_vm1, %v426_v18, %v427_v63  ;;  %v436_v18 = vrot.slane %v2608_v43, 7 }
  0xef   : > { %v757_v1 = vpop.permute.xlu0 %756  ;;  %v607_v28 = vpop.permute.xlu1 %606 }
  0xf0   : > { %v855_v55 = vsel %vm823_vm4, %v822_v8, %v757_v1  ;;  %v803_v38 = vsel %vm790_vm3, %v491_v17, %v607_v28  ;;  %v613_v58 = vpop.permute.xlu2 %612  ;;  %v430_v1 = vrot.slane %v2528_v62, 7 }
  0xf1   : > { %894 = vst.msk [vmem:[#allocation2 + $0x108] sm:$0xff] %vm856_vm2, %v855_v55  ;;  %v941_v40 = vld [vmem:[#allocation2 + $0x68] sm:$0xff]  ;;  %v806_v9 = vsel %vm790_vm3, %v428_v26, %v613_v58 }
  0xf2   : > { %2010 = vmatmul.msk.f32.gmra.mxu0 %vm856_vm2, %v941_v40  ;;  %2075 = vmatmul.msk.f32.gmra.mxu2 %vm856_vm2, %v941_v40  ;;  %v431_v28 = vsel %vm404_vm1, %v429_v45, %v430_v1 }
  0xf3   : > { %2044 = vmatmul.msk.f32.gmra.mxu1 %vm856_vm2, %v941_v40 }
  0xf7   : > { %v719_v21 = vpop.permute.xlu0 %718  ;;  %v739_v50 = vpop.permute.xlu1 %738 }
  0xf8   : > { %v836_v53 = vsel %vm823_vm4, %v803_v38, %v719_v21  ;;  %v846_v39 = vsel %vm823_vm4, %v813_v48, %v739_v50  ;;  %v2755_v41 = vld [vmem:[#allocation2 + $0x108] sm:$0xff]  ;;  %v727_v10 = vpop.permute.xlu2 %726  ;;  %v433_v38 = vrot.slane %v2581_v16, 7 }
  0xf9   : > { %875 = vst.msk [vmem:[#allocation2 + $0x70] sm:$0xff] %vm856_vm2, %v836_v53  ;;  %2030 = vmatmul.msk.f32.gmra.mxu3 %vm856_vm2, %v2755_v41 }
  0xfa   : > { %885 = vst.msk [vmem:[#allocation2 + $0xc0] sm:$0xff] %vm856_vm2, %v846_v39  ;;  %v434_v50 = vsel %vm404_vm1, %v432_v32, %v433_v38 }
  0xff   : > { %v629_v7 = vpop.permute.xlu0 %628  ;;  %v721_v19 = vpop.permute.xlu1 %720 }
 0x100   : > { %v814_v44 = vsel %vm790_vm3, %v440_v2, %v629_v7  ;;  %v837_v47 = vsel %vm823_vm4, %v804_v34, %v721_v19  ;;  %v942_v56 = vld [vmem:[#allocation2 + $0x70] sm:$0xff]  ;;  %v619_v55 = vpop.permute.xlu2 %618  ;;  %v435_v34 = vrot.slane %v2606_v29, 7 }
 0x101   : > { %876 = vst.msk [vmem:[#allocation2 + $0x78] sm:$0xff] %vm856_vm2, %v837_v47  ;;  %v847_v52 = vsel %vm823_vm4, %v814_v44, %v741_v61  ;;  %2011 = vmatmul.msk.f32.gmra.mxu0 %vm856_vm2, %v942_v56  ;;  %2045 = vmatmul.msk.f32.gmra.mxu1 %vm856_vm2, %v942_v56  ;;  %v2771_v57 = vld [vmem:[#allocation2 + $0xc0] sm:$0xff]  ;;  %v809_v21 = vsel %vm790_vm3, %v494_v5, %v619_v55 }
 0x102   : > { %886 = vst.msk [vmem:[#allocation2 + $0xc8] sm:$0xff] %vm856_vm2, %v847_v52  ;;  %2055 = vmatmul.msk.f32.vlgmr.msrb.gmra.mxu3 %vm856_vm2, %v2771_v57  ;;  %2076 = vmatmul.msk.f32.gmra.mxu2 %vm856_vm2, %v942_v56  ;;  %v495_v29 = vsel %vm404_vm1, 0.0, %v435_v34  ;;  %v437_v43 = vsel %vm404_vm1, %v435_v34, %v436_v18 }
 0x107   : > { %v611_v6 = vpop.permute.xlu0 %610  ;;  %v723_v22 = vpop.permute.xlu1 %722 }
 0x108   : > { %v805_v4 = vsel %vm790_vm3, %v492_v60, %v611_v6  ;;  %v943_v36 = vld [vmem:[#allocation2 + $0x78] sm:$0xff]  ;;  %v733_v54 = vpop.permute.xlu2 %732 }
 0x109   : > { %v838_v24 = vsel %vm823_vm4, %v805_v4, %v723_v22  ;;  %2012 = vmatmul.msk.f32.gmra.mxu0 %vm856_vm2, %v943_v36  ;;  %2046 = vmatmul.msk.f32.gmra.mxu1 %vm856_vm2, %v943_v36  ;;  %v2786_v37 = vld [vmem:[#allocation2 + $0xc8] sm:$0xff] }
 0x10a   : > { %877 = vst.msk [vmem:[#allocation2 + $0x80] sm:$0xff] %vm856_vm2, %v838_v24  ;;  %2077 = vmatmul.msk.f32.gmra.mxu2 %vm856_vm2, %v943_v36  ;;  %2056 = vmatmul.msk.f32.gmra.mxu3 %vm856_vm2, %v2786_v37 }
 0x10f   : > { %v725_v0 = vpop.permute.xlu0 %724  ;;  %v615_v13 = vpop.permute.xlu1 %614 }
 0x110   : > { %v839_v51 = vsel %vm823_vm4, %v806_v9, %v725_v0  ;;  %v807_v14 = vsel %vm790_vm3, %v493_v12, %v615_v13  ;;  %v625_v22 = vpop.permute.xlu2 %624 }
 0x111   : > { %878 = vst.msk [vmem:[#allocation2 + $0x88] sm:$0xff] %vm856_vm2, %v839_v51  ;;  %v944_v25 = vld [vmem:[#allocation2 + $0x80] sm:$0xff]  ;;  %v840_v8 = vsel %vm823_vm4, %v807_v14, %v727_v10  ;;  %v812_v24 = vsel %vm790_vm3, %v437_v43, %v625_v22 }
 0x112   : > { %2013 = vmatmul.msk.f32.gmra.mxu0 %vm856_vm2, %v944_v25  ;;  %2047 = vmatmul.msk.f32.gmra.mxu1 %vm856_vm2, %v944_v25  ;;  %879 = vst.msk [vmem:[#allocation2 + $0x90] sm:$0xff] %vm856_vm2, %v840_v8 }
 0x113   : > { %2057 = vmatmul.msk.f32.gmra.mxu3 %vm856_vm2, %v2600_v23  ;;  %2078 = vmatmul.msk.f32.gmra.mxu2 %vm856_vm2, %v944_v25 }
 0x116   : > { %v1079_v31 = vpop.f32.mrf.mxu0  ;;  %v1294_v48 = vpop.f32.mrf.mxu1 }
 0x117   : > { %v617_v27 = vpop.permute.xlu0 %616  ;;  %v729_v40 = vpop.permute.xlu1 %728  ;;  %v1289_v7 = vadd.f32 %v2779_v20, %v1079_v31 }
 0x118   : > { %v945_v62 = vld [vmem:[#allocation2 + $0x88] sm:$0xff]  ;;  %v808_v17 = vsel %vm790_vm3, %v431_v28, %v617_v27 }
 0x119   : > { %v841_v35 = vsel %vm823_vm4, %v808_v17, %v729_v40  ;;  %v946_v39 = vld [vmem:[#allocation2 + $0x90] sm:$0xff] }
 0x11a   : > { %2014 = vmatmul.msk.f32.gmra.mxu0 %vm856_vm2, %v945_v62  ;;  %2048 = vmatmul.msk.f32.gmra.mxu1 %vm856_vm2, %v945_v62  ;;  %880 = vst.msk [vmem:[#allocation2 + $0x98] sm:$0xff] %vm856_vm2, %v841_v35 }
 0x11b   : > { %2058 = vmatmul.msk.f32.gmra.mxu3 %vm856_vm2, %v2643_v46  ;;  %2079 = vmatmul.msk.f32.gmra.mxu2 %vm856_vm2, %v945_v62 }
 0x11f   : > { %v1082_v53 = vpop.f32.mrf.mxu0  ;;  %v731_v42 = vpop.permute.xlu0 %730 }
 0x120   : > { %v621_v61 = vpop.permute.xlu1 %620  ;;  %v842_v16 = vsel %vm823_vm4, %v809_v21, %v731_v42  ;;  %v1297_v44 = vpop.f32.mrf.mxu1  ;;  %v1292_v6 = vadd.f32 %v1291_v59, %v1082_v53 }
 0x121   : > { %v810_v30 = vsel %vm790_vm3, %v434_v50, %v621_v61  ;;  %881 = vst.msk [vmem:[#allocation2 + $0xa0] sm:$0xff] %vm856_vm2, %v842_v16  ;;  %v947_v52 = vld [vmem:[#allocation2 + $0x98] sm:$0xff] }
 0x122   : > { %2015 = vmatmul.msk.f32.gmra.mxu0 %vm856_vm2, %v946_v39  ;;  %2049 = vmatmul.msk.f32.gmra.mxu1 %vm856_vm2, %v946_v39  ;;  %v843_v2 = vsel %vm823_vm4, %v810_v30, %v733_v54 }
 0x123   : > { %2059 = vmatmul.msk.f32.gmra.mxu3 %vm856_vm2, %v2665_v11  ;;  %2080 = vmatmul.msk.f32.gmra.mxu2 %vm856_vm2, %v946_v39  ;;  %882 = vst.msk [vmem:[#allocation2 + $0xa8] sm:$0xff] %vm856_vm2, %v843_v2 }
 0x124   : > { %v1534_v19 = vpop.f32.mrf.mxu2 }
 0x125   : > { %v2840_v47 = vadd.f32 %v1534_v19, %v1289_v7 }
 0x127   : > { %1865 = vst.msk [vmem:[%s2838_s28] sm:$0xff] %vm790_vm3, %v2840_v47  ;;  %v1085_v56 = vpop.f32.mrf.mxu0  ;;  %v623_v58 = vpop.permute.xlu0 %622 }
 0x128   : > { %v735_v60 = vpop.permute.xlu1 %734  ;;  %v811_v20 = vsel %vm790_vm3, %v495_v29, %v623_v58  ;;  %v1300_v45 = vpop.f32.mrf.mxu1  ;;  %v948_v9 = vld [vmem:[#allocation2 + $0xa0] sm:$0xff]  ;;  %v1295_v0 = vadd.f32 %v1294_v48, %v1085_v56  ;;  %v1415_v56 = vld [vmem:[#allocation2 + $0x110] sm:$0xff] }
 0x129   : > { %v844_v63 = vsel %vm823_vm4, %v811_v20, %v735_v60 }
 0x12a   : > { %2016 = vmatmul.msk.f32.gmra.mxu0 %vm856_vm2, %v947_v52  ;;  %2050 = vmatmul.msk.f32.gmra.mxu1 %vm856_vm2, %v947_v52  ;;  %883 = vst.msk [vmem:[#allocation2 + $0xb0] sm:$0xff] %vm856_vm2, %v844_v63  ;;  %v949_v59 = vld [vmem:[#allocation2 + $0xa8] sm:$0xff] }
 0x12b   : > { %2060 = vmatmul.msk.f32.gmra.mxu3 %vm856_vm2, %v2679_v33  ;;  %2081 = vmatmul.msk.f32.gmra.mxu2 %vm856_vm2, %v947_v52 }
 0x12c   : > { %v1537_v4 = vpop.f32.mrf.mxu2 }
 0x12d   : > { %v2856_v36 = vadd.f32 %v1537_v4, %v1292_v6 }
 0x12e   : > { %v2879_v1 = vpop.f32.mrf.mxu3 }
 0x12f   : > { %1866 = vst.msk [vmem:[%s2838_s28 + $0x8] sm:$0xff] %vm790_vm3, %v2856_v36  ;;  %v1088_v26 = vpop.f32.mrf.mxu0  ;;  %v737_v12 = vpop.permute.xlu0 %736 }
 0x130   : > { %v845_v10 = vsel %vm823_vm4, %v812_v24, %v737_v12  ;;  %v1303_v25 = vpop.f32.mrf.mxu1  ;;  %v1298_v8 = vadd.f32 %v1297_v44, %v1088_v26 }
 0x131   : > { %884 = vst.msk [vmem:[#allocation2 + $0xb8] sm:$0xff] %vm856_vm2, %v845_v10  ;;  %v950_v27 = vld [vmem:[#allocation2 + $0xb0] sm:$0xff] }
 0x132   : > { %2017 = vmatmul.msk.f32.gmra.mxu0 %vm856_vm2, %v948_v9  ;;  %2051 = vmatmul.msk.f32.gmra.mxu1 %vm856_vm2, %v948_v9 }
 0x133   : > { %2061 = vmatmul.msk.f32.gmra.mxu3 %vm856_vm2, %v2702_v49  ;;  %2082 = vmatmul.msk.f32.gmra.mxu2 %vm856_vm2, %v948_v9 }
 0x134   : > { %v1540_v13 = vpop.f32.mrf.mxu2 }
 0x135   : > { %v2869_v51 = vadd.f32 %v1540_v13, %v1295_v0 }
 0x137   : > { %1867 = vst.msk [vmem:[%s2838_s28 + $0x10] sm:$0xff] %vm790_vm3, %v2869_v51  ;;  %v1091_v14 = vpop.f32.mrf.mxu0 }
 0x138   : > { %v1301_v40 = vadd.f32 %v1300_v45, %v1091_v14  ;;  %v1306_v32 = vpop.f32.mrf.mxu1  ;;  %v951_v48 = vld [vmem:[#allocation2 + $0xb8] sm:$0xff] }
 0x13a   : > { %2018 = vmatmul.msk.f32.gmra.mxu0 %vm856_vm2, %v949_v59  ;;  %2052 = vmatmul.msk.f32.gmra.mxu1 %vm856_vm2, %v949_v59 }
 0x13b   : > { %2062 = vmatmul.msk.f32.gmra.mxu3 %vm856_vm2, %v2718_v3  ;;  %2083 = vmatmul.msk.f32.gmra.mxu2 %vm856_vm2, %v949_v59 }
 0x13c   : > { %v1543_v28 = vpop.f32.mrf.mxu2  ;;  %v2891_v62 = vpop.f32.mrf.mxu3 }
 0x13d   : > { %v2881_v55 = vadd.f32 %v1543_v28, %v1298_v8 }
 0x13f   : > { %1868 = vst.msk [vmem:[%s2838_s28 + $0x18] sm:$0xff] %vm790_vm3, %v2881_v55  ;;  %v1094_v31 = vpop.f32.mrf.mxu0 }
 0x140   : > { %v1304_v5 = vadd.f32 %v1303_v25, %v1094_v31  ;;  %v1309_v21 = vpop.f32.mrf.mxu1 }
 0x142   : > { %2019 = vmatmul.msk.f32.gmra.mxu0 %vm856_vm2, %v950_v27  ;;  %2053 = vmatmul.msk.f32.gmra.mxu1 %vm856_vm2, %v950_v27 }
 0x143   : > { %2084 = vmatmul.msk.f32.gmra.mxu2 %vm856_vm2, %v950_v27  ;;  %2090 = vmatmul.msk.f32.vlgmr.msra.gmra.mxu3 %vm856_vm2, %v2665_v11 }
 0x144   : > { %v1546_v17 = vpop.f32.mrf.mxu2 }
 0x145   : > { %v2893_v35 = vadd.f32 %v1546_v17, %v1301_v40  ;;  %v2905_v53 = vpop.f32.mrf.mxu3 }
 0x147   : > { %1869 = vst.msk [vmem:[%s2838_s28 + $0x20] sm:$0xff] %vm790_vm3, %v2893_v35  ;;  %v1097_v38 = vpop.f32.mrf.mxu0 }
 0x148   : > { %v1312_v61 = vpop.f32.mrf.mxu1 }
 0x14a   : > { %2020 = vmatmul.msk.f32.gmra.mxu0 %vm856_vm2, %v951_v48  ;;  %2054 = vmatmul.msk.f32.gmra.mxu1 %vm856_vm2, %v951_v48 }
 0x14b   : > { %2085 = vmatmul.msk.f32.gmra.mxu2 %vm856_vm2, %v951_v48  ;;  %2091 = vmatmul.msk.f32.gmra.mxu3 %vm856_vm2, %v2679_v33  ;;  %v1307_v33 = vadd.f32 %v1306_v32, %v1097_v38 }
 0x14c   : > { %v1549_v11 = vpop.f32.mrf.mxu2 }
 0x14d   : > { %v2903_v50 = vadd.f32 %v1549_v11, %v1304_v5  ;;  %v2918_v16 = vpop.f32.mrf.mxu3 }
 0x14f   : > { %1870 = vst.msk [vmem:[%s2838_s28 + $0x28] sm:$0xff] %vm790_vm3, %v2903_v50  ;;  %v1100_v39 = vpop.f32.mrf.mxu0 }
 0x150   : > { %v1310_v34 = vadd.f32 %v1309_v21, %v1100_v39 }
 0x152   : > { %2021 = vmatmul.msk.f32.gmra.mxu0 %vm856_vm2, %v2771_v57 }
 0x153   : > { %2086 = vmatmul.msk.f32.gmra.mxu2 %vm856_vm2, %v2771_v57  ;;  %2092 = vmatmul.msk.f32.gmra.mxu3 %vm856_vm2, %v2702_v49  ;;  %v1315_v57 = vpop.f32.mrf.mxu1 }
 0x155   : > { %v1552_v54 = vpop.f32.mrf.mxu2 }
 0x156   : > { %v2916_v42 = vadd.f32 %v1552_v54, %v1307_v33 }
 0x157   : > { %v1103_v30 = vpop.f32.mrf.mxu0 }
 0x158   : > { %1871 = vst.msk [vmem:[%s2838_s28 + $0x30] sm:$0xff] %vm790_vm3, %v2916_v42 }
 0x15a   : > { %2022 = vmatmul.msk.f32.gmra.mxu0 %vm856_vm2, %v2786_v37 }
 0x15b   : > { %2087 = vmatmul.msk.f32.gmra.mxu2 %vm856_vm2, %v2786_v37  ;;  %2093 = vmatmul.msk.f32.gmra.mxu3 %vm856_vm2, %v2718_v3  ;;  %v1313_v3 = vadd.f32 %v1312_v61, %v1103_v30  ;;  %v1318_v44 = vpop.f32.mrf.mxu1 }
 0x15c   : > { %v2929_v49 = vpop.f32.mrf.mxu3 }
 0x15f   : > { %v1106_v2 = vpop.f32.mrf.mxu0 }
 0x160   : > { %v1316_v52 = vadd.f32 %v1315_v57, %v1106_v2 }
 0x163   : > { %2088 = vmatmul.msk.f32.gmra.mxu2 %vm856_vm2, %v2600_v23  ;;  %2094 = vmatmul.msk.f32.gmra.mxu3 %vm856_vm2, %v2732_v15  ;;  %v1321_v58 = vpop.f32.mrf.mxu1 }
 0x164   : > { %v1555_v7 = vpop.f32.mrf.mxu2 }
 0x165   : > { %v2935_v19 = vadd.f32 %v1555_v7, %v1310_v34  ;;  %v2940_v37 = vpop.f32.mrf.mxu3 }
 0x167   : > { %1872 = vst.msk [vmem:[%s2838_s28 + $0x38] sm:$0xff] %vm790_vm3, %v2935_v19  ;;  %v1109_v23 = vpop.f32.mrf.mxu0 }
 0x168   : > { %v1319_v22 = vadd.f32 %v1318_v44, %v1109_v23 }
 0x16b   : > { %2089 = vmatmul.msk.f32.gmra.mxu2 %vm856_vm2, %v2643_v46  ;;  %2095 = vmatmul.msk.f32.gmra.mxu3 %vm856_vm2, %v2755_v41  ;;  %v1416_v41 = vld [vmem:[#allocation2 + $0x118] sm:$0xff]  ;;  %v1324_v43 = vpop.f32.mrf.mxu1 }
 0x16c   : > { %v1558_v29 = vpop.f32.mrf.mxu2 }
 0x16d   : > { %v2946_v15 = vadd.f32 %v1558_v29, %v1313_v3  ;;  %v2952_v18 = vpop.f32.mrf.mxu3 }
 0x16f   : > { %1873 = vst.msk [vmem:[%s2838_s28 + $0x40] sm:$0xff] %vm790_vm3, %v2946_v15  ;;  %v1112_v46 = vpop.f32.mrf.mxu0 }
 0x170   : > { %v1322_v12 = vadd.f32 %v1321_v58, %v1112_v46 }
 0x173   : > { %2096 = vmatmul.msk.f32.gmra.mxu3 %vm856_vm2, %v1415_v56  ;;  %v1327_v9 = vpop.f32.mrf.mxu1 }
 0x175   : > { %v1561_v60 = vpop.f32.mrf.mxu2 }
 0x176   : > { %v2954_v20 = vadd.f32 %v1561_v60, %v1316_v52 }
 0x178   : > { %1874 = vst.msk [vmem:[%s2838_s28 + $0x48] sm:$0xff] %vm790_vm3, %v2954_v20 }
 0x17b   : > { %2097 = vmatmul.msk.f32.gmra.mxu3 %vm856_vm2, %v1416_v41 }
 0x17c   : > { %v2960_v63 = vpop.f32.mrf.mxu3 }
 0x17e   : > { %v1115_v6 = vpop.f32.mrf.mxu0  ;;  %v1330_v59 = vpop.f32.mrf.mxu1 }
 0x17f   : > { %v1325_v25 = vadd.f32 %v1324_v43, %v1115_v6  ;;  %v1663_v43 = vsel %vm790_vm3, %v2856_v36, 0.0 }
 0x185   : > { %v1360_v4 = vpop.f32.mrf.mxu3  ;;  %v1564_v24 = vpop.f32.mrf.mxu2 }
 0x186   : > { %v2962_v45 = vadd.f32 %v1564_v24, %v1319_v22  ;;  %v1118_v26 = vpop.f32.mrf.mxu0  ;;  %v1333_v40 = vpop.f32.mrf.mxu1  ;;  %v1662_v24 = vsel %vm790_vm3, %v2840_v47, 0.0 }
 0x187   : > { %v1328_v32 = vadd.f32 %v1327_v9, %v1118_v26  ;;  %v1665_v26 = vsel %vm790_vm3, %v2869_v51, 0.0  ;;  %v1361_v9 = vadd.f32 %v1360_v4, %v2879_v1  ;;  %v1671_v1 = vsel %vm790_vm3, %v2903_v50, 0.0 }
 0x188   : > { %1875 = vst.msk [vmem:[%s2838_s28 + $0x50] sm:$0xff] %vm790_vm3, %v2962_v45 }
 0x18d   : > { %v1567_v10 = vpop.f32.mrf.mxu2  ;;  %v2967_v0 = vpop.f32.mrf.mxu3 }
 0x18e   : > { %v2969_v13 = vadd.f32 %v1567_v10, %v1322_v12  ;;  %v1664_v10 = vadd.f32 %v1663_v43, %v1662_v24 }
 0x18f   : > { %v1121_v14 = vpop.f32.mrf.mxu0  ;;  %v1336_v21 = vpop.f32.mrf.mxu1 }
 0x190   : > { %1876 = vst.msk [vmem:[%s2838_s28 + $0x58] sm:$0xff] %vm790_vm3, %v2969_v13  ;;  %v1331_v11 = vadd.f32 %v1330_v59, %v1121_v14 }
 0x196   : > { %v2974_v8 = vpop.f32.mrf.mxu3  ;;  %v1570_v28 = vpop.f32.mrf.mxu2 }
 0x197   : > { %v2976_v31 = vadd.f32 %v1570_v28, %v1325_v25  ;;  %v1124_v27 = vpop.f32.mrf.mxu0  ;;  %v1339_v34 = vpop.f32.mrf.mxu1  ;;  %v1667_v25 = vsel %vm790_vm3, %v2881_v55, 0.0  ;;  %v1367_v43 = vadd.f32 %v2974_v8, %v2905_v53 }
 0x198   : > { %v1334_v61 = vadd.f32 %v1333_v40, %v1124_v27  ;;  %v1666_v40 = vadd.f32 %v1665_v26, %v1664_v10  ;;  %v1683_v10 = vsel %vm790_vm3, %v2969_v13, 0.0 }
 0x199   : > { %1877 = vst.msk [vmem:[%s2838_s28 + $0x60] sm:$0xff] %vm790_vm3, %v2976_v31 }
 0x19e   : > { %v2981_v17 = vpop.f32.mrf.mxu3  ;;  %v1573_v38 = vpop.f32.mrf.mxu2 }
 0x19f   : > { %v2983_v48 = vadd.f32 %v1573_v38, %v1328_v32  ;;  %v1127_v5 = vpop.f32.mrf.mxu0  ;;  %v1342_v52 = vpop.f32.mrf.mxu1  ;;  %v1669_v32 = vsel %vm790_vm3, %v2893_v35, 0.0  ;;  %v1668_v38 = vadd.f32 %v1667_v25, %v1666_v40 }
 0x1a0   : > { %v1337_v3 = vadd.f32 %v1336_v21, %v1127_v5  ;;  %v1364_v21 = vadd.f32 %v2967_v0, %v2891_v62  ;;  %v1679_v0 = vsel %vm790_vm3, %v2954_v20, 0.0 }
 0x1a1   : > { %1878 = vst.msk [vmem:[%s2838_s28 + $0x68] sm:$0xff] %vm790_vm3, %v2983_v48  ;;  %v1670_v5 = vadd.f32 %v1669_v32, %v1668_v38  ;;  %v1685_v32 = vsel %vm790_vm3, %v2976_v31, 0.0  ;;  %v1687_v8 = vsel %vm790_vm3, %v2983_v48, 0.0 }
 0x1a6   : > { %v2988_v39 = vpop.f32.mrf.mxu3  ;;  %v1576_v33 = vpop.f32.mrf.mxu2 }
 0x1a7   : > { %v2990_v54 = vadd.f32 %v1576_v33, %v1331_v11  ;;  %v1130_v30 = vpop.f32.mrf.mxu0  ;;  %v1345_v22 = vpop.f32.mrf.mxu1  ;;  %v1673_v11 = vsel %vm790_vm3, %v2916_v42, 0.0 }
 0x1a8   : > { %v1340_v58 = vadd.f32 %v1339_v34, %v1130_v30  ;;  %v1672_v30 = vadd.f32 %v1671_v1, %v1670_v5  ;;  %v1370_v1 = vadd.f32 %v2981_v17, %v2918_v16 }
 0x1a9   : > { %1879 = vst.msk [vmem:[%s2838_s28 + $0x70] sm:$0xff] %vm790_vm3, %v2990_v54 }
 0x1ae   : > { %v2995_v57 = vpop.f32.mrf.mxu3  ;;  %v1579_v2 = vpop.f32.mrf.mxu2 }
 0x1af   : > { %v2997_v7 = vadd.f32 %v1579_v2, %v1334_v61  ;;  %v1133_v29 = vpop.f32.mrf.mxu0  ;;  %v1348_v33 = vpop.f32.mrf.mxu1 }
 0x1b0   : > { %v1343_v12 = vadd.f32 %v1342_v52, %v1133_v29  ;;  %v1674_v52 = vadd.f32 %v1673_v11, %v1672_v30 }
 0x1b1   : > { %1880 = vst.msk [vmem:[%s2838_s28 + $0x78] sm:$0xff] %vm790_vm3, %v2997_v7 }
 0x1b6   : > { %v3002_v44 = vpop.f32.mrf.mxu3  ;;  %v1582_v23 = vpop.f32.mrf.mxu2 }
 0x1b7   : > { %v3004_v56 = vadd.f32 %v1582_v23, %v1337_v3  ;;  %v1136_v6 = vpop.f32.mrf.mxu0  ;;  %v1675_v3 = vsel %vm790_vm3, %v2935_v19, 0.0  ;;  %v1351_v40 = vpop.f32.mrf.mxu1 }
 0x1b8   : > { %v1346_v61 = vadd.f32 %v1345_v22, %v1136_v6  ;;  %v1676_v62 = vadd.f32 %v1675_v3, %v1674_v52  ;;  %v1681_v6 = vsel %vm790_vm3, %v2962_v45, 0.0 }
 0x1b9   : > { %1881 = vst.msk [vmem:[%s2838_s28 + $0x80] sm:$0xff] %vm790_vm3, %v3004_v56  ;;  %v1693_v52 = vsel %vm790_vm3, %v3004_v56, 0.0 }
 0x1be   : > { %v3009_v60 = vpop.f32.mrf.mxu3  ;;  %v1585_v46 = vpop.f32.mrf.mxu2 }
 0x1bf   : > { %v3011_v41 = vadd.f32 %v1585_v46, %v1340_v58  ;;  %v1139_v4 = vpop.f32.mrf.mxu0  ;;  %v1677_v58 = vsel %vm790_vm3, %v2946_v15, 0.0  ;;  %v1354_v17 = vpop.f32.mrf.mxu1 }
 0x1c0   : > { %v1678_v46 = vadd.f32 %v1677_v58, %v1676_v62  ;;  %v1349_v22 = vadd.f32 %v1348_v33, %v1139_v4  ;;  %v1689_v4 = vsel %vm790_vm3, %v2990_v54, 0.0 }
 0x1c1   : > { %1882 = vst.msk [vmem:[%s2838_s28 + $0x88] sm:$0xff] %vm790_vm3, %v3011_v41  ;;  %v1695_v58 = vsel %vm790_vm3, %v3011_v41, 0.0 }
 0x1c2   : > { %v1680_v26 = vadd.f32 %v1679_v0, %v1678_v46  ;;  %v1373_v0 = vadd.f32 %v2988_v39, %v2929_v49 }
 0x1c4   : > { %v1682_v25 = vadd.f32 %v1681_v6, %v1680_v26 }
 0x1c6   : > { %v1588_v14 = vpop.f32.mrf.mxu2  ;;  %v1606_v59 = vpop.f32.mrf.mxu3  ;;  %v1684_v53 = vadd.f32 %v1683_v10, %v1682_v25 }
 0x1c7   : > { %v3025_v28 = vadd.f32 %v1588_v14, %v1343_v12  ;;  %v3027_v27 = vadd.f32 %v1606_v59, %v1361_v9  ;;  %v1142_v24 = vpop.f32.mrf.mxu0 }
 0x1c8   : > { %v1686_v38 = vadd.f32 %v1685_v32, %v1684_v53  ;;  %v1352_v5 = vadd.f32 %v1351_v40, %v1142_v24  ;;  %v1357_v32 = vpop.f32.mrf.mxu1 }
 0x1c9   : > { %1883 = vst.msk [vmem:[%s2838_s28 + $0x90] sm:$0xff] %vm790_vm3, %v3025_v28  ;;  %v1697_v46 = vsel %vm790_vm3, %v3025_v28, 0.0 }
 0x1ca   : > { %1889 = vst.msk [vmem:[%s2838_s28 + $0xc0] sm:$0xff] %vm790_vm3, %v3027_v27  ;;  %v1688_v11 = vadd.f32 %v1687_v8, %v1686_v38  ;;  %v1376_v8 = vadd.f32 %v2995_v57, %v2940_v37  ;;  %v1709_v37 = vsel %vm790_vm3, %v3027_v27, 0.0 }
 0x1ce   : > { %v1591_v2 = vpop.f32.mrf.mxu2  ;;  %v1609_v34 = vpop.f32.mrf.mxu3 }
 0x1cf   : > { %v3045_v23 = vadd.f32 %v1591_v2, %v1346_v61  ;;  %v3047_v29 = vadd.f32 %v1609_v34, %v1364_v21  ;;  %v1691_v61 = vsel %vm790_vm3, %v2997_v7, 0.0  ;;  %v1690_v34 = vadd.f32 %v1689_v4, %v1688_v11  ;;  %v1145_v3 = vpop.f32.mrf.mxu0 }
 0x1d0   : > { %v1355_v6 = vadd.f32 %v1354_v17, %v1145_v3 }
 0x1d1   : > { %1884 = vst.msk [vmem:[%s2838_s28 + $0x98] sm:$0xff] %vm790_vm3, %v3045_v23  ;;  %v1692_v16 = vadd.f32 %v1691_v61, %v1690_v34  ;;  %v1699_v26 = vsel %vm790_vm3, %v3045_v23, 0.0 }
 0x1d2   : > { %1890 = vst.msk [vmem:[%s2838_s28 + $0xc8] sm:$0xff] %vm790_vm3, %v3047_v29 }
 0x1d3   : > { %v1694_v62 = vadd.f32 %v1693_v52, %v1692_v16  ;;  %v1379_v52 = vadd.f32 %v3002_v44, %v2952_v18  ;;  %v1711_v16 = vsel %vm790_vm3, %v3047_v29, 0.0 }
 0x1d6   : > { %v1594_v9 = vpop.f32.mrf.mxu2  ;;  %v1612_v12 = vpop.f32.mrf.mxu3 }
 0x1d7   : > { %v3065_v14 = vadd.f32 %v1594_v9, %v1349_v22  ;;  %v3067_v59 = vadd.f32 %v1612_v12, %v1367_v43  ;;  %v1696_v43 = vadd.f32 %v1695_v58, %v1694_v62  ;;  %v1148_v39 = vpop.f32.mrf.mxu0 }
 0x1d8   : > { %v1358_v38 = vadd.f32 %v1357_v32, %v1148_v39 }
 0x1d9   : > { %1885 = vst.msk [vmem:[%s2838_s28 + $0xa0] sm:$0xff] %vm790_vm3, %v3065_v14  ;;  %v1698_v10 = vadd.f32 %v1697_v46, %v1696_v43  ;;  %v1701_v25 = vsel %vm790_vm3, %v3065_v14, 0.0  ;;  %v1713_v62 = vsel %vm790_vm3, %v3067_v59, 0.0 }
 0x1da   : > { %1891 = vst.msk [vmem:[%s2838_s28 + $0xd0] sm:$0xff] %vm790_vm3, %v3067_v59 }
 0x1db   : > { %v1700_v49 = vadd.f32 %v1699_v26, %v1698_v10 }
 0x1dd   : > { %v1702_v53 = vadd.f32 %v1701_v25, %v1700_v49 }
 0x1de   : > { %v1597_v21 = vpop.f32.mrf.mxu2  ;;  %v1615_v33 = vpop.f32.mrf.mxu3 }
 0x1df   : > { %v3085_v30 = vadd.f32 %v1597_v21, %v1352_v5  ;;  %v3087_v2 = vadd.f32 %v1615_v33, %v1370_v1 }
 0x1e1   : > { %1886 = vst.msk [vmem:[%s2838_s28 + $0xa8] sm:$0xff] %vm790_vm3, %v3085_v30  ;;  %v1703_v40 = vsel %vm790_vm3, %v3085_v30, 0.0 }
 0x1e2   : > { %1892 = vst.msk [vmem:[%s2838_s28 + $0xd8] sm:$0xff] %vm790_vm3, %v3087_v2  ;;  %v1704_v4 = vadd.f32 %v1703_v40, %v1702_v53 }
 0x1e6   : > { %v1600_v22 = vpop.f32.mrf.mxu2  ;;  %v1618_v24 = vpop.f32.mrf.mxu3 }
 0x1e7   : > { %v1652_v9 = vadd.f32 %v1600_v22, %v1355_v6  ;;  %v3105_v12 = vadd.f32 %v1618_v24, %v1373_v0  ;;  %v1715_v6 = vsel %vm790_vm3, %v3087_v2, 0.0  ;;  %v1382_v22 = vadd.f32 %v3009_v60, %v2960_v63 }
 0x1e9   : > { %1887 = vst.msk [vmem:[%s2838_s28 + $0xb0] sm:$0xff] %vm790_vm3, %v1652_v9  ;;  %v1705_v1 = vsel %vm790_vm3, %v1652_v9, 0.0  ;;  %v1717_v18 = vsel %vm790_vm3, %v3105_v12, 0.0 }
 0x1ea   : > { %1893 = vst.msk [vmem:[%s2838_s28 + $0xe0] sm:$0xff] %vm790_vm3, %v3105_v12  ;;  %v1706_v61 = vadd.f32 %v1705_v1, %v1704_v4 }
 0x1ee   : > { %v1603_v5 = vpop.f32.mrf.mxu2  ;;  %v1621_v11 = vpop.f32.mrf.mxu3 }
 0x1ef   : > { %v1653_v21 = vadd.f32 %v1603_v5, %v1358_v38  ;;  %v1659_v33 = vadd.f32 %v1621_v11, %v1376_v8 }
 0x1f1   : > { %v1707_v34 = vsel %vm790_vm3, %v1653_v21, 0.0  ;;  %1888 = vst.msk [vmem:[%s2838_s28 + $0xb8] sm:$0xff] %vm790_vm3, %v1653_v21  ;;  %v1719_v24 = vsel %vm790_vm3, %v1659_v33, 0.0 }
 0x1f2   : > { %v1708_v3 = vadd.f32 %v1707_v34, %v1706_v61  ;;  %1894 = vst.msk [vmem:[%s2838_s28 + $0xe8] sm:$0xff] %vm790_vm3, %v1659_v33 }
 0x1f4   : > { %v1710_v57 = vadd.f32 %v1709_v37, %v1708_v3 }
 0x1f6   : > { %v1712_v17 = vadd.f32 %v1711_v16, %v1710_v57  ;;  %v1624_v58 = vpop.f32.mrf.mxu3 }
 0x1f7   : > { %v1660_v0 = vadd.f32 %v1624_v58, %v1379_v52 }
 0x1f8   : > { %v1714_v46 = vadd.f32 %v1713_v62, %v1712_v17 }
 0x1f9   : > { %1895 = vst.msk [vmem:[%s2838_s28 + $0xf0] sm:$0xff] %vm790_vm3, %v1660_v0  ;;  %v1721_v25 = vsel %vm790_vm3, %v1660_v0, 0.0 }
 0x1fa   : > { %v1716_v43 = vadd.f32 %v1715_v6, %v1714_v46 }
 0x1fc   : > { %v1718_v44 = vadd.f32 %v1717_v18, %v1716_v43 }
 0x1fe   : > { %v1720_v26 = vadd.f32 %v1719_v24, %v1718_v44  ;;  %v1627_v10 = vpop.f32.mrf.mxu3 }
 0x1ff   : > { %v1661_v49 = vadd.f32 %v1627_v10, %v1382_v22 }
 0x200   : > { %v1722_v39 = vadd.f32 %v1721_v25, %v1720_v26 }
 0x201   : > { %v1723_v40 = vsel %vm790_vm3, %v1661_v49, 0.0  ;;  %1896 = vst.msk [vmem:[%s2838_s28 + $0xf8] sm:$0xff] %vm790_vm3, %v1661_v49 }
 0x202   : > { %v1724_v32 = vadd.f32 %v1723_v40, %v1722_v39 }
 0x204   : > { %v1725_v53 = vrot.slane %v1724_v32, 4 }
 0x206   : > { %v1726_v8 = vadd.f32 %v1725_v53, %v1724_v32 }
 0x208   : > { %v1727_v38 = vrot.slane %v1726_v8, 2 }
 0x20a   : > { %v1728_v1 = vadd.f32 %v1727_v38, %v1726_v8 }
 0x20c   : > { %v1729_v4 = vrot.slane %v1728_v1, 1 }
 0x20e   : > { %v1730_v63 = vadd.f32 %v1729_v4, %v1728_v1 }
 0x210   : > { %v3151_v60 = vmul.f32 0.00390625, %v1730_v63 }
 0x212   : > { %1898 = vst.msk [vmem:[%s3149_s6] sm:$0x1] %vm1897_vm5, %v3151_v60  ;;  %v3158_v5 = vsub.f32 %v3065_v14, %v3151_v60  ;;  %v3162_v11 = vsub.f32 %v3085_v30, %v3151_v60  ;;  %v3165_v61 = vsub.f32 %v1652_v9, %v3151_v60  ;;  %v3168_v34 = vsub.f32 %v1653_v21, %v3151_v60 }
 0x213   : > { %v3172_v3 = vsub.f32 %v3067_v59, %v3151_v60  ;;  %v3176_v37 = vsub.f32 %v3087_v2, %v3151_v60  ;;  %v3180_v14 = vsub.f32 %v3105_v12, %v3151_v60  ;;  %v3183_v30 = vsub.f32 %v1659_v33, %v3151_v60 }
 0x214   : > { %v3186_v9 = vsub.f32 %v1660_v0, %v3151_v60  ;;  %v3189_v21 = vsub.f32 %v1661_v49, %v3151_v60  ;;  %v1732_v59 = vsub.f32 %v2840_v47, %v3151_v60  ;;  %v1733_v2 = vsub.f32 %v2856_v36, %v3151_v60 }
 0x215   : > { %v1734_v57 = vsub.f32 %v2869_v51, %v3151_v60  ;;  %v1735_v12 = vsub.f32 %v2881_v55, %v3151_v60  ;;  %v1736_v16 = vsub.f32 %v2893_v35, %v3151_v60  ;;  %v1737_v58 = vsub.f32 %v2903_v50, %v3151_v60 }
 0x216   : > { %v1764_v33 = vmul.f32 %v1732_v59, %v1732_v59  ;;  %v1765_v52 = vmul.f32 %v1733_v2, %v1733_v2  ;;  %v1738_v51 = vsub.f32 %v2916_v42, %v3151_v60  ;;  %v1739_v35 = vsub.f32 %v2935_v19, %v3151_v60 }
 0x217   : > { %v1766_v17 = vmul.f32 %v1734_v57, %v1734_v57  ;;  %v1767_v62 = vmul.f32 %v1735_v12, %v1735_v12  ;;  %v1768_v46 = vmul.f32 %v1736_v16, %v1736_v16  ;;  %v1769_v43 = vmul.f32 %v1737_v58, %v1737_v58 }
 0x218   : > { %v1796_v47 = vsel %vm790_vm3, %v1764_v33, 0.0  ;;  %v1797_v36 = vsel %vm790_vm3, %v1765_v52, 0.0  ;;  %v1740_v44 = vsub.f32 %v2946_v15, %v3151_v60  ;;  %v1770_v22 = vmul.f32 %v1738_v51, %v1738_v51 }
 0x219   : > { %v1798_v0 = vadd.f32 %v1797_v36, %v1796_v47  ;;  %v1799_v55 = vsel %vm790_vm3, %v1766_v17, 0.0  ;;  %v1801_v18 = vsel %vm790_vm3, %v1767_v62, 0.0  ;;  %v1803_v24 = vsel %vm790_vm3, %v1768_v46, 0.0 }
 0x21a   : > { %v1741_v42 = vsub.f32 %v2954_v20, %v3151_v60  ;;  %v1771_v10 = vmul.f32 %v1739_v35, %v1739_v35  ;;  %v1805_v25 = vsel %vm790_vm3, %v1769_v43, 0.0  ;;  %v1742_v19 = vsub.f32 %v2962_v45, %v3151_v60 }
 0x21b   : > { %v1800_v6 = vadd.f32 %v1799_v55, %v1798_v0  ;;  %v1772_v39 = vmul.f32 %v1740_v44, %v1740_v44  ;;  %v1807_v40 = vsel %vm790_vm3, %v1770_v22, 0.0  ;;  %v1743_v15 = vsub.f32 %v2969_v13, %v3151_v60 }
 0x21c   : > { %v1773_v53 = vmul.f32 %v1741_v42, %v1741_v42  ;;  %v1809_v8 = vsel %vm790_vm3, %v1771_v10, 0.0  ;;  %v1744_v20 = vsub.f32 %v2976_v31, %v3151_v60  ;;  %v1774_v1 = vmul.f32 %v1742_v19, %v1742_v19 }
 0x21d   : > { %v1802_v50 = vadd.f32 %v1801_v18, %v1800_v6  ;;  %v1811_v4 = vsel %vm790_vm3, %v1772_v39, 0.0  ;;  %v1745_v45 = vsub.f32 %v2983_v48, %v3151_v60  ;;  %v1775_v59 = vmul.f32 %v1743_v15, %v1743_v15 }
 0x21e   : > { %v1813_v2 = vsel %vm790_vm3, %v1773_v53, 0.0  ;;  %v1746_v13 = vsub.f32 %v2990_v54, %v3151_v60  ;;  %v1776_v12 = vmul.f32 %v1744_v20, %v1744_v20  ;;  %v1815_v33 = vsel %vm790_vm3, %v1774_v1, 0.0 }
 0x21f   : > { %v1804_v26 = vadd.f32 %v1803_v24, %v1802_v50  ;;  %v1747_v31 = vsub.f32 %v2997_v7, %v3151_v60  ;;  %v1777_v16 = vmul.f32 %v1745_v45, %v1745_v45  ;;  %v1817_v17 = vsel %vm790_vm3, %v1775_v59, 0.0 }
 0x220   : > { %v1748_v48 = vsub.f32 %v3004_v56, %v3151_v60  ;;  %v1778_v62 = vmul.f32 %v1746_v13, %v1746_v13  ;;  %v1819_v47 = vsel %vm790_vm3, %v1776_v12, 0.0  ;;  %v1749_v54 = vsub.f32 %v3011_v41, %v3151_v60 }
 0x221   : > { %v1806_v49 = vadd.f32 %v1805_v25, %v1804_v26  ;;  %v1779_v0 = vmul.f32 %v1747_v31, %v1747_v31  ;;  %v1821_v51 = vsel %vm790_vm3, %v1777_v16, 0.0  ;;  %v1750_v7 = vsub.f32 %v3025_v28, %v3151_v60 }
 0x222   : > { %v1780_v55 = vmul.f32 %v1748_v48, %v1748_v48  ;;  %v1823_v6 = vsel %vm790_vm3, %v1778_v62, 0.0  ;;  %v1751_v56 = vsub.f32 %v3045_v23, %v3151_v60  ;;  %v1781_v43 = vmul.f32 %v1749_v54, %v1749_v54 }
 0x223   : > { %v1808_v32 = vadd.f32 %v1807_v40, %v1806_v49  ;;  %v1825_v18 = vsel %vm790_vm3, %v1779_v0, 0.0  ;;  %v1782_v44 = vmul.f32 %v1750_v7, %v1750_v7  ;;  %v1784_v28 = vmul.f32 %v3158_v5, %v3158_v5 }
 0x224   : > { %v1827_v41 = vsel %vm790_vm3, %v1780_v55, 0.0  ;;  %v1783_v24 = vmul.f32 %v1751_v56, %v1751_v56  ;;  %v1829_v26 = vsel %vm790_vm3, %v1781_v43, 0.0  ;;  %v1785_v23 = vmul.f32 %v3162_v11, %v3162_v11 }
 0x225   : > { %v1810_v38 = vadd.f32 %v1809_v8, %v1808_v32  ;;  %v1831_v10 = vsel %vm790_vm3, %v1782_v44, 0.0  ;;  %v1756_v39 = vsub.f32 %v3027_v27, %v3151_v60  ;;  %v1786_v40 = vmul.f32 %v3165_v61, %v3165_v61 }
 0x226   : > { %v1833_v49 = vsel %vm790_vm3, %v1783_v24, 0.0  ;;  %v1835_v32 = vsel %vm790_vm3, %v1784_v28, 0.0  ;;  %v1757_v5 = vsub.f32 %v3047_v29, %v3151_v60  ;;  %v1787_v53 = vmul.f32 %v3168_v34, %v3168_v34 }
 0x227   : > { %v1812_v63 = vadd.f32 %v1811_v4, %v1810_v38  ;;  %v1837_v11 = vsel %vm790_vm3, %v1785_v23, 0.0  ;;  %v1788_v38 = vmul.f32 %v1756_v39, %v1756_v39  ;;  %v1839_v20 = vsel %vm790_vm3, %v1786_v40, 0.0 }
 0x228   : > { %v1789_v27 = vmul.f32 %v1757_v5, %v1757_v5  ;;  %v1841_v4 = vsel %vm790_vm3, %v1787_v53, 0.0  ;;  %v1791_v60 = vmul.f32 %v3176_v37, %v3176_v37  ;;  %v1793_v12 = vmul.f32 %v3183_v30, %v3183_v30 }
 0x229   : > { %v1814_v57 = vadd.f32 %v1813_v2, %v1812_v63  ;;  %v1790_v63 = vmul.f32 %v3172_v3, %v3172_v3  ;;  %v1843_v45 = vsel %vm790_vm3, %v1788_v38, 0.0  ;;  %v1792_v2 = vmul.f32 %v3180_v14, %v3180_v14 }
 0x22a   : > { %v1845_v34 = vsel %vm790_vm3, %v1789_v27, 0.0  ;;  %v1849_v3 = vsel %vm790_vm3, %v1791_v60, 0.0  ;;  %v1795_v16 = vmul.f32 %v3189_v21, %v3189_v21  ;;  %v1853_v14 = vsel %vm790_vm3, %v1793_v12, 0.0 }
 0x22b   : > { %v1816_v52 = vadd.f32 %v1815_v33, %v1814_v57  ;;  %v1847_v57 = vsel %vm790_vm3, %v1790_v63, 0.0  ;;  %v1851_v37 = vsel %vm790_vm3, %v1792_v2, 0.0 }
 0x22c   : > { %v1857_v30 = vsel %vm790_vm3, %v1795_v16, 0.0 }
 0x22d   : > { %v1818_v58 = vadd.f32 %v1817_v17, %v1816_v52  ;;  %v1794_v52 = vmul.f32 %v3186_v9, %v3186_v9 }
 0x22f   : > { %v1820_v36 = vadd.f32 %v1819_v47, %v1818_v58  ;;  %v1855_v58 = vsel %vm790_vm3, %v1794_v52, 0.0 }
 0x231   : > { %v1822_v46 = vadd.f32 %v1821_v51, %v1820_v36 }
 0x233   : > { %v1824_v35 = vadd.f32 %v1823_v6, %v1822_v46 }
 0x235   : > { %v1826_v50 = vadd.f32 %v1825_v18, %v1824_v35 }
 0x237   : > { %v1828_v22 = vadd.f32 %v1827_v41, %v1826_v50 }
 0x239   : > { %v1830_v42 = vadd.f32 %v1829_v26, %v1828_v22 }
 0x23b   : > { %v1832_v25 = vadd.f32 %v1831_v10, %v1830_v42 }
 0x23d   : > { %v1834_v19 = vadd.f32 %v1833_v49, %v1832_v25 }
 0x23f   : > { %v1836_v15 = vadd.f32 %v1835_v32, %v1834_v19 }
 0x241   : > { %v1838_v8 = vadd.f32 %v1837_v11, %v1836_v15 }
 0x243   : > { %v1840_v1 = vadd.f32 %v1839_v20, %v1838_v8 }
 0x245   : > { %v1842_v61 = vadd.f32 %v1841_v4, %v1840_v1 }
 0x247   : > { %v1844_v29 = vadd.f32 %v1843_v45, %v1842_v61 }
 0x249   : > { %v1846_v59 = vadd.f32 %v1845_v34, %v1844_v29 }
 0x24b   : > { %v1848_v13 = vadd.f32 %v1847_v57, %v1846_v59 }
 0x24d   : > { %v1850_v33 = vadd.f32 %v1849_v3, %v1848_v13 }
 0x24f   : > { %v1852_v31 = vadd.f32 %v1851_v37, %v1850_v33 }
 0x251   : > { %v1854_v17 = vadd.f32 %v1853_v14, %v1852_v31 }
 0x253   : > { %v1856_v48 = vadd.f32 %v1855_v58, %v1854_v17 }
 0x255   : > { %v1858_v62 = vadd.f32 %v1857_v30, %v1856_v48 }
 0x257   : > { %v1859_v47 = vrot.slane %v1858_v62, 4 }
 0x259   : > { %v1860_v36 = vadd.f32 %v1859_v47, %v1858_v62 }
 0x25b   : > { %v1861_v54 = vrot.slane %v1860_v36, 2 }
 0x25d   : > { %v1862_v9 = vadd.f32 %v1861_v54, %v1860_v36 }
 0x25f   : > { %v1863_v0 = vrot.slane %v1862_v9, 1 }
 0x261   : > { %v1864_v51 = vadd.f32 %v1863_v0, %v1862_v9 }
 0x263   : > { %1899 = vst.msk [vmem:[%s3149_s6 + $0x1] sm:$0x1] %vm1897_vm5, %v1864_v51 }
 0x264 PF: > { %s16_s18 = sadd.s32 1, %s2130_s18  }
 0x265   : > { %p13_p4 = scmp.ge.s32.totalorder %s16_s18, 4  }
 0x267   :  { %15 = sbr.rel (!%p13_p4) target bundleno = 1 (0x1), region = 83 }

</bundles_post_ra>
